<compile_context>
chip_gen: v5e
topology: v5e:2x2
jax: 0.10.0
libtpu: 0.0.40
codegen_flags: <defaults>
</compile_context>

<pallas_src>
import jax
import jax.numpy as jnp
from jax import lax
from jax.experimental import pallas as pl
from jax.experimental.pallas import tpu as pltpu


def _convt_tap_kernel(x_ref, w_ref, b_ref, o_ref):
    """One grid step = rows [i*tm, (i+1)*tm) of x  X  weight tap kh (all kw folded).

    x_ref: (M, Cin) or (tm, Cin)   bf16  (resident activation, or this tile only)
    w_ref: (1, Cin, K*Cout)        bf16  (tap kh; columns ordered kw-major, c-minor)
    b_ref: (1, K*Cout)             f32   (bias tiled K times)
    o_ref: (th, 1, W, K*Cout)      f32
    """
    th, _, W, _ = o_ref.shape
    tm = th * W
    if x_ref.shape[0] == tm:                 # tiled-x path: block already selected
        xs = x_ref[...]
    else:                                    # fully-resident x: slice this tile's rows
        i = pl.program_id(1)
        start = pl.multiple_of(i * tm, tm)
        xs = x_ref[pl.ds(start, tm), :]
    acc = jnp.dot(xs, w_ref[0], preferred_element_type=jnp.float32)   # (tm, K*Cout) MXU
    acc = acc + b_ref[...]                                            # f32 bias
    acc = jax.nn.sigmoid(acc)                                         # f32 EUP epilogue
    # (tm, K*Cout) -> (th, 1, W, K*Cout): sublane split only, lane dim untouched.
    o_ref[...] = acc.reshape(o_ref.shape).astype(o_ref.dtype)


def conv_transpose_sigmoid(x, weight, bias, *, stride=5, kernel=5, padding=2,
                           tm_target=256, out_dtype=jnp.float32):
    """x: [N, Cin, H, W]  weight: [Cin, Cout, K, K]  bias: [Cout] -> [N, Cout, Ho, Wo]."""
    assert stride == kernel, "relies on stride == kernel_size (no overlap-add)"
    N, Cin, H, W = x.shape
    _, Cout, K, _ = weight.shape
    Ho = (H - 1) * stride - 2 * padding + kernel
    Wo = (W - 1) * stride - 2 * padding + kernel
    KC = K * Cout

    # Rows-per-tile: th*W ~= tm_target with th | H; keep >= 2 row tiles so the
    # v7x megacore split (on the "parallel" row axis) gives both cores work.
    th = max(1, min(H, tm_target // max(W, 1)))
    while H % th:
        th -= 1
    while th > 1 and (N * H) // th < 2:
        th -= 1
        while th > 1 and H % th:
            th -= 1
    tm = th * W
    NI = (N * H) // th
    M = N * H * W

    # Activations NCHW -> (M, Cin) bf16 rows (one row per input pixel).
    x2d = jnp.transpose(x, (0, 2, 3, 1)).reshape(M, Cin).astype(jnp.bfloat16)
    # Weights (Cin, Cout, K, K) -> (kh, Cin, kw*Cout + c): one tap per outer grid
    # step, all kw folded into the MXU N dimension.
    w3 = jnp.transpose(weight, (2, 0, 3, 1)).reshape(K, Cin, KC).astype(jnp.bfloat16)
    b2d = jnp.tile(bias.astype(jnp.float32), K).reshape(1, KC)

    # Fully-resident x unless it would strain VMEM (v7x: 64 MiB physical); the
    # tiled fallback re-reads x K times, which is cheap vs. the output traffic.
    x_resident = M * Cin * 2 <= (24 << 20)
    if x_resident:
        # TODO(synk): pipeline_mode=pl.Buffered(1) would halve this constant-index
        # buffer's VMEM footprint; left at the default for lowering compatibility.
        x_spec = pl.BlockSpec((M, Cin), lambda kh, i: (0, 0))
        x_vmem = 2 * M * Cin * 2
    else:
        x_spec = pl.BlockSpec((tm, Cin), lambda kh, i: (i, 0))
        x_vmem = 2 * tm * Cin * 2

    out_bytes = jnp.dtype(out_dtype).itemsize
    vmem_need = (x_vmem
                 + 2 * Cin * KC * 2              # double-buffered weight tap
                 + 2 * KC * 4                    # bias
                 + 2 * tm * KC * out_bytes       # double-buffered output block
                 + 2 * tm * KC * 4)              # matmul / sigmoid f32 temporaries
    vmem_limit = int(min(max(vmem_need * 1.25 + (4 << 20), 32 << 20), 60 << 20))

    cost = pl.CostEstimate(
        flops=2 * M * Cin * Cout * K * K,
        transcendentals=M * Cout * K * K,
        bytes_accessed=(M * Cin * 2 * (1 if x_resident else K)
                        + K * K * Cin * Cout * 2 + KC * 4
                        + M * K * K * Cout * out_bytes),
    )

    out4 = pl.pallas_call(
        _convt_tap_kernel,
        out_shape=jax.ShapeDtypeStruct((N * H, K, W, KC), out_dtype),
        grid_spec=pltpu.PrefetchScalarGridSpec(
            num_scalar_prefetch=0,
            grid=(K, NI),                       # kh outer (each tap DMA'd once), rows inner
            in_specs=[
                x_spec,
                pl.BlockSpec((1, Cin, KC), lambda kh, i: (kh, 0, 0)),
                pl.BlockSpec((1, KC), lambda kh, i: (0, 0)),
            ],
            out_specs=pl.BlockSpec((th, 1, W, KC), lambda kh, i: (i, kh, 0, 0)),
        ),
        compiler_params=pltpu.CompilerParams(
            dimension_semantics=("arbitrary", "parallel"),
            vmem_limit_bytes=vmem_limit),
        cost_estimate=cost,
    )(x2d, w3, b2d)

    # (N*H, K, W, K*Cout) is row-major (n, h, kh, w, kw, c), so the NHWC view is
    # a FREE reshape; only the padding crop + NCHW transpose remain (one fused
    # XLA pass).  TODO(synk): emit NHWC directly if the consumer accepts it.
    y = out4.reshape(N, H * K, W * K, Cout)
    y = y[:, padding:padding + Ho, padding:padding + Wo, :]
    return jnp.transpose(y, (0, 3, 1, 2)).astype(out_dtype)


if __name__ == "__main__":
    # Small shapes consistent with the module (scaled down from 768ch / 32x32).
    N, C, H, W = 2, 128, 16, 16
    K, STRIDE, PAD = 5, 5, 2

    key = jax.random.PRNGKey(0)
    kx, kw_, kb = jax.random.split(key, 3)
    x = jax.random.normal(kx, (N, C, H, W), dtype=jnp.float32)
    # ConvTranspose2d weight shape: [in_channels, out_channels, kH, kW]
    weight = jax.random.normal(kw_, (C, C, K, K), dtype=jnp.float32) * 0.05
    bias = jax.random.normal(kb, (C,), dtype=jnp.float32) * 0.05

    fn = jax.jit(conv_transpose_sigmoid)
    out = jax.block_until_ready(fn(x, weight, bias))

    # Reference: transposed conv == conv with lhs-dilated input + flipped kernel,
    # on bf16-rounded operands (same rounding the kernel applies), so the only
    # remaining difference vs the f32-accumulating MXU kernel is summation order.
    x_bf = x.astype(jnp.bfloat16).astype(jnp.float32)
    w_bf = weight.astype(jnp.bfloat16).astype(jnp.float32)
    w_flipped = jnp.transpose(jnp.flip(w_bf, (2, 3)), (1, 0, 2, 3))  # OIHW
    ref = lax.conv_general_dilated(
        x_bf, w_flipped,
        window_strides=(1, 1),
        padding=[(K - 1 - PAD, K - 1 - PAD)] * 2,
        lhs_dilation=(STRIDE, STRIDE),
        dimension_numbers=("NCHW", "OIHW", "NCHW"),
    )
    ref = jax.nn.sigmoid(ref + bias[None, :, None, None])

    Ho = (H - 1) * STRIDE - 2 * PAD + K
    Wo = (W - 1) * STRIDE - 2 * PAD + K
    assert out.shape == ref.shape == (N, C, Ho, Wo), (out.shape, ref.shape)
    err = float(jnp.max(jnp.abs(out - ref)))
    assert err < 5e-4, err
    print("KERNEL_OK")
</pallas_src>

<mosaic_0001>
module attributes {stable_mosaic.version = 11 : i64} {
  func.func @_convt_tap_kernel(%arg0: i32, %arg1: i32, %arg2: memref<512x128xbf16, #tpu.memory_space<vmem>>, %arg3: memref<1x128x640xbf16, #tpu.memory_space<vmem>>, %arg4: memref<1x640xf32, #tpu.memory_space<vmem>>, %arg5: memref<16x1x16x640xf32, #tpu.memory_space<vmem>>) attributes {dimension_semantics = [#tpu.dimension_semantics<arbitrary>, #tpu.dimension_semantics<parallel>], iteration_bounds = array<i64: 5, 2>, scalar_prefetch = 0 : i64, scratch_operands = 0 : i64, tpu.core_type = #tpu.core_type<tc>, window_params = [{pipeline_mode = #tpu.pipeline_mode<synchronous>, transform_indices = @transform_0, window_bounds = array<i64: 512, 128>}, {transform_indices = @transform_1, window_bounds = array<i64: 1, 128, 640>}, {pipeline_mode = #tpu.pipeline_mode<synchronous>, transform_indices = @transform_2, window_bounds = array<i64: 1, 640>}, {transform_indices = @transform_3, window_bounds = array<i64: 16, 1, 16, 640>}]} {
    %c256_i32 = arith.constant 256 : i32
    %0 = arith.muli %arg1, %c256_i32 : i32
    %1 = tpu.assume_multiple %0, 256 : i32
    %2 = arith.index_cast %1 : i32 to index
    %c0 = arith.constant 0 : index
    %3 = vector.load %arg2[%2, %c0] : memref<512x128xbf16, #tpu.memory_space<vmem>>, vector<256x128xbf16>
    %c0_0 = arith.constant 0 : index
    %c0_1 = arith.constant 0 : index
    %c0_2 = arith.constant 0 : index
    %4 = vector.load %arg3[%c0_0, %c0_1, %c0_2] : memref<1x128x640xbf16, #tpu.memory_space<vmem>>, vector<1x128x640xbf16>
    %5 = vector.shape_cast %4 : vector<1x128x640xbf16> to vector<128x640xbf16>
    %cst = arith.constant dense<0.000000e+00> : vector<256x640xf32>
    %6 = tpu.matmul %3, %5, %cst {dimension_numbers = #tpu.dot_dimension_numbers<[1], [0], [0], [1], [0, 0, 1, 1], [], []>} : vector<256x128xbf16>, vector<128x640xbf16>, vector<256x640xf32> -> vector<256x640xf32>
    %c0_3 = arith.constant 0 : index
    %c0_4 = arith.constant 0 : index
    %7 = vector.load %arg4[%c0_3, %c0_4] : memref<1x640xf32, #tpu.memory_space<vmem>>, vector<1x640xf32>
    %8 = vector.broadcast %7 : vector<1x640xf32> to vector<256x640xf32>
    %9 = arith.addf %6, %8 : vector<256x640xf32>
    %10 = arith.negf %9 : vector<256x640xf32>
    %11 = math.exp %10 : vector<256x640xf32>
    %cst_5 = arith.constant 1.000000e+00 : f32
    %12 = vector.broadcast %cst_5 : f32 to vector<256x640xf32>
    %13 = arith.addf %12, %11 : vector<256x640xf32>
    %14 = arith.divf %12, %13 : vector<256x640xf32>
    %15 = vector.shape_cast %14 : vector<256x640xf32> to vector<16x1x16x640xf32>
    %c0_6 = arith.constant 0 : index
    %c0_7 = arith.constant 0 : index
    %c0_8 = arith.constant 0 : index
    %c0_9 = arith.constant 0 : index
    %16 = vector.load %arg5[%c0_6, %c0_7, %c0_8, %c0_9] : memref<16x1x16x640xf32, #tpu.memory_space<vmem>>, vector<16x1x16x640xf32>
    tpu.vector_store %arg5[%c0_6, %c0_7, %c0_8, %c0_9], %15 {strides = array<i32>} : memref<16x1x16x640xf32, #tpu.memory_space<vmem>>, vector<16x1x16x640xf32>,
    return
  }
  func.func @transform_0(%arg0: i32, %arg1: i32) -> (i32, i32) {
    %c0_i32 = arith.constant 0 : i32
    %c0_i32_0 = arith.constant 0 : i32
    %c0_i32_1 = arith.constant 0 : i32
    return %c0_i32, %c0_i32_0 : i32, i32
  }
  func.func @transform_1(%arg0: i32, %arg1: i32) -> (i32, i32, i32) {
    %c0_i32 = arith.constant 0 : i32
    %c0_i32_0 = arith.constant 0 : i32
    %c0_i32_1 = arith.constant 0 : i32
    return %arg0, %c0_i32, %c0_i32_0 : i32, i32, i32
  }
  func.func @transform_2(%arg0: i32, %arg1: i32) -> (i32, i32) {
    %c0_i32 = arith.constant 0 : i32
    %c0_i32_0 = arith.constant 0 : i32
    %c0_i32_1 = arith.constant 0 : i32
    return %c0_i32, %c0_i32_0 : i32, i32
  }
  func.func @transform_3(%arg0: i32, %arg1: i32) -> (i32, i32, i32, i32) {
    %c0_i32 = arith.constant 0 : i32
    %c0_i32_0 = arith.constant 0 : i32
    %c0_i32_1 = arith.constant 0 : i32
    return %arg1, %arg0, %c0_i32, %c0_i32_0 : i32, i32, i32, i32
  }
}

</mosaic_0001>

<bundles_post_ra>
// kernel: conv_transpose_sigmoid.1
= control target key start
LH: loop header
LB: loop body
LE: loop exit
PB: predicated region body
PF: predicated region fallthrough
CT: control target
= control target key end

     0   :  { %s5901_s12 = smov 0   ;;  %s5903_s13 = smov 0   ;;  %s9262_s0 = inlined_call_operand.vmem [shape: bf16[512,128], index: 0, kind: input, shape index: {}]   ;;  %s9263_s1 = inlined_call_operand.vmem [shape: bf16[5,128,640], index: 1, kind: input, shape index: {}]   ;;  %s9264_s2 = inlined_call_operand.vmem [shape: f32[1,640], index: 2, kind: input, shape index: {}]   ;;  %s9265_s3 = inlined_call_operand.vmem [shape: f32[32,5,16,640], index: 3, kind: output, shape index: {}]  }
   0x1   :  { %s5905_s14 = smov 0   ;;  %s5907_s15 = smov 0  }
   0x2   :  { %s5909_s16 = smov 0   ;;  %s5911_s17 = smov 0  }
   0x3   :  { %s5913_s18 = smov 0  }
   0x4 LB: > { %s22_s19 = sadd.s32 1, %s5871_s16  ;;  %s25_s20 = sadd.s32 1, %s5875_s17  ;;  %s5879_s18 = sphi %s5913_s18, %s13_s18   ;;  %s5875_s17 = sphi %s5911_s17, %s9526_s17   ;;  %s5871_s16 = sphi %s5909_s16, %s9525_s16   ;;  %s5867_s15 = sphi %s5907_s15, %s9524_s15   ;;  %s5863_s14 = sphi %s5905_s14, %s9523_s14   ;;  %s5859_s13 = sphi %s5903_s13, %s9522_s13   ;;  %s5855_s12 = sphi %s5901_s12, %s9521_s12  }
   0x5   : > { %p23_p0 = scmp.ge.s32.totalorder %s22_s19, 2  ;;  %s4641_s21 = sadd.s32 4294967295, %s5879_s18  }
   0x6   : > { %p112_p1 = scmp.ne.s32.totalorder %s5859_s13, %s5855_s12  ;;  %p113_p2 = scmp.eq.s32.totalorder %s4641_s21, 9 }
   0x7   : > { %s9528_s19 = smov (%p23_p0, %s22_s19), 0  ;;  %s9530_s20 = smov (!%p23_p0, %s25_s20), %s5875_s17 }
   0x8   : > { %s97_s22 = ssub.s32 %s5871_s16, %s9528_s19  ;;  %p27_p3 = scmp.ge.s32.totalorder %s9530_s20, 5 }
   0x9   : > { %p4645_p4 = scmp.ge.s32.totalorder %s5879_s18, 1  ;;  %p5947_p5 = por %p113_p2, %p112_p1 }
   0xa   : > { %p151_p6 = scmp.lt.s32.totalorder %s5879_s18, 11  ;;  %s9532_s20 = smov (%p27_p3, %s9530_s20), 0 }
   0xb   : > { %s98_s24 = ssub.s32 %s5875_s17, %s9532_s20  ;;  %s102_s26 = sadd.s32 1, %s5859_s13 }
   0xc   : > { %p152_p7 = pnand %p4645_p4, %p151_p6  ;;  %s99_s25 = sor.u32 %s98_s24, %s97_s22 }
   0xd   : > { %p100_p8 = scmp.eq.s32.totalorder %s99_s25, 0  ;;  %p174_p9 = scmp.lt.s32.totalorder (!%p152_p7), %s5867_s15, 4 }
   0xe   : > { %155 = sbr.rel (%p152_p7) target bundleno = 1023 (0x3ff), region = 32  ;;  %s4647_s6 = sshll.u32 (!%p152_p7), %s5863_s14, 8 }
   0xf   : > { %s5958_s27 = scalar_select %p100_p8, %s5859_s13, %s102_s26  }
  0x10   : > { %s181_s7 = sshra.s32 (!%p152_p7), %s4647_s6, 3  ;;  %s171_s24 = sand.u32 (!%p152_p7), 1, %s5855_s12  }
  0x11   : > { %s4648_s8 = sshll.u32 (!%p152_p7), %s181_s7, 2  ;;  %s6153_s12 = smul.u32 (!%p152_p7), 1280, %s171_s24 }
  0x12   : > { %s5987_s11 = scalar_lea.vmem (!%p152_p7), %s9262_s0, %s4648_s8 }
  0x13   : > { %s175_s28 = scalar_select %p174_p9, %s5867_s15, 4  ;;  %v5994_v28 = vld [vmem:[%s5987_s11] sm:$0xff] }
  0x14   : > { %v5997_v29 = vld [vmem:[%s5987_s11 + $0x20] sm:$0xff]  ;;  %s6188_s25 = scalar_lea.vmem [#allocation2], %s6153_s12  ;;  %s5121_s30 = smul.u32 (%p5947_p5), 800, %s5863_s14 }
  0x15   : > { %s5119_s29 = smul.u32 320, %s175_s28  ;;  %v6008_v40 = vld [vmem:[%s5987_s11 + $0x40] sm:$0xff] }
  0x16   : > { %v5050_v41 = vld [vmem:[%s5987_s11 + $0x60] sm:$0xff] }
  0x17   : > { %s5965_s5 = scalar_lea.vmem %s9263_s1, %s5119_s29  ;;  %s5120_s29 = smul.u32 (%p5947_p5), 10, %s5867_s15 }
  0x18   : > { %v4855_v0 = vld [vmem:[%s5965_s5 + $0x118] sm:$0xf]  ;;  %v5091_v1 = vld [vmem:[%s5965_s5 + $0x128] sm:$0xf0]  ;;  %v4835_v2 = vld [vmem:[%s5965_s5 + $0xf0] sm:$0xf] }
  0x19   : > { %v4856_v3 = vor.u32 %v5091_v1, %v4855_v0  ;;  %v5086_v4 = vld [vmem:[%s5965_s5 + $0x100] sm:$0xf0]  ;;  %v4815_v6 = vld [vmem:[%s5965_s5 + $0xc8] sm:$0xf]  ;;  %v5081_v7 = vld [vmem:[%s5965_s5 + $0xd8] sm:$0xf0]  ;;  %s4236_s4 = sadd.s32 (%p5947_p5), %s5121_s30, %s5120_s29 }
  0x1a   : > { %v4836_v5 = vor.u32 %v5086_v4, %v4835_v2  ;;  %v4816_v8 = vor.u32 %v5081_v7, %v4815_v6  ;;  %v4795_v9 = vld [vmem:[%s5965_s5 + $0xa0] sm:$0xf]  ;;  %v5076_v10 = vld [vmem:[%s5965_s5 + $0xb0] sm:$0xf0]  ;;  %v4775_v12 = vld [vmem:[%s5965_s5 + $0x78] sm:$0xf] }
  0x1b   : > { %581 = vmatpush.bf16.msra.mxu0 %v4856_v3  ;;  %5094 = vmatpush.bf16.msra.mxu1 %v4856_v3  ;;  %v4796_v11 = vor.u32 %v5076_v10, %v4795_v9  ;;  %v5071_v13 = vld [vmem:[%s5965_s5 + $0x88] sm:$0xf0]  ;;  %v4755_v15 = vld [vmem:[%s5965_s5 + $0x50] sm:$0xf]  ;;  %v5066_v16 = vld [vmem:[%s5965_s5 + $0x60] sm:$0xf0] }
  0x1c   : > { %5095 = vmatpush.bf16.msra.mxu2 %v4856_v3  ;;  %5096 = vmatpush.bf16.msra.mxu3 %v4856_v3  ;;  %v4776_v14 = vor.u32 %v5071_v13, %v4775_v12  ;;  %v4756_v17 = vor.u32 %v5066_v16, %v4755_v15  ;;  %v4735_v18 = vld [vmem:[%s5965_s5 + $0x28] sm:$0xf]  ;;  %v5061_v19 = vld [vmem:[%s5965_s5 + $0x38] sm:$0xf0]  ;;  %v4715_v21 = vld [vmem:[%s5965_s5] sm:$0xf] }
  0x1d   : > { %v4736_v20 = vor.u32 %v5061_v19, %v4735_v18  ;;  %v5056_v22 = vld [vmem:[%s5965_s5 + $0x10] sm:$0xf0]  ;;  %v4863_v23 = vld [vmem:[%s5965_s5 + $0x120] sm:$0xf]  ;;  %v5090_v25 = vld [vmem:[%s5965_s5 + $0x124] sm:$0xf] }
  0x1e   : > { %v5092_v24 = vld [vmem:[%s5965_s5 + $0x130] sm:$0xf0]  ;;  %v4865_v26 = vld [vmem:[%s5965_s5 + $0x134] sm:$0xf0]  ;;  %v4716_v27 = vor.u32 %v5056_v22, %v4715_v21  ;;  %v5089_v30 = vld [vmem:[%s5965_s5 + $0x11c] sm:$0xf] }
  0x1f   : > { %582 = vmatpush.bf16.msra.mxu0 %v4836_v5  ;;  %5097 = vmatpush.bf16.msra.mxu1 %v4836_v5  ;;  %v4857_v31 = vld [vmem:[%s5965_s5 + $0x12c] sm:$0xf0]  ;;  %v4864_v32 = vor.u32 %v5092_v24, %v4863_v23  ;;  %v4868_v33 = vor.u32 %v5090_v25, %v4865_v26  ;;  %v4871_v34 = vld [vmem:[%s5965_s5 + $0x128] sm:$0xf]  ;;  %v5093_v35 = vld [vmem:[%s5965_s5 + $0x138] sm:$0xf0] }
  0x20   : > { %5098 = vmatpush.bf16.msra.mxu2 %v4836_v5  ;;  %5099 = vmatpush.bf16.msra.mxu3 %v4836_v5  ;;  %v4843_v36 = vld [vmem:[%s5965_s5 + $0xf8] sm:$0xf]  ;;  %v5087_v37 = vld [vmem:[%s5965_s5 + $0x108] sm:$0xf0]  ;;  %v5085_v38 = vld [vmem:[%s5965_s5 + $0xfc] sm:$0xf]  ;;  %v4860_v42 = vor.u32 %v5089_v30, %v4857_v31  ;;  %v4872_v43 = vor.u32 %v5093_v35, %v4871_v34 }
  0x21   : > { %v4845_v39 = vld [vmem:[%s5965_s5 + $0x10c] sm:$0xf0]  ;;  %v5084_v44 = vld [vmem:[%s5965_s5 + $0xf4] sm:$0xf]  ;;  %v4837_v45 = vld [vmem:[%s5965_s5 + $0x104] sm:$0xf0]  ;;  %v4844_v46 = vor.u32 %v5087_v37, %v4843_v36 }
  0x22   : > { %v4848_v47 = vor.u32 %v5085_v38, %v4845_v39  ;;  %v4851_v48 = vld [vmem:[%s5965_s5 + $0x100] sm:$0xf]  ;;  %v5088_v49 = vld [vmem:[%s5965_s5 + $0x110] sm:$0xf0]  ;;  %v4823_v50 = vld [vmem:[%s5965_s5 + $0xd0] sm:$0xf]  ;;  %v4840_v54 = vor.u32 %v5084_v44, %v4837_v45 }
  0x23   : > { %583 = vmatpush.bf16.msra.mxu0 %v4816_v8  ;;  %5100 = vmatpush.bf16.msra.mxu1 %v4816_v8  ;;  %v5082_v51 = vld [vmem:[%s5965_s5 + $0xe0] sm:$0xf0]  ;;  %v5080_v52 = vld [vmem:[%s5965_s5 + $0xd4] sm:$0xf]  ;;  %v4825_v53 = vld [vmem:[%s5965_s5 + $0xe4] sm:$0xf0]  ;;  %v4852_v55 = vor.u32 %v5088_v49, %v4851_v48 }
  0x24   : > { %5101 = vmatpush.bf16.msra.mxu2 %v4816_v8  ;;  %5102 = vmatpush.bf16.msra.mxu3 %v4816_v8  ;;  %v5079_v56 = vld [vmem:[%s5965_s5 + $0xcc] sm:$0xf]  ;;  %v4817_v57 = vld [vmem:[%s5965_s5 + $0xdc] sm:$0xf0]  ;;  %v4824_v58 = vor.u32 %v5082_v51, %v4823_v50  ;;  %v4828_v59 = vor.u32 %v5080_v52, %v4825_v53  ;;  %v4831_v60 = vld [vmem:[%s5965_s5 + $0xd8] sm:$0xf] }
  0x25   : > { %v5083_v61 = vld [vmem:[%s5965_s5 + $0xe8] sm:$0xf0]  ;;  %v4803_v62 = vld [vmem:[%s5965_s5 + $0xa8] sm:$0xf]  ;;  %v5077_v63 = vld [vmem:[%s5965_s5 + $0xb8] sm:$0xf0]  ;;  %v4820_v2 = vor.u32 %v5079_v56, %v4817_v57 }
  0x26   : > { %v5075_v0 = vld [vmem:[%s5965_s5 + $0xac] sm:$0xf]  ;;  %v4805_v1 = vld [vmem:[%s5965_s5 + $0xbc] sm:$0xf0]  ;;  %v4832_v3 = vor.u32 %v5083_v61, %v4831_v60  ;;  %v5074_v4 = vld [vmem:[%s5965_s5 + $0xa4] sm:$0xf]  ;;  %v4804_v6 = vor.u32 %v5077_v63, %v4803_v62 }
  0x27   : > { %584 = vmatpush.bf16.msra.mxu0 %v4796_v11  ;;  %5103 = vmatpush.bf16.msra.mxu1 %v4796_v11  ;;  %v4797_v5 = vld [vmem:[%s5965_s5 + $0xb4] sm:$0xf0]  ;;  %v4808_v7 = vor.u32 %v5075_v0, %v4805_v1  ;;  %v4811_v8 = vld [vmem:[%s5965_s5 + $0xb0] sm:$0xf]  ;;  %v5078_v9 = vld [vmem:[%s5965_s5 + $0xc0] sm:$0xf0] }
  0x28   : > { %5104 = vmatpush.bf16.msra.mxu2 %v4796_v11  ;;  %5105 = vmatpush.bf16.msra.mxu3 %v4796_v11  ;;  %v4783_v10 = vld [vmem:[%s5965_s5 + $0x80] sm:$0xf]  ;;  %v5072_v11 = vld [vmem:[%s5965_s5 + $0x90] sm:$0xf0]  ;;  %v5070_v12 = vld [vmem:[%s5965_s5 + $0x84] sm:$0xf]  ;;  %v4800_v16 = vor.u32 %v5074_v4, %v4797_v5 }
  0x29   : > { %v4785_v13 = vld [vmem:[%s5965_s5 + $0x94] sm:$0xf0]  ;;  %v6042_v15 = vld [vmem:[%s5987_s11 + $0x28] sm:$0xff]  ;;  %v5069_v18 = vld [vmem:[%s5965_s5 + $0x7c] sm:$0xf] }
  0x2a   : > { %v4777_v19 = vld [vmem:[%s5965_s5 + $0x8c] sm:$0xf0]  ;;  %v4788_v21 = vor.u32 %v5070_v12, %v4785_v13  ;;  %v4791_v22 = vld [vmem:[%s5965_s5 + $0x88] sm:$0xf]  ;;  %v5073_v23 = vld [vmem:[%s5965_s5 + $0x98] sm:$0xf0] }
  0x2b   : > { %585 = vmatpush.bf16.msra.mxu0 %v4776_v14  ;;  %5106 = vmatpush.bf16.msra.mxu1 %v4776_v14  ;;  %v4763_v24 = vld [vmem:[%s5965_s5 + $0x58] sm:$0xf]  ;;  %v5067_v25 = vld [vmem:[%s5965_s5 + $0x68] sm:$0xf0]  ;;  %v5065_v26 = vld [vmem:[%s5965_s5 + $0x5c] sm:$0xf] }
  0x2c   : > { %5107 = vmatpush.bf16.msra.mxu2 %v4776_v14  ;;  %5108 = vmatpush.bf16.msra.mxu3 %v4776_v14  ;;  %v6039_v14 = vld [vmem:[%s5987_s11 + $0x8] sm:$0xff]  ;;  %v5064_v34 = vld [vmem:[%s5965_s5 + $0x54] sm:$0xf]  ;;  %v4764_v35 = vor.u32 %v5067_v25, %v4763_v24  ;;  %v4771_v38 = vld [vmem:[%s5965_s5 + $0x60] sm:$0xf] }
  0x2d   : > { %v6053_v30 = vld [vmem:[%s5987_s11 + $0x48] sm:$0xff]  ;;  %v5068_v39 = vld [vmem:[%s5965_s5 + $0x70] sm:$0xf0]  ;;  %v4737_v48 = vld [vmem:[%s5965_s5 + $0x3c] sm:$0xf0] }
  0x2e   : > { %v5051_v31 = vld [vmem:[%s5987_s11 + $0x68] sm:$0xff]  ;;  %v4772_v45 = vor.u32 %v5068_v39, %v4771_v38  ;;  %v4751_v51 = vld [vmem:[%s5965_s5 + $0x38] sm:$0xf]  ;;  %v4725_v56 = vld [vmem:[%s5965_s5 + $0x1c] sm:$0xf0] }
  0x2f   : > { %586 = vmatpush.bf16.msra.mxu0 %v4756_v17  ;;  %5109 = vmatpush.bf16.msra.mxu1 %v4756_v17  ;;  %v4757_v37 = vld [vmem:[%s5965_s5 + $0x64] sm:$0xf0]  ;;  %v5063_v52 = vld [vmem:[%s5965_s5 + $0x48] sm:$0xf0]  ;;  %v4717_v62 = vld [vmem:[%s5965_s5 + $0x14] sm:$0xf0] }
  0x30   : > { %5110 = vmatpush.bf16.msra.mxu2 %v4756_v17  ;;  %5111 = vmatpush.bf16.msra.mxu3 %v4756_v17  ;;  %v4812_v17 = vor.u32 %v5078_v9, %v4811_v8  ;;  %v4760_v44 = vor.u32 %v5064_v34, %v4757_v37  ;;  %v4723_v53 = vld [vmem:[%s5965_s5 + $0x8] sm:$0xf]  ;;  %v4731_v63 = vld [vmem:[%s5965_s5 + $0x10] sm:$0xf]  ;;  %v5058_v0 = vld [vmem:[%s5965_s5 + $0x20] sm:$0xf0] }
  0x31   : > { %v6081_v4 = vld [vmem:[%s5987_s11 + $0x30] sm:$0xff]  ;;  %v6088_v8 = vld [vmem:[%s5987_s11 + $0x38] sm:$0xff] }
  0x32   : > { %v5048_v5 = vld [vmem:[%s5987_s11 + $0x50] sm:$0xff]  ;;  %v5049_v9 = vld [vmem:[%s5987_s11 + $0x58] sm:$0xff] }
  0x33   : > { %587 = vmatpush.bf16.msra.mxu0 %v4736_v20  ;;  %5112 = vmatpush.bf16.msra.mxu1 %v4736_v20 }
  0x34   : > { %5113 = vmatpush.bf16.msra.mxu2 %v4736_v20  ;;  %5114 = vmatpush.bf16.msra.mxu3 %v4736_v20  ;;  %v4784_v20 = vor.u32 %v5072_v11, %v4783_v10  ;;  %v5053_v10 = vld [vmem:[%s5987_s11 + $0x78] sm:$0xff] }
  0x37   : > { %588 = vmatpush.bf16.msra.mxu0 %v4716_v27  ;;  %5115 = vmatpush.bf16.msra.mxu1 %v4716_v27 }
  0x38   : > { %5116 = vmatpush.bf16.msra.mxu2 %v4716_v27  ;;  %5117 = vmatpush.bf16.msra.mxu3 %v4716_v27  ;;  %v4765_v27 = vld [vmem:[%s5965_s5 + $0x6c] sm:$0xf0] }
  0x39   : > { %v4768_v36 = vor.u32 %v5065_v26, %v4765_v27 }
  0x3a   : > { %589 = vmatmul.bf16.vlgmr.msra.gmra.mxu0 %v5994_v28  ;;  %609 = vmatmul.bf16.vlgmr.msra.gmra.mxu1 %v5997_v29 }
  0x3b   : > { %629 = vmatmul.bf16.vlgmr.msra.gmra.mxu2 %v6008_v40  ;;  %649 = vmatmul.bf16.vlgmr.msra.gmra.mxu3 %v5050_v41  ;;  %v4743_v41 = vld [vmem:[%s5965_s5 + $0x30] sm:$0xf] }
  0x3c   : > { %759 = vmatpush.bf16.msrb.mxu2 %v4864_v32  ;;  %848 = vmatpush.bf16.msrb.mxu3 %v4868_v33  ;;  %v4780_v32 = vor.u32 %v5069_v18, %v4777_v19  ;;  %v4792_v33 = vor.u32 %v5073_v23, %v4791_v22 }
  0x3d   : > { %670 = vmatpush.bf16.msrb.mxu1 %v4860_v42  ;;  %937 = vmatpush.bf16.msrb.mxu0 %v4872_v43  ;;  %v5062_v42 = vld [vmem:[%s5965_s5 + $0x40] sm:$0xf0]  ;;  %v5060_v43 = vld [vmem:[%s5965_s5 + $0x34] sm:$0xf] }
  0x3e   : > { %v4744_v49 = vor.u32 %v5062_v42, %v4743_v41 }
  0x40   : > { %760 = vmatpush.bf16.msrb.mxu2 %v4844_v46  ;;  %849 = vmatpush.bf16.msrb.mxu3 %v4848_v47  ;;  %v4745_v46 = vld [vmem:[%s5965_s5 + $0x44] sm:$0xf0]  ;;  %v5059_v47 = vld [vmem:[%s5965_s5 + $0x2c] sm:$0xf] }
  0x41   : > { %671 = vmatpush.bf16.msrb.mxu1 %v4840_v54  ;;  %938 = vmatpush.bf16.msrb.mxu0 %v4852_v55  ;;  %v4748_v50 = vor.u32 %v5060_v43, %v4745_v46  ;;  %v5057_v54 = vld [vmem:[%s5965_s5 + $0x18] sm:$0xf0]  ;;  %v5055_v55 = vld [vmem:[%s5965_s5 + $0xc] sm:$0xf]  ;;  %v4740_v57 = vor.u32 %v5059_v47, %v4737_v48 }
  0x42   : > { %v4724_v60 = vor.u32 %v5057_v54, %v4723_v53  ;;  %v4728_v61 = vor.u32 %v5055_v55, %v4725_v56 }
  0x44   : > { %761 = vmatpush.bf16.msrb.mxu2 %v4824_v58  ;;  %850 = vmatpush.bf16.msrb.mxu3 %v4828_v59  ;;  %v4752_v58 = vor.u32 %v5063_v52, %v4751_v51  ;;  %v5054_v59 = vld [vmem:[%s5965_s5 + $0x4] sm:$0xf]  ;;  %s5035_s5 = sshll.u32 (%p5947_p5), %s4236_s4, 3 }
  0x45   : > { %672 = vmatpush.bf16.msrb.mxu1 %v4820_v2  ;;  %939 = vmatpush.bf16.msrb.mxu0 %v4832_v3  ;;  %v4720_v1 = vor.u32 %v5054_v59, %v4717_v62  ;;  %v4732_v2 = vor.u32 %v5058_v0, %v4731_v63  ;;  %v5040_v3 = vld [vmem:[%s5987_s11 + $0x10] sm:$0xff]  ;;  %s8921_s7 = scalar_lea.vmem (%p5947_p5), %s9265_s3, %s5035_s5 }
  0x48   : > { %762 = vmatpush.bf16.msrb.mxu2 %v4804_v6  ;;  %851 = vmatpush.bf16.msrb.mxu3 %v4808_v7  ;;  %v5052_v6 = vld [vmem:[%s5987_s11 + $0x70] sm:$0xff]  ;;  %v5041_v7 = vld [vmem:[%s5987_s11 + $0x18] sm:$0xff] }
  0x49   : > { %673 = vmatpush.bf16.msrb.mxu1 %v4800_v16  ;;  %940 = vmatpush.bf16.msrb.mxu0 %v4812_v17 }
  0x4a   : > { %594 = vmatmul.bf16.gmra.mxu0 %v6039_v14  ;;  %614 = vmatmul.bf16.gmra.mxu1 %v6042_v15 }
  0x4b   : > { %634 = vmatmul.bf16.gmra.mxu2 %v6053_v30  ;;  %654 = vmatmul.bf16.gmra.mxu3 %v5051_v31 }
  0x4c   : > { %763 = vmatpush.bf16.msrb.mxu2 %v4784_v20  ;;  %852 = vmatpush.bf16.msrb.mxu3 %v4788_v21 }
  0x4d   : > { %674 = vmatpush.bf16.msrb.mxu1 %v4780_v32  ;;  %941 = vmatpush.bf16.msrb.mxu0 %v4792_v33 }
  0x50   : > { %764 = vmatpush.bf16.msrb.mxu2 %v4764_v35  ;;  %853 = vmatpush.bf16.msrb.mxu3 %v4768_v36 }
  0x51   : > { %675 = vmatpush.bf16.msrb.mxu1 %v4760_v44  ;;  %942 = vmatpush.bf16.msrb.mxu0 %v4772_v45 }
  0x54   : > { %765 = vmatpush.bf16.msrb.mxu2 %v4744_v49  ;;  %854 = vmatpush.bf16.msrb.mxu3 %v4748_v50 }
  0x55   : > { %676 = vmatpush.bf16.msrb.mxu1 %v4740_v57  ;;  %943 = vmatpush.bf16.msrb.mxu0 %v4752_v58 }
  0x58   : > { %766 = vmatpush.bf16.msrb.mxu2 %v4724_v60  ;;  %855 = vmatpush.bf16.msrb.mxu3 %v4728_v61 }
  0x59   : > { %677 = vmatpush.bf16.msrb.mxu1 %v4720_v1  ;;  %944 = vmatpush.bf16.msrb.mxu0 %v4732_v2 }
  0x5a   : > { %599 = vmatmul.bf16.gmra.mxu0 %v5040_v3  ;;  %619 = vmatmul.bf16.gmra.mxu1 %v6081_v4 }
  0x5b   : > { %639 = vmatmul.bf16.gmra.mxu2 %v5048_v5  ;;  %659 = vmatmul.bf16.gmra.mxu3 %v5052_v6 }
  0x6a   : > { %604 = vmatmul.bf16.gmra.mxu0 %v5041_v7  ;;  %624 = vmatmul.bf16.gmra.mxu1 %v6088_v8 }
  0x6b   : > { %644 = vmatmul.bf16.gmra.mxu2 %v5049_v9  ;;  %664 = vmatmul.bf16.gmra.mxu3 %v5053_v10 }
  0x7a   : > { %678 = vmatmul.bf16.vlgmr.msrb.gmra.mxu1 %v5994_v28  ;;  %945 = vmatmul.bf16.vlgmr.msrb.gmra.mxu0 %v5994_v28 }
  0x7b   : > { %767 = vmatmul.bf16.vlgmr.msrb.gmra.mxu2 %v5994_v28  ;;  %856 = vmatmul.bf16.vlgmr.msrb.gmra.mxu3 %v5994_v28  ;;  %v265_v28 = vld [vmem:[%s9264_s2] sm:$0x1f] }
  0x7c   : > { %v6104_v11 = vperm.slane %v265_v28, 0 }
  0x8a   : > { %683 = vmatmul.bf16.gmra.mxu1 %v6039_v14  ;;  %950 = vmatmul.bf16.gmra.mxu0 %v6039_v14 }
  0x8b   : > { %772 = vmatmul.bf16.gmra.mxu2 %v6039_v14  ;;  %861 = vmatmul.bf16.gmra.mxu3 %v6039_v14 }
  0x9a   : > { %688 = vmatmul.bf16.gmra.mxu1 %v5040_v3  ;;  %955 = vmatmul.bf16.gmra.mxu0 %v5040_v3 }
  0x9b   : > { %777 = vmatmul.bf16.gmra.mxu2 %v5040_v3  ;;  %866 = vmatmul.bf16.gmra.mxu3 %v5040_v3 }
  0xaa   : > { %693 = vmatmul.bf16.gmra.mxu1 %v5041_v7  ;;  %960 = vmatmul.bf16.gmra.mxu0 %v5041_v7 }
  0xab   : > { %782 = vmatmul.bf16.gmra.mxu2 %v5041_v7  ;;  %871 = vmatmul.bf16.gmra.mxu3 %v5041_v7 }
  0xb7   : > { %v590_v12 = vpop.f32.mrf.mxu0  ;;  %v610_v13 = vpop.f32.mrf.mxu1 }
  0xb8   : > { %v591_v16 = vadd.f32 %v590_v12, %v6104_v11  ;;  %v611_v14 = vadd.f32 %v610_v13, %v6104_v11 }
  0xba   : > { %v4873_v17 = vmul.f32 -1.442695, %v591_v16  ;;  %v4913_v18 = vmul.f32 -1.442695, %v611_v14  ;;  %698 = vmatmul.bf16.gmra.mxu1 %v5997_v29  ;;  %965 = vmatmul.bf16.gmra.mxu0 %v5997_v29 }
  0xbb   : > { %787 = vmatmul.bf16.gmra.mxu2 %v5997_v29  ;;  %876 = vmatmul.bf16.gmra.mxu3 %v5997_v29 }
  0xbc   : > { %5178 = vpow2.f32 %v4873_v17 }
  0xbd   : > { %5180 = vpow2.f32 %v4913_v18 }
  0xbe   : > { %v630_v19 = vpop.f32.mrf.mxu2  ;;  %v650_v20 = vpop.f32.mrf.mxu3 }
  0xbf   : > { %v631_v21 = vadd.f32 %v630_v19, %v6104_v11  ;;  %v651_v22 = vadd.f32 %v650_v20, %v6104_v11  ;;  %v592_v23 = vpop.f32.mrf.mxu0  ;;  %v612_v24 = vpop.f32.mrf.mxu1 }
  0xc0   : > { %v593_v25 = vadd.f32 %v592_v23, %v6104_v11  ;;  %v613_v26 = vadd.f32 %v612_v24, %v6104_v11 }
  0xc1   : > { %v4953_v27 = vmul.f32 -1.442695, %v631_v21  ;;  %v4993_v31 = vmul.f32 -1.442695, %v651_v22 }
  0xc2   : > { %v5179_v32 = vpop.eup %5178  ;;  %v4878_v29 = vmul.f32 -1.442695, %v593_v25  ;;  %v4918_v36 = vmul.f32 -1.442695, %v613_v26 }
  0xc3   : > { %v5181_v33 = vpop.eup %5180  ;;  %v6116_v34 = vadd.f32 1.0, %v5179_v32  ;;  %5182 = vpow2.f32 %v4953_v27 }
  0xc4   : > { %v6118_v35 = vadd.f32 1.0, %v5181_v33  ;;  %5184 = vpow2.f32 %v4993_v31 }
  0xc5   : > { %5186 = vrcp.f32 %v6116_v34  ;;  %v1675_v41 = vand.u32 2147483647, %v6116_v34  ;;  %v1677_v42 = vand.u32 2147483648, %v6116_v34  ;;  %vm1671_vm0 = vweird.f32 %v6116_v34 }
  0xc6   : > { %5188 = vrcp.f32 %v6118_v35  ;;  %v632_v37 = vpop.f32.mrf.mxu2  ;;  %v652_v38 = vpop.f32.mrf.mxu3  ;;  %v2275_v45 = vand.u32 2147483647, %v6118_v35  ;;  %v2277_v49 = vand.u32 2147483648, %v6118_v35  ;;  %vm2271_vm1 = vweird.f32 %v6118_v35 }
  0xc7   : > { %5190 = vpow2.f32 %v4878_v29  ;;  %v633_v39 = vadd.f32 %v632_v37, %v6104_v11  ;;  %v595_v43 = vpop.f32.mrf.mxu0  ;;  %v653_v47 = vadd.f32 %v652_v38, %v6104_v11  ;;  %v615_v54 = vpop.f32.mrf.mxu1  ;;  %vm6141_vm2 = vcmp.eq.f32.partialorder %v1675_v41, 8.507059e+37 }
  0xc8   : > { %5192 = vpow2.f32 %v4918_v36  ;;  %v596_v53 = vadd.f32 %v595_v43, %v6104_v11  ;;  %v1678_v58 = vor.u32 1.1754944e-38, %v1677_v42  ;;  %vm6147_vm3 = vcmp.eq.f32.partialorder %v2275_v45, 8.507059e+37 }
  0xc9   : > { %v5183_v44 = vpop.eup %5182  ;;  %v4958_v46 = vmul.f32 -1.442695, %v633_v39  ;;  %v2278_v0 = vor.u32 1.1754944e-38, %v2277_v49  ;;  %v616_v1 = vadd.f32 %v615_v54, %v6104_v11 }
  0xca   : > { %v5185_v48 = vpop.eup %5184  ;;  %v6128_v50 = vadd.f32 1.0, %v5183_v44  ;;  %703 = vmatmul.bf16.gmra.mxu1 %v6042_v15  ;;  %970 = vmatmul.bf16.gmra.mxu0 %v6042_v15  ;;  %v4883_v5 = vmul.f32 -1.442695, %v596_v53 }
  0xcb   : > { %v5187_v51 = vpop.eup %5186  ;;  %v6134_v52 = vadd.f32 1.0, %v5185_v48  ;;  %792 = vmatmul.bf16.gmra.mxu2 %v6042_v15  ;;  %881 = vmatmul.bf16.gmra.mxu3 %v6042_v15  ;;  %v4998_v15 = vmul.f32 -1.442695, %v653_v47  ;;  %v6164_v17 = vmul.f32 -1.442695, %v616_v1 }
  0xcc   : > { %v5189_v55 = vpop.eup %5188  ;;  %v1667_v56 = vmul.f32 %v5187_v51, %v6116_v34  ;;  %5194 = vrcp.f32 %v6128_v50  ;;  %vm1672_vm4 = vweird.f32 %v5187_v51  ;;  %v2875_v3 = vand.u32 2147483647, %v6128_v50 }
  0xcd   : > { %v5191_v59 = vpop.eup %5190  ;;  %v2267_v60 = vmul.f32 %v5189_v55, %v6118_v35  ;;  %5196 = vpow2.f32 %v4958_v46  ;;  %v2877_v7 = vand.u32 2147483648, %v6128_v50  ;;  %vm2272_vm5 = vweird.f32 %v5189_v55  ;;  %vm1673_vm6 = vmor %vm1671_vm0, %vm1672_vm4 }
  0xce   : > { %v5193_v62 = vpop.eup %5192  ;;  %v1668_v63 = vsub.f32 1.0, %v1667_v56  ;;  %5198 = vrcp.f32 %v6134_v52  ;;  %v6157_v9 = vadd.f32 1.0, %v5191_v59  ;;  %v3475_v12 = vand.u32 2147483647, %v6134_v52  ;;  %v635_v21 = vpop.f32.mrf.mxu2  ;;  %vm2273_vm9 = vmor %vm2271_vm1, %vm2272_vm5 }
  0xcf   : > { %v2268_v2 = vsub.f32 1.0, %v2267_v60  ;;  %v6159_v10 = vadd.f32 1.0, %v5193_v62  ;;  %5200 = vpow2.f32 %v4998_v15  ;;  %v3477_v14 = vand.u32 2147483648, %v6134_v52  ;;  %v655_v53 = vpop.f32.mrf.mxu3  ;;  %v617_v24 = vpop.f32.mrf.mxu1 }
  0xd0   : > { %v1669_v6 = vmul.f32 %v5187_v51, %v1668_v63  ;;  %5202 = vrcp.f32 %v6157_v9  ;;  %vm2871_vm7 = vweird.f32 %v6128_v50  ;;  %vm3471_vm8 = vweird.f32 %v6134_v52 }
  0xd1   : > { %v2269_v28 = vmul.f32 %v5189_v55, %v2268_v2  ;;  %vm6175_vm10 = vcmp.eq.f32.partialorder %v2875_v3, 8.507059e+37  ;;  %v2878_v25 = vor.u32 1.1754944e-38, %v2877_v7  ;;  %5204 = vrcp.f32 %v6159_v10 }
  0xd2   : > { %v5195_v13 = vpop.eup %5194  ;;  %v1670_v16 = vadd.f32 %v5187_v51, %v1669_v6  ;;  %vm6183_vm11 = vcmp.eq.f32.partialorder %v3475_v12, 8.507059e+37  ;;  %v3478_v29 = vor.u32 1.1754944e-38, %v3477_v14  ;;  %v1750_v35 = vand.u32 2147483647, %v6157_v9 }
  0xd3   : > { %v5197_v18 = vpop.eup %5196  ;;  %v2270_v19 = vadd.f32 %v5189_v55, %v2269_v28  ;;  %v2867_v20 = vmul.f32 %v5195_v13, %v6128_v50  ;;  %v636_v36 = vadd.f32 %v635_v21, %v6104_v11  ;;  %vm2872_vm12 = vweird.f32 %v5195_v13 }
  0xd4   : > { %v5199_v22 = vpop.eup %5198  ;;  %v1674_v23 = vsel %vm1673_vm6, %v5187_v51, %v1670_v16  ;;  %v6196_v41 = vadd.f32 1.0, %v5197_v18  ;;  %vm1746_vm14 = vweird.f32 %v6157_v9  ;;  %v1752_v43 = vand.u32 2147483648, %v6157_v9  ;;  %vm2873_vm15 = vmor %vm2871_vm7, %vm2872_vm12 }
  0xd5   : > { %v1679_v26 = vsel %vm6141_vm2, %v1678_v58, %v1674_v23  ;;  %v2274_v27 = vsel %vm2273_vm9, %v5189_v55, %v2270_v19  ;;  %v2868_v31 = vsub.f32 1.0, %v2867_v20  ;;  %v3467_v32 = vmul.f32 %v5199_v22, %v6134_v52  ;;  %v5201_v37 = vpop.eup %5200 }
  0xd6   : > { %4066 = vst [vmem:[%s6188_s25] sm:$0xff] %v1679_v26  ;;  %v2279_v34 = vsel %vm6147_vm3, %v2278_v0, %v2274_v27  ;;  %v5203_v42 = vpop.eup %5202  ;;  %vm3472_vm13 = vweird.f32 %v5199_v22  ;;  %5206 = vpow2.f32 %v4883_v5  ;;  %v6201_v47 = vadd.f32 1.0, %v5201_v37  ;;  %v597_v5 = vpop.f32.mrf.mxu0 }
  0xd7   : > { %4106 = vst [vmem:[%s6188_s25 + $0x140] sm:$0xff] %v2279_v34  ;;  %v2869_v38 = vmul.f32 %v5195_v13, %v2868_v31  ;;  %v3468_v39 = vsub.f32 1.0, %v3467_v32  ;;  %v1742_v46 = vmul.f32 %v5203_v42, %v6157_v9  ;;  %v5205_v48 = vpop.eup %5204  ;;  %vm6205_vm0 = vcmp.eq.f32.partialorder %v1750_v35, 8.507059e+37  ;;  %vm3473_vm2 = vmor %vm3471_vm8, %vm3472_vm13  ;;  %v657_v31 = vpop.f32.mrf.mxu3 }
  0xd8   : > { %vm2346_vm1 = vweird.f32 %v6159_v10  ;;  %v2350_v51 = vand.u32 2147483647, %v6159_v10  ;;  %5208 = vrcp.f32 %v6196_v41  ;;  %v2342_v56 = vmul.f32 %v5205_v48, %v6159_v10 }
  0xd9   : > { %v2870_v44 = vadd.f32 %v5195_v13, %v2869_v38  ;;  %v3469_v45 = vmul.f32 %v5199_v22, %v3468_v39  ;;  %v1743_v50 = vsub.f32 1.0, %v1742_v46  ;;  %vm1747_vm3 = vweird.f32 %v5203_v42 }
  0xda   : > { %708 = vmatmul.bf16.gmra.mxu1 %v6081_v4  ;;  %975 = vmatmul.bf16.gmra.mxu0 %v6081_v4  ;;  %v2352_v58 = vand.u32 2147483648, %v6159_v10  ;;  %v2950_v59 = vand.u32 2147483647, %v6196_v41  ;;  %v2343_v15 = vsub.f32 1.0, %v2342_v56  ;;  %5210 = vrcp.f32 %v6201_v47  ;;  %vm1748_vm6 = vmor %vm1746_vm14, %vm1747_vm3 }
  0xdb   : > { %v2874_v54 = vsel %vm2873_vm15, %v5195_v13, %v2870_v44  ;;  %v3470_v55 = vadd.f32 %v5199_v22, %v3469_v45  ;;  %797 = vmatmul.bf16.gmra.mxu2 %v6081_v4  ;;  %886 = vmatmul.bf16.gmra.mxu3 %v6081_v4  ;;  %v1744_v61 = vmul.f32 %v5203_v42, %v1743_v50  ;;  %v1753_v63 = vor.u32 1.1754944e-38, %v1752_v43 }
  0xdc   : > { %v2879_v57 = vsel %vm6175_vm10, %v2878_v25, %v2874_v54  ;;  %v5207_v4 = vpop.eup %5206  ;;  %vm6228_vm4 = vcmp.eq.f32.partialorder %v2350_v51, 8.507059e+37  ;;  %v2952_v52 = vand.u32 2147483648, %v6196_v41  ;;  %v2344_v2 = vmul.f32 %v5205_v48, %v2343_v15  ;;  %v637_v25 = vpop.f32.mrf.mxu2 }
  0xdd   : > { %4146 = vst [vmem:[%s6188_s25 + $0x280] sm:$0xff] %v2879_v57  ;;  %v3474_v60 = vsel %vm3473_vm2, %v5199_v22, %v3470_v55  ;;  %v1745_v1 = vadd.f32 %v5203_v42, %v1744_v61  ;;  %vm2347_vm5 = vweird.f32 %v5205_v48  ;;  %v6234_v3 = vadd.f32 1.0, %v5207_v4 }
  0xde   : > { %v3479_v62 = vsel %vm6183_vm11, %v3478_v29, %v3474_v60  ;;  %v5209_v6 = vpop.eup %5208  ;;  %v2353_v7 = vor.u32 1.1754944e-38, %v2352_v58  ;;  %vm2946_vm7 = vweird.f32 %v6196_v41  ;;  %5212 = vpow2.f32 %v6164_v17  ;;  %vm2348_vm9 = vmor %vm2346_vm1, %vm2347_vm5 }
  0xdf   : > { %4186 = vst [vmem:[%s6188_s25 + $0x3c0] sm:$0xff] %v3479_v62  ;;  %v4963_v28 = vmul.f32 -1.442695, %v636_v36  ;;  %v1749_v12 = vsel %vm1748_vm6, %v5203_v42, %v1745_v1  ;;  %v2345_v13 = vadd.f32 %v5205_v48, %v2344_v2  ;;  %v2942_v16 = vmul.f32 %v5209_v6, %v6196_v41 }
  0xe0   : > { %vm6242_vm8 = vcmp.eq.f32.partialorder %v2950_v59, 8.507059e+37  ;;  %v656_v18 = vadd.f32 %v655_v53, %v6104_v11  ;;  %v1754_v9 = vsel %vm6205_vm0, %v1753_v63, %v1749_v12  ;;  %v2953_v19 = vor.u32 1.1754944e-38, %v2952_v52  ;;  %v5211_v20 = vpop.eup %5210 }
  0xe1   : > { %5214 = vrcp.f32 %v6234_v3  ;;  %v598_v17 = vadd.f32 %v597_v5, %v6104_v11  ;;  %4071 = vst [vmem:[%s6188_s25 + $0x28] sm:$0xff] %v1754_v9  ;;  %v2349_v21 = vsel %vm2348_vm9, %v5205_v48, %v2345_v13  ;;  %v2943_v22 = vsub.f32 1.0, %v2942_v16 }
  0xe2   : > { %vm3546_vm10 = vweird.f32 %v6201_v47  ;;  %v3550_v23 = vand.u32 2147483647, %v6201_v47  ;;  %v2354_v10 = vsel %vm6228_vm4, %v2353_v7, %v2349_v21  ;;  %v3542_v26 = vmul.f32 %v5211_v20, %v6201_v47 }
  0xe3   : > { %v3552_v27 = vand.u32 2147483648, %v6201_v47  ;;  %5216 = vpow2.f32 %v4963_v28  ;;  %4111 = vst [vmem:[%s6188_s25 + $0x168] sm:$0xff] %v2354_v10  ;;  %v2944_v32 = vmul.f32 %v5209_v6, %v2943_v22  ;;  %vm2947_vm11 = vweird.f32 %v5209_v6 }
  0xe4   : > { %vm3547_vm12 = vweird.f32 %v5211_v20  ;;  %v5003_v33 = vmul.f32 -1.442695, %v656_v18  ;;  %v5213_v34 = vpop.eup %5212  ;;  %v3543_v29 = vsub.f32 1.0, %v3542_v26  ;;  %v4888_v35 = vmul.f32 -1.442695, %v598_v17  ;;  %vm2948_vm13 = vmor %vm2946_vm7, %vm2947_vm11 }
  0xe5   : > { %v618_v36 = vadd.f32 %v617_v24, %v6104_v11  ;;  %v638_v37 = vadd.f32 %v637_v25, %v6104_v11  ;;  %v2945_v38 = vadd.f32 %v5209_v6, %v2944_v32  ;;  %v6264_v39 = vadd.f32 1.0, %v5213_v34  ;;  %vm3548_vm0 = vmor %vm3546_vm10, %vm3547_vm12 }
  0xe6   : > { %5218 = vpow2.f32 %v5003_v33  ;;  %v658_v42 = vadd.f32 %v657_v31, %v6104_v11  ;;  %v3544_v44 = vmul.f32 %v5211_v20, %v3543_v29  ;;  %vm6269_vm14 = vcmp.eq.f32.partialorder %v3550_v23, 8.507059e+37 }
  0xe7   : > { %v5215_v43 = vpop.eup %5214  ;;  %5220 = vpow2.f32 %v4888_v35  ;;  %v4928_v45 = vmul.f32 -1.442695, %v618_v36  ;;  %v4968_v46 = vmul.f32 -1.442695, %v638_v37  ;;  %v2949_v48 = vsel %vm2948_vm13, %v5209_v6, %v2945_v38  ;;  %v600_v6 = vpop.f32.mrf.mxu0 }
  0xe8   : > { %v1817_v51 = vmul.f32 %v5215_v43, %v6234_v3  ;;  %5222 = vrcp.f32 %v6264_v39  ;;  %v2954_v54 = vsel %vm6242_vm8, %v2953_v19, %v2949_v48  ;;  %v3545_v41 = vadd.f32 %v5211_v20, %v3544_v44 }
  0xe9   : > { %v5217_v53 = vpop.eup %5216  ;;  %v3553_v55 = vor.u32 1.1754944e-38, %v3552_v27  ;;  %vm1821_vm15 = vweird.f32 %v6234_v3  ;;  %4151 = vst [vmem:[%s6188_s25 + $0x2a8] sm:$0xff] %v2954_v54  ;;  %v1825_v56 = vand.u32 2147483647, %v6234_v3  ;;  %5224 = vpow2.f32 %v4928_v45 }
  0xea   : > { %713 = vmatmul.bf16.gmra.mxu1 %v6088_v8  ;;  %980 = vmatmul.bf16.gmra.mxu0 %v6088_v8  ;;  %v1818_v50 = vsub.f32 1.0, %v1817_v51  ;;  %v6285_v57 = vadd.f32 1.0, %v5217_v53  ;;  %v3549_v58 = vsel %vm3548_vm0, %v5211_v20, %v3545_v41  ;;  %v1827_v59 = vand.u32 2147483648, %v6234_v3 }
  0xeb   : > { %802 = vmatmul.bf16.gmra.mxu2 %v6088_v8  ;;  %891 = vmatmul.bf16.gmra.mxu3 %v6088_v8  ;;  %5226 = vpow2.f32 %v4968_v46  ;;  %v5008_v60 = vmul.f32 -1.442695, %v658_v42  ;;  %v3554_v47 = vsel %vm6269_vm14, %v3553_v55, %v3549_v58  ;;  %vm1822_vm1 = vweird.f32 %v5215_v43 }
  0xec   : > { %v5219_v61 = vpop.eup %5218  ;;  %v1819_v15 = vmul.f32 %v5215_v43, %v1818_v50  ;;  %5228 = vrcp.f32 %v6285_v57  ;;  %4191 = vst [vmem:[%s6188_s25 + $0x3e8] sm:$0xff] %v3554_v47  ;;  %v2425_v62 = vand.u32 2147483647, %v6264_v39  ;;  %v2427_v52 = vand.u32 2147483648, %v6264_v39  ;;  %vm1823_vm2 = vmor %vm1821_vm15, %vm1822_vm1 }
  0xed   : > { %v5221_v4 = vpop.eup %5220  ;;  %v6295_v63 = vadd.f32 1.0, %v5219_v61  ;;  %5230 = vpow2.f32 %v5008_v60  ;;  %vm1826_vm3 = vcmp.eq.f32.partialorder %v1825_v56, 8.507059e+37  ;;  %v1828_v2 = vor.u32 1.1754944e-38, %v1827_v59  ;;  %v640_v59 = vpop.f32.mrf.mxu2 }
  0xee   : > { %v5223_v8 = vpop.eup %5222  ;;  %v1820_v0 = vadd.f32 %v5215_v43, %v1819_v15  ;;  %v6298_v1 = vadd.f32 1.0, %v5221_v4  ;;  %v3025_v12 = vand.u32 2147483647, %v6285_v57  ;;  %v3027_v13 = vand.u32 2147483648, %v6285_v57 }
  0xef   : > { %v2417_v5 = vmul.f32 %v5223_v8, %v6264_v39  ;;  %v5225_v7 = vpop.eup %5224  ;;  %5232 = vrcp.f32 %v6295_v63  ;;  %vm2421_vm4 = vweird.f32 %v6264_v39  ;;  %vm6309_vm5 = vcmp.eq.f32.partialorder %v2425_v62, 8.507059e+37 }
  0xf0   : > { %v1824_v28 = vsel %vm1823_vm2, %v5215_v43, %v1820_v0  ;;  %5234 = vrcp.f32 %v6298_v1  ;;  %v2428_v19 = vor.u32 1.1754944e-38, %v2427_v52  ;;  %vm3021_vm6 = vweird.f32 %v6285_v57  ;;  %v620_v43 = vpop.f32.mrf.mxu1 }
  0xf1   : > { %v5227_v16 = vpop.eup %5226  ;;  %v1829_v14 = vsel %vm1826_vm3, %v1828_v2, %v1824_v28  ;;  %v2418_v18 = vsub.f32 1.0, %v2417_v5  ;;  %v601_v17 = vadd.f32 %v600_v6, %v6104_v11  ;;  %vm2422_vm7 = vweird.f32 %v5223_v8 }
  0xf2   : > { %v5229_v3 = vpop.eup %5228  ;;  %4076 = vst [vmem:[%s6188_s25 + $0x50] sm:$0xff] %v1829_v14  ;;  %v3625_v22 = vand.u32 2147483647, %v6295_v63  ;;  %vm6317_vm8 = vcmp.eq.f32.partialorder %v3025_v12, 8.507059e+37  ;;  %v3028_v25 = vor.u32 1.1754944e-38, %v3027_v13  ;;  %v3627_v10 = vand.u32 2147483648, %v6295_v63  ;;  %vm2423_vm10 = vmor %vm2421_vm4, %vm2422_vm7  ;;  %v602_v14 = vpop.f32.mrf.mxu0 }
  0xf3   : > { %v2419_v20 = vmul.f32 %v5223_v8, %v2418_v18  ;;  %v3017_v21 = vmul.f32 %v5229_v3, %v6285_v57  ;;  %v5231_v23 = vpop.eup %5230  ;;  %v6322_v26 = vadd.f32 1.0, %v5225_v7  ;;  %vm3621_vm9 = vweird.f32 %v6295_v63 }
  0xf4   : > { %v6325_v32 = vadd.f32 1.0, %v5227_v16  ;;  %vm3022_vm11 = vweird.f32 %v5229_v3  ;;  %vm1896_vm12 = vweird.f32 %v6298_v1  ;;  %v1900_v34 = vand.u32 2147483647, %v6298_v1  ;;  %v660_v16 = vpop.f32.mrf.mxu3 }
  0xf5   : > { %v2420_v27 = vadd.f32 %v5223_v8, %v2419_v20  ;;  %v3018_v31 = vsub.f32 1.0, %v3017_v21  ;;  %v5233_v33 = vpop.eup %5232  ;;  %v1902_v29 = vand.u32 2147483648, %v6298_v1  ;;  %5236 = vrcp.f32 %v6322_v26  ;;  %vm3023_vm14 = vmor %vm3021_vm6, %vm3022_vm11 }
  0xf6   : > { %v6333_v35 = vpop.eup %5234  ;;  %v3617_v38 = vmul.f32 %v5233_v33, %v6295_v63  ;;  %vm6336_vm13 = vcmp.eq.f32.partialorder %v3625_v22, 8.507059e+37  ;;  %v6340_v39 = vadd.f32 1.0, %v5231_v23  ;;  %v3628_v45 = vor.u32 1.1754944e-38, %v3627_v10 }
  0xf7   : > { %v2424_v36 = vsel %vm2423_vm10, %v5223_v8, %v2420_v27  ;;  %v3019_v37 = vmul.f32 %v5229_v3, %v3018_v31  ;;  %v1892_v46 = vmul.f32 %v6333_v35, %v6298_v1  ;;  %v2500_v48 = vand.u32 2147483647, %v6322_v26 }
  0xf8   : > { %v2429_v44 = vsel %vm6309_vm5, %v2428_v19, %v2424_v36  ;;  %v3618_v51 = vsub.f32 1.0, %v3617_v38  ;;  %v2502_v53 = vand.u32 2147483648, %v6322_v26  ;;  %5238 = vrcp.f32 %v6325_v32 }
  0xf9   : > { %4116 = vst [vmem:[%s6188_s25 + $0x190] sm:$0xff] %v2429_v44  ;;  %v3020_v49 = vadd.f32 %v5229_v3, %v3019_v37  ;;  %v1893_v54 = vsub.f32 1.0, %v1892_v46  ;;  %vm6355_vm15 = vcmp.eq.f32.partialorder %v1900_v34, 8.507059e+37  ;;  %v1903_v55 = vor.u32 1.1754944e-38, %v1902_v29  ;;  %v642_v37 = vpop.f32.mrf.mxu2 }
  0xfa   : > { %718 = vmatmul.bf16.gmra.mxu1 %v6008_v40  ;;  %985 = vmatmul.bf16.gmra.mxu0 %v6008_v40  ;;  %v4893_v50 = vmul.f32 -1.442695, %v601_v17  ;;  %v3619_v58 = vmul.f32 %v5233_v33, %v3618_v51  ;;  %vm3622_vm0 = vweird.f32 %v5233_v33  ;;  %5240 = vrcp.f32 %v6340_v39  ;;  %v622_v17 = vpop.f32.mrf.mxu1 }
  0xfb   : > { %807 = vmatmul.bf16.gmra.mxu2 %v6008_v40  ;;  %896 = vmatmul.bf16.gmra.mxu3 %v6008_v40  ;;  %v3024_v56 = vsel %vm3023_vm14, %v5229_v3, %v3020_v49  ;;  %v5237_v57 = vpop.eup %5236  ;;  %v1894_v61 = vmul.f32 %v6333_v35, %v1893_v54  ;;  %vm1897_vm1 = vweird.f32 %v6333_v35  ;;  %vm2496_vm2 = vweird.f32 %v6322_v26  ;;  %vm3623_vm4 = vmor %vm3621_vm9, %vm3622_vm0 }
  0xfc   : > { %v3029_v60 = vsel %vm6317_vm8, %v3028_v25, %v3024_v56  ;;  %v3620_v47 = vadd.f32 %v5233_v33, %v3619_v58  ;;  %v2492_v40 = vmul.f32 %v5237_v57, %v6322_v26  ;;  %vm6369_vm3 = vcmp.eq.f32.partialorder %v2500_v48, 8.507059e+37  ;;  %vm1898_vm6 = vmor %vm1896_vm12, %vm1897_vm1  ;;  %v605_v58 = vpop.f32.mrf.mxu0 }
  0xfd   : > { %4156 = vst [vmem:[%s6188_s25 + $0x2d0] sm:$0xff] %v3029_v60  ;;  %v2503_v4 = vor.u32 1.1754944e-38, %v2502_v53  ;;  %v3100_v62 = vand.u32 2147483647, %v6325_v32  ;;  %v1895_v8 = vadd.f32 %v6333_v35, %v1894_v61  ;;  %vm3096_vm5 = vweird.f32 %v6325_v32 }
  0xfe   : > { %v3102_v0 = vand.u32 2147483648, %v6325_v32  ;;  %5242 = vpow2.f32 %v4893_v50  ;;  %v621_v52 = vadd.f32 %v620_v43, %v6104_v11  ;;  %v5239_v2 = vpop.eup %5238  ;;  %v3624_v5 = vsel %vm3623_vm4, %v5233_v33, %v3620_v47 }
  0xff   : > { %v2493_v6 = vsub.f32 1.0, %v2492_v40  ;;  %vm2497_vm7 = vweird.f32 %v5237_v57  ;;  %v641_v63 = vadd.f32 %v640_v59, %v6104_v11  ;;  %v3629_v7 = vsel %vm6336_vm13, %v3628_v45, %v3624_v5 }
 0x100   : > { %v1899_v28 = vsel %vm1898_vm6, %v6333_v35, %v1895_v8  ;;  %v3092_v12 = vmul.f32 %v5239_v2, %v6325_v32  ;;  %vm3696_vm8 = vweird.f32 %v6340_v39  ;;  %v3700_v13 = vand.u32 2147483647, %v6340_v39  ;;  %v5241_v1 = vpop.eup %5240  ;;  %4196 = vst [vmem:[%s6188_s25 + $0x410] sm:$0xff] %v3629_v7  ;;  %vm2498_vm10 = vmor %vm2496_vm2, %vm2497_vm7 }
 0x101   : > { %v1904_v18 = vsel %vm6355_vm15, %v1903_v55, %v1899_v28  ;;  %v2494_v3 = vmul.f32 %v5237_v57, %v2493_v6  ;;  %v3702_v9 = vand.u32 2147483648, %v6340_v39  ;;  %v4933_v19 = vmul.f32 -1.442695, %v621_v52  ;;  %v662_v55 = vpop.f32.mrf.mxu3 }
 0x102   : > { %4081 = vst [vmem:[%s6188_s25 + $0x78] sm:$0xff] %v1904_v18  ;;  %v3093_v20 = vsub.f32 1.0, %v3092_v12  ;;  %vm3097_vm9 = vweird.f32 %v5239_v2  ;;  %v3692_v21 = vmul.f32 %v5241_v1, %v6340_v39  ;;  %v4973_v22 = vmul.f32 -1.442695, %v641_v63 }
 0x103   : > { %v2495_v23 = vadd.f32 %v5237_v57, %v2494_v3  ;;  %5244 = vpow2.f32 %v4933_v19  ;;  %v661_v24 = vadd.f32 %v660_v16, %v6104_v11  ;;  %v603_v25 = vadd.f32 %v602_v14, %v6104_v11  ;;  %vm3098_vm12 = vmor %vm3096_vm5, %vm3097_vm9 }
 0x104   : > { %v5243_v10 = vpop.eup %5242  ;;  %v3094_v27 = vmul.f32 %v5239_v2, %v3093_v20  ;;  %v3693_v31 = vsub.f32 1.0, %v3692_v21  ;;  %5246 = vpow2.f32 %v4973_v22  ;;  %v623_v33 = vadd.f32 %v622_v17, %v6104_v11 }
 0x105   : > { %v2499_v34 = vsel %vm2498_vm10, %v5237_v57, %v2495_v23  ;;  %v6403_v29 = vadd.f32 1.0, %v5243_v10  ;;  %v5013_v35 = vmul.f32 -1.442695, %v661_v24  ;;  %v4898_v36 = vmul.f32 -1.442695, %v603_v25 }
 0x106   : > { %v2504_v38 = vsel %vm6369_vm3, %v2503_v4, %v2499_v34  ;;  %v3095_v42 = vadd.f32 %v5239_v2, %v3094_v27  ;;  %v3694_v43 = vmul.f32 %v5241_v1, %v3693_v31  ;;  %vm3697_vm11 = vweird.f32 %v5241_v1  ;;  %v6477_v34 = vpop.f32.mrf.mxu1 }
 0x107   : > { %4121 = vst [vmem:[%s6188_s25 + $0x1b8] sm:$0xff] %v2504_v38  ;;  %vm3101_vm13 = vcmp.eq.f32.partialorder %v3100_v62, 8.507059e+37  ;;  %v3103_v26 = vor.u32 1.1754944e-38, %v3102_v0  ;;  %5248 = vrcp.f32 %v6403_v29  ;;  %v4938_v44 = vmul.f32 -1.442695, %v623_v33  ;;  %vm3698_vm14 = vmor %vm3696_vm8, %vm3697_vm11 }
 0x108   : > { %v3099_v45 = vsel %vm3098_vm12, %v5239_v2, %v3095_v42  ;;  %v3695_v46 = vadd.f32 %v5241_v1, %v3694_v43  ;;  %5250 = vpow2.f32 %v5013_v35  ;;  %v643_v48 = vadd.f32 %v642_v37, %v6104_v11 }
 0x109   : > { %v5245_v49 = vpop.eup %5244  ;;  %v3104_v51 = vsel %vm3101_vm13, %v3103_v26, %v3099_v45  ;;  %v3703_v53 = vor.u32 1.1754944e-38, %v3702_v9  ;;  %5252 = vpow2.f32 %v4898_v36  ;;  %vm3701_vm15 = vcmp.eq.f32.partialorder %v3700_v13, 8.507059e+37 }
 0x10a   : > { %723 = vmatmul.bf16.gmra.mxu1 %v6053_v30  ;;  %990 = vmatmul.bf16.gmra.mxu0 %v6053_v30  ;;  %v5247_v32 = vpop.eup %5246  ;;  %4161 = vst [vmem:[%s6188_s25 + $0x2f8] sm:$0xff] %v3104_v51  ;;  %v3699_v54 = vsel %vm3698_vm14, %v5241_v1, %v3695_v46  ;;  %v6418_v41 = vadd.f32 1.0, %v5245_v49  ;;  %5254 = vpow2.f32 %v4938_v44  ;;  %v4978_v56 = vmul.f32 -1.442695, %v643_v48  ;;  %v5818_v48 = vld [vmem:[%s5987_s11 + $0x50] sm:$0xff] }
 0x10b   : > { %812 = vmatmul.bf16.gmra.mxu2 %v6053_v30  ;;  %901 = vmatmul.bf16.gmra.mxu3 %v6053_v30  ;;  %v3704_v39 = vsel %vm3701_vm15, %v3703_v53, %v3699_v54  ;;  %v6422_v50 = vadd.f32 1.0, %v5247_v32  ;;  %v1975_v59 = vand.u32 2147483647, %v6403_v29  ;;  %v1977_v60 = vand.u32 2147483648, %v6403_v29 }
 0x10c   : > { %4201 = vst [vmem:[%s6188_s25 + $0x438] sm:$0xff] %v3704_v39  ;;  %5256 = vrcp.f32 %v6418_v41  ;;  %v663_v61 = vadd.f32 %v662_v55, %v6104_v11  ;;  %vm1971_vm0 = vweird.f32 %v6403_v29  ;;  %v2575_v40 = vand.u32 2147483647, %v6418_v41 }
 0x10d   : > { %v5249_v57 = vpop.eup %5248  ;;  %5258 = vrcp.f32 %v6422_v50  ;;  %v606_v15 = vadd.f32 %v605_v58, %v6104_v11  ;;  %v2577_v62 = vand.u32 2147483648, %v6418_v41  ;;  %v3177_v8 = vand.u32 2147483648, %v6422_v50  ;;  %v645_v58 = vpop.f32.mrf.mxu2 }
 0x10e   : > { %v5251_v47 = vpop.eup %5250  ;;  %v1967_v30 = vmul.f32 %v5249_v57, %v6403_v29  ;;  %5260 = vpow2.f32 %v4978_v56  ;;  %vm6438_vm1 = vcmp.eq.f32.partialorder %v1975_v59, 8.507059e+37  ;;  %v3175_v5 = vand.u32 2147483647, %v6422_v50 }
 0x10f   : > { %v5253_v4 = vpop.eup %5252  ;;  %v6436_v0 = vadd.f32 1.0, %v5251_v47  ;;  %v1978_v7 = vor.u32 1.1754944e-38, %v1977_v60  ;;  %vm2571_vm2 = vweird.f32 %v6418_v41  ;;  %v5018_v28 = vmul.f32 -1.442695, %v663_v61  ;;  %v665_v47 = vpop.f32.mrf.mxu3 }
 0x110   : > { %v1968_v52 = vsub.f32 1.0, %v1967_v30  ;;  %v6443_v6 = vadd.f32 1.0, %v5253_v4  ;;  %v5255_v63 = vpop.eup %5254  ;;  %vm1972_vm3 = vweird.f32 %v5249_v57  ;;  %vm3171_vm4 = vweird.f32 %v6422_v50 }
 0x111   : > { %5262 = vrcp.f32 %v6436_v0  ;;  %v4903_v16 = vmul.f32 -1.442695, %v606_v15  ;;  %vm6455_vm5 = vcmp.eq.f32.partialorder %v2575_v40, 8.507059e+37  ;;  %v2578_v3 = vor.u32 1.1754944e-38, %v2577_v62  ;;  %vm1973_vm7 = vmor %vm1971_vm0, %vm1972_vm3 }
 0x112   : > { %v6447_v12 = vpop.eup %5256  ;;  %v1969_v13 = vmul.f32 %v5249_v57, %v1968_v52  ;;  %5264 = vrcp.f32 %v6443_v6  ;;  %v3178_v9 = vor.u32 1.1754944e-38, %v3177_v8  ;;  %v3775_v19 = vand.u32 2147483647, %v6436_v0 }
 0x113   : > { %v6451_v14 = vpop.eup %5258  ;;  %v2567_v1 = vmul.f32 %v6447_v12, %v6418_v41  ;;  %vm6462_vm6 = vcmp.eq.f32.partialorder %v3175_v5, 8.507059e+37  ;;  %v3777_v22 = vand.u32 2147483648, %v6436_v0  ;;  %v2050_v23 = vand.u32 2147483647, %v6443_v6 }
 0x114   : > { %v1970_v17 = vadd.f32 %v5249_v57, %v1969_v13  ;;  %v3167_v20 = vmul.f32 %v6451_v14, %v6422_v50  ;;  %v5261_v24 = vpop.eup %5260  ;;  %vm2572_vm8 = vweird.f32 %v6447_v12  ;;  %v6472_v10 = vadd.f32 1.0, %v5255_v63  ;;  %v627_v13 = vpop.f32.mrf.mxu1 }
 0x115   : > { %v2568_v25 = vsub.f32 1.0, %v2567_v1  ;;  %5266 = vpow2.f32 %v5018_v28  ;;  %vm3771_vm9 = vweird.f32 %v6436_v0  ;;  %v6475_v33 = vadd.f32 1.0, %v5261_v24  ;;  %vm6506_vm13 = vmor %vm2571_vm2, %vm2572_vm8 }
 0x116   : > { %v1974_v27 = vsel %vm1973_vm7, %v5249_v57, %v1970_v17  ;;  %v3168_v31 = vsub.f32 1.0, %v3167_v20  ;;  %5268 = vpow2.f32 %v4903_v16  ;;  %v2052_v37 = vand.u32 2147483648, %v6443_v6  ;;  %v607_v20 = vpop.f32.mrf.mxu0 }
 0x117   : > { %v6479_v35 = vpop.eup %5262  ;;  %v1979_v29 = vsel %vm6438_vm1, %v1978_v7, %v1974_v27  ;;  %v2569_v36 = vmul.f32 %v6447_v12, %v2568_v25  ;;  %5270 = vrcp.f32 %v6472_v10  ;;  %vm3172_vm10 = vweird.f32 %v6451_v14 }
 0x118   : > { %v6486_v38 = vpop.eup %5264  ;;  %4086 = vst [vmem:[%s6188_s25 + $0xa0] sm:$0xff] %v1979_v29  ;;  %v3169_v42 = vmul.f32 %v6451_v14, %v3168_v31  ;;  %v3767_v43 = vmul.f32 %v6479_v35, %v6436_v0  ;;  %vm2046_vm11 = vweird.f32 %v6443_v6  ;;  %vm6495_vm12 = vcmp.eq.f32.partialorder %v3775_v19, 8.507059e+37  ;;  %vm3173_vm15 = vmor %vm3171_vm4, %vm3172_vm10 }
 0x119   : > { %v2570_v26 = vadd.f32 %v6447_v12, %v2569_v36  ;;  %v3778_v45 = vor.u32 1.1754944e-38, %v3777_v22  ;;  %v2042_v46 = vmul.f32 %v6486_v38, %v6443_v6  ;;  %vm6511_vm14 = vcmp.eq.f32.partialorder %v2050_v23, 8.507059e+37 }
 0x11a   : > { %728 = vmatmul.bf16.gmra.mxu1 %v5818_v48  ;;  %995 = vmatmul.bf16.gmra.mxu0 %v5818_v48  ;;  %v3170_v51 = vadd.f32 %v6451_v14, %v3169_v42  ;;  %v3768_v53 = vsub.f32 1.0, %v3767_v43  ;;  %5272 = vrcp.f32 %v6475_v33  ;;  %v2053_v39 = vor.u32 1.1754944e-38, %v2052_v37  ;;  %v667_v42 = vpop.f32.mrf.mxu3 }
 0x11b   : > { %817 = vmatmul.bf16.gmra.mxu2 %v5818_v48  ;;  %906 = vmatmul.bf16.gmra.mxu3 %v5818_v48  ;;  %v5267_v54 = vpop.eup %5266  ;;  %v2574_v41 = vsel %vm6506_vm13, %v6447_v12, %v2570_v26  ;;  %v2043_v55 = vsub.f32 1.0, %v2042_v46  ;;  %v2650_v56 = vand.u32 2147483647, %v6472_v10  ;;  %vm3772_vm0 = vweird.f32 %v6479_v35 }
 0x11c   : > { %v5269_v59 = vpop.eup %5268  ;;  %v2579_v57 = vsel %vm6455_vm5, %v2578_v3, %v2574_v41  ;;  %v3174_v60 = vsel %vm3173_vm15, %v6451_v14, %v3170_v51  ;;  %v3769_v61 = vmul.f32 %v6479_v35, %v3768_v53  ;;  %vm2047_vm1 = vweird.f32 %v6486_v38  ;;  %vm3773_vm3 = vmor %vm3771_vm9, %vm3772_vm0 }
 0x11d   : > { %v5271_v30 = vpop.eup %5270  ;;  %4126 = vst [vmem:[%s6188_s25 + $0x1e0] sm:$0xff] %v2579_v57  ;;  %v3179_v50 = vsel %vm6462_vm6, %v3178_v9, %v3174_v60  ;;  %v2044_v40 = vmul.f32 %v6486_v38, %v2043_v55  ;;  %vm2646_vm2 = vweird.f32 %v6472_v10  ;;  %v2652_v62 = vand.u32 2147483648, %v6472_v10  ;;  %vm2048_vm5 = vmor %vm2046_vm11, %vm2047_vm1  ;;  %v5819_v55 = vld [vmem:[%s5987_s11 + $0x58] sm:$0xff] }
 0x11e   : > { %4166 = vst [vmem:[%s6188_s25 + $0x320] sm:$0xff] %v3179_v50  ;;  %v3770_v15 = vadd.f32 %v6479_v35, %v3769_v61  ;;  %v2642_v4 = vmul.f32 %v5271_v30, %v6472_v10  ;;  %v6539_v8 = vadd.f32 1.0, %v5267_v54  ;;  %vm6544_vm4 = vcmp.eq.f32.partialorder %v2650_v56, 8.507059e+37  ;;  %v679_v56 = vpop.f32.mrf.mxu1  ;;  %v5820_v61 = vld [vmem:[%s9264_s2] sm:$0x1f] }
 0x11f   : > { %v2045_v52 = vadd.f32 %v6486_v38, %v2044_v40  ;;  %v3250_v5 = vand.u32 2147483647, %v6475_v33  ;;  %v6549_v63 = vadd.f32 1.0, %v5269_v59  ;;  %v3252_v12 = vand.u32 2147483648, %v6475_v33 }
 0x120   : > { %v5273_v7 = vpop.eup %5272  ;;  %v3774_v28 = vsel %vm3773_vm3, %v6479_v35, %v3770_v15  ;;  %v2643_v0 = vsub.f32 1.0, %v2642_v4  ;;  %5274 = vrcp.f32 %v6539_v8  ;;  %vm3246_vm6 = vweird.f32 %v6475_v33  ;;  %v647_v35 = vpop.f32.mrf.mxu2 }
 0x121   : > { %v3779_v16 = vsel %vm6495_vm12, %v3778_v45, %v3774_v28  ;;  %v2049_v14 = vsel %vm2048_vm5, %v6486_v38, %v2045_v52  ;;  %v3242_v1 = vmul.f32 %v5273_v7, %v6475_v33  ;;  %vm2647_vm7 = vweird.f32 %v5271_v30 }
 0x122   : > { %4206 = vst [vmem:[%s6188_s25 + $0x460] sm:$0xff] %v3779_v16  ;;  %v2054_v6 = vsel %vm6511_vm14, %v2053_v39, %v2049_v14  ;;  %v2644_v18 = vmul.f32 %v5271_v30, %v2643_v0  ;;  %v3852_v3 = vand.u32 2147483648, %v6539_v8  ;;  %v2653_v9 = vor.u32 1.1754944e-38, %v2652_v62  ;;  %vm2648_vm10 = vmor %vm2646_vm2, %vm2647_vm7  ;;  %v946_v62 = vpop.f32.mrf.mxu0 }
 0x123   : > { %4091 = vst [vmem:[%s6188_s25 + $0xc8] sm:$0xff] %v2054_v6  ;;  %v3243_v19 = vsub.f32 1.0, %v3242_v1  ;;  %vm6566_vm8 = vcmp.eq.f32.partialorder %v3250_v5, 8.507059e+37  ;;  %5276 = vrcp.f32 %v6549_v63  ;;  %vm3247_vm9 = vweird.f32 %v5273_v7 }
 0x124   : > { %v2645_v21 = vadd.f32 %v5271_v30, %v2644_v18  ;;  %v3253_v22 = vor.u32 1.1754944e-38, %v3252_v12  ;;  %v3850_v23 = vand.u32 2147483647, %v6539_v8  ;;  %vm3846_vm11 = vweird.f32 %v6539_v8  ;;  %vm3248_vm13 = vmor %vm3246_vm6, %vm3247_vm9 }
 0x125   : > { %v3244_v24 = vmul.f32 %v5273_v7, %v3243_v19  ;;  %v2125_v25 = vand.u32 2147483647, %v6549_v63  ;;  %v626_v27 = vadd.f32 %v6477_v34, %v6104_v11  ;;  %v646_v31 = vadd.f32 %v645_v58, %v6104_v11 }
 0x126   : > { %v5275_v29 = vpop.eup %5274  ;;  %v2649_v36 = vsel %vm2648_vm10, %v5271_v30, %v2645_v21  ;;  %v3853_v37 = vor.u32 1.1754944e-38, %v3852_v3  ;;  %vm2121_vm12 = vweird.f32 %v6549_v63  ;;  %v666_v10 = vadd.f32 %v665_v47, %v6104_v11 }
 0x127   : > { %v608_v38 = vadd.f32 %v607_v20, %v6104_v11  ;;  %v2654_v43 = vsel %vm6544_vm4, %v2653_v9, %v2649_v36  ;;  %v3245_v26 = vadd.f32 %v5273_v7, %v3244_v24  ;;  %v3842_v34 = vmul.f32 %v5275_v29, %v6539_v8  ;;  %v6613_v8 = vpop.f32.mrf.mxu3 }
 0x128   : > { %v2127_v44 = vand.u32 2147483648, %v6549_v63  ;;  %4131 = vst [vmem:[%s6188_s25 + $0x208] sm:$0xff] %v2654_v43  ;;  %v4943_v45 = vmul.f32 -1.442695, %v626_v27  ;;  %v4983_v46 = vmul.f32 -1.442695, %v646_v31  ;;  %v628_v48 = vadd.f32 %v627_v13, %v6104_v11  ;;  %v768_v5 = vpop.f32.mrf.mxu2 }
 0x129   : > { %v648_v49 = vadd.f32 %v647_v35, %v6104_v11  ;;  %v5277_v51 = vpop.eup %5276  ;;  %v3249_v53 = vsel %vm3248_vm13, %v5273_v7, %v3245_v26  ;;  %v3843_v32 = vsub.f32 1.0, %v3842_v34  ;;  %v5023_v54 = vmul.f32 -1.442695, %v666_v10  ;;  %v5821_v34 = vld [vmem:[%s5987_s11 + $0x60] sm:$0xff] }
 0x12a   : > { %v4908_v41 = vmul.f32 -1.442695, %v608_v38  ;;  %733 = vmatmul.bf16.gmra.mxu1 %v5819_v55  ;;  %1000 = vmatmul.bf16.gmra.mxu0 %v5819_v55  ;;  %v3254_v39 = vsel %vm6566_vm8, %v3253_v22, %v3249_v53  ;;  %vm3847_vm14 = vweird.f32 %v5275_v29  ;;  %v2117_v33 = vmul.f32 %v5277_v51, %v6549_v63  ;;  %v681_v63 = vpop.f32.mrf.mxu1  ;;  %v6657_v26 = vpop.f32.mrf.mxu0 }
 0x12b   : > { %5278 = vpow2.f32 %v4943_v45  ;;  %822 = vmatmul.bf16.gmra.mxu2 %v5819_v55  ;;  %911 = vmatmul.bf16.gmra.mxu3 %v5819_v55  ;;  %4171 = vst [vmem:[%s6188_s25 + $0x348] sm:$0xff] %v3254_v39  ;;  %v3844_v58 = vmul.f32 %v5275_v29, %v3843_v32  ;;  %v4948_v59 = vmul.f32 -1.442695, %v628_v48  ;;  %v4988_v57 = vmul.f32 -1.442695, %v648_v49  ;;  %vm3848_vm0 = vmor %vm3846_vm11, %vm3847_vm14 }
 0x12c   : > { %5280 = vpow2.f32 %v4983_v46  ;;  %v2118_v60 = vsub.f32 1.0, %v2117_v33  ;;  %vm2122_vm15 = vweird.f32 %v5277_v51  ;;  %v6600_v47 = vperm.slane %v5820_v61, 1 }
 0x12d   : > { %5282 = vpow2.f32 %v5023_v54  ;;  %v3845_v30 = vadd.f32 %v5275_v29, %v3844_v58  ;;  %v668_v50 = vadd.f32 %v667_v42, %v6104_v11  ;;  %v6603_v40 = vperm.slane %v5820_v61, 4  ;;  %vm2123_vm3 = vmor %vm2121_vm12, %vm2122_vm15 }
 0x12e   : > { %5284 = vpow2.f32 %v4908_v41  ;;  %v2119_v15 = vmul.f32 %v5277_v51, %v2118_v60  ;;  %v680_v4 = vadd.f32 %v679_v56, %v6600_v47  ;;  %v6609_v52 = vperm.slane %v5820_v61, 2 }
 0x12f   : > { %5286 = vpow2.f32 %v4948_v59  ;;  %v3849_v2 = vsel %vm3848_vm0, %v5275_v29, %v3845_v30  ;;  %vm3851_vm1 = vcmp.eq.f32.partialorder %v3850_v23, 8.507059e+37  ;;  %vm2126_vm2 = vcmp.eq.f32.partialorder %v2125_v25, 8.507059e+37  ;;  %v6670_v53 = vpop.f32.mrf.mxu3 }
 0x130   : > { %5288 = vpow2.f32 %v4988_v57  ;;  %v3854_v11 = vsel %vm3851_vm1, %v3853_v37, %v3849_v2  ;;  %v2120_v28 = vadd.f32 %v5277_v51, %v2119_v15  ;;  %v2128_v12 = vor.u32 1.1754944e-38, %v2127_v44 }
 0x131   : > { %v5279_v7 = vpop.eup %5278  ;;  %4211 = vst [vmem:[%s6188_s25 + $0x488] sm:$0xff] %v3854_v11  ;;  %v5028_v16 = vmul.f32 -1.442695, %v668_v50  ;;  %v947_v14 = vadd.f32 %v946_v62, %v6603_v40  ;;  %v4874_v3 = vmul.f32 -1.442695, %v680_v4  ;;  %v769_v9 = vadd.f32 %v768_v5, %v6609_v52 }
 0x132   : > { %v5281_v0 = vpop.eup %5280  ;;  %v6619_v13 = vadd.f32 1.0, %v5279_v7  ;;  %v2124_v6 = vsel %vm2123_vm3, %v5277_v51, %v2120_v28  ;;  %v6643_v36 = vadd.f32 %v681_v63, %v6600_v47  ;;  %v6649_v38 = vperm.slane %v5820_v61, 3  ;;  %v6668_v51 = vpop.f32.mrf.mxu2 }
 0x133   : > { %v5283_v1 = vpop.eup %5282  ;;  %v6622_v18 = vadd.f32 1.0, %v5281_v0  ;;  %v2129_v17 = vsel %vm2126_vm2, %v2128_v12, %v2124_v6  ;;  %v6632_v24 = vmul.f32 -1.442695, %v947_v14  ;;  %v6637_v31 = vmul.f32 -1.442695, %v769_v9 }
 0x134   : > { %v5285_v19 = vpop.eup %5284  ;;  %5290 = vrcp.f32 %v6619_v13  ;;  %4096 = vst [vmem:[%s6188_s25 + $0xf0] sm:$0xff] %v2129_v17  ;;  %v6628_v22 = vadd.f32 1.0, %v5283_v1  ;;  %v2725_v25 = vand.u32 2147483647, %v6619_v13  ;;  %v2727_v35 = vand.u32 2147483648, %v6619_v13 }
 0x135   : > { %v5287_v20 = vpop.eup %5286  ;;  %5292 = vrcp.f32 %v6622_v18  ;;  %v6630_v23 = vadd.f32 1.0, %v5285_v19  ;;  %v3325_v29 = vand.u32 2147483647, %v6622_v18  ;;  %v3327_v37 = vand.u32 2147483648, %v6622_v18 }
 0x136   : > { %v5289_v21 = vpop.eup %5288  ;;  %5294 = vpow2.f32 %v5028_v16  ;;  %v6635_v27 = vadd.f32 1.0, %v5287_v20  ;;  %vm2721_vm4 = vweird.f32 %v6619_v13  ;;  %vm3321_vm5 = vweird.f32 %v6622_v18 }
 0x137   : > { %5296 = vpow2.f32 %v4874_v3  ;;  %v6647_v10 = vadd.f32 1.0, %v5289_v21  ;;  %v3927_v43 = vand.u32 2147483648, %v6628_v22  ;;  %vm6662_vm6 = vcmp.eq.f32.partialorder %v2725_v25, 8.507059e+37 }
 0x138   : > { %5298 = vrcp.f32 %v6628_v22  ;;  %v3925_v48 = vand.u32 2147483647, %v6628_v22  ;;  %v2202_v49 = vand.u32 2147483648, %v6630_v23  ;;  %v2728_v54 = vor.u32 1.1754944e-38, %v2727_v35 }
 0x139   : > { %5300 = vrcp.f32 %v6630_v23  ;;  %vm6673_vm7 = vcmp.eq.f32.partialorder %v3325_v29, 8.507059e+37  ;;  %v2200_v39 = vand.u32 2147483647, %v6630_v23  ;;  %v3328_v58 = vor.u32 1.1754944e-38, %v3327_v37 }
 0x13a   : > { %v6651_v42 = vpop.eup %5290  ;;  %5302 = vrcp.f32 %v6635_v27  ;;  %738 = vmatmul.bf16.gmra.mxu1 %v5821_v34  ;;  %1005 = vmatmul.bf16.gmra.mxu0 %v5821_v34  ;;  %vm3921_vm8 = vweird.f32 %v6628_v22  ;;  %v3928_v60 = vor.u32 1.1754944e-38, %v3927_v43  ;;  %vm2196_vm11 = vweird.f32 %v6630_v23 }
 0x13b   : > { %v5293_v44 = vpop.eup %5292  ;;  %v2717_v45 = vmul.f32 %v6651_v42, %v6619_v13  ;;  %827 = vmatmul.bf16.gmra.mxu2 %v5821_v34  ;;  %916 = vmatmul.bf16.gmra.mxu3 %v5821_v34  ;;  %5304 = vrcp.f32 %v6647_v10  ;;  %vm2722_vm9 = vweird.f32 %v6651_v42  ;;  %vm6684_vm12 = vcmp.eq.f32.partialorder %v3925_v48, 8.507059e+37  ;;  %v684_v48 = vpop.f32.mrf.mxu1 }
 0x13c   : > { %v5295_v32 = vpop.eup %5294  ;;  %v3317_v41 = vmul.f32 %v5293_v44, %v6622_v18  ;;  %vm3322_vm10 = vweird.f32 %v5293_v44  ;;  %v2203_v4 = vor.u32 1.1754944e-38, %v2202_v49  ;;  %vm2796_vm13 = vweird.f32 %v6635_v27  ;;  %vm2723_vm0 = vmor %vm2721_vm4, %vm2722_vm9 }
 0x13d   : > { %v5297_v33 = vpop.eup %5296  ;;  %v2718_v56 = vsub.f32 1.0, %v2717_v45  ;;  %v2800_v62 = vand.u32 2147483647, %v6635_v27  ;;  %vm6691_vm14 = vcmp.eq.f32.partialorder %v2200_v39, 8.507059e+37  ;;  %v2802_v28 = vand.u32 2147483648, %v6635_v27  ;;  %vm3323_vm2 = vmor %vm3321_vm5, %vm3322_vm10 }
 0x13e   : > { %v5299_v59 = vpop.eup %5298  ;;  %v3318_v57 = vsub.f32 1.0, %v3317_v41  ;;  %v3400_v0 = vand.u32 2147483647, %v6647_v10  ;;  %v6703_v3 = vadd.f32 1.0, %v5295_v32  ;;  %v6709_v63 = vadd.f32 1.0, %v5297_v33 }
 0x13f   : > { %v5301_v61 = vpop.eup %5300  ;;  %v2719_v30 = vmul.f32 %v6651_v42, %v2718_v56  ;;  %v3917_v50 = vmul.f32 %v5299_v59, %v6628_v22  ;;  %vm3922_vm15 = vweird.f32 %v5299_v59  ;;  %v3402_v34 = vand.u32 2147483648, %v6647_v10 }
 0x140   : > { %v5303_v2 = vpop.eup %5302  ;;  %v3319_v5 = vmul.f32 %v5293_v44, %v3318_v57  ;;  %v2192_v7 = vmul.f32 %v5301_v61, %v6630_v23  ;;  %vm2197_vm1 = vweird.f32 %v5301_v61  ;;  %vm3923_vm4 = vmor %vm3921_vm8, %vm3922_vm15  ;;  %5306 = vrcp.f32 %v6703_v3 }
 0x141   : > { %v2720_v12 = vadd.f32 %v6651_v42, %v2719_v30  ;;  %v3918_v16 = vsub.f32 1.0, %v3917_v50  ;;  %v2792_v14 = vmul.f32 %v5303_v2, %v6635_v27  ;;  %v5305_v9 = vpop.eup %5304  ;;  %vm2797_vm3 = vweird.f32 %v5303_v2  ;;  %vm2198_vm5 = vmor %vm2196_vm11, %vm2197_vm1 }
 0x142   : > { %v3320_v1 = vadd.f32 %v5293_v44, %v3319_v5  ;;  %v2193_v6 = vsub.f32 1.0, %v2192_v7  ;;  %v3392_v35 = vmul.f32 %v5305_v9, %v6647_v10  ;;  %v2803_v46 = vor.u32 1.1754944e-38, %v2802_v28 }
 0x143   : > { %v2724_v19 = vsel %vm2723_vm0, %v6651_v42, %v2720_v12  ;;  %v3919_v17 = vmul.f32 %v5299_v59, %v3918_v16  ;;  %v2793_v20 = vsub.f32 1.0, %v2792_v14  ;;  %5308 = vrcp.f32 %v6709_v63  ;;  %v5822_v12 = vld [vmem:[%s5987_s11 + $0x68] sm:$0xff] }
 0x144   : > { %v2729_v13 = vsel %vm6662_vm6, %v2728_v54, %v2724_v19  ;;  %v3324_v21 = vsel %vm3323_vm2, %v5293_v44, %v3320_v1  ;;  %v2194_v25 = vmul.f32 %v5301_v61, %v2193_v6  ;;  %v3393_v43 = vsub.f32 1.0, %v3392_v35  ;;  %v6732_v54 = vpop.f32.mrf.mxu0 }
 0x145   : > { %4136 = vst [vmem:[%s6188_s25 + $0x230] sm:$0xff] %v2729_v13  ;;  %v3329_v29 = vsel %vm6673_vm7, %v3328_v58, %v3324_v21  ;;  %v3920_v37 = vadd.f32 %v5299_v59, %v3919_v17  ;;  %v2794_v42 = vmul.f32 %v5303_v2, %v2793_v20  ;;  %vm3397_vm6 = vweird.f32 %v5305_v9  ;;  %vm2798_vm7 = vmor %vm2796_vm13, %vm2797_vm3 }
 0x146   : > { %4176 = vst [vmem:[%s6188_s25 + $0x370] sm:$0xff] %v3329_v29  ;;  %v2195_v18 = vadd.f32 %v5301_v61, %v2194_v25  ;;  %v3394_v32 = vmul.f32 %v5305_v9, %v3393_v43  ;;  %vm2801_vm8 = vcmp.eq.f32.partialorder %v2800_v62, 8.507059e+37  ;;  %vm3396_vm9 = vweird.f32 %v6647_v10  ;;  %v5307_v58 = vpop.eup %5306  ;;  %v6761_v62 = vpop.f32.mrf.mxu3 }
 0x147   : > { %v3924_v44 = vsel %vm3923_vm4, %v5299_v59, %v3920_v37  ;;  %v2795_v45 = vadd.f32 %v5303_v2, %v2794_v42  ;;  %vm3401_vm10 = vcmp.eq.f32.partialorder %v3400_v0, 8.507059e+37  ;;  %vm3398_vm11 = vmor %vm3396_vm9, %vm3397_vm6  ;;  %v3403_v27 = vor.u32 1.1754944e-38, %v3402_v34  ;;  %v6765_v0 = vpop.f32.mrf.mxu1 }
 0x148   : > { %v3929_v22 = vsel %vm6684_vm12, %v3928_v60, %v3924_v44  ;;  %v2199_v49 = vsel %vm2198_vm5, %v5301_v61, %v2195_v18  ;;  %v3395_v39 = vadd.f32 %v5305_v9, %v3394_v32  ;;  %5310 = vpow2.f32 %v6632_v24 }
 0x149   : > { %4216 = vst [vmem:[%s6188_s25 + $0x4b0] sm:$0xff] %v3929_v22  ;;  %v2204_v23 = vsel %vm6691_vm14, %v2203_v4, %v2199_v49  ;;  %v2799_v41 = vsel %vm2798_vm7, %v5303_v2, %v2795_v45  ;;  %v858_v33 = vadd.f32 %v6613_v8, %v6649_v38  ;;  %v4879_v56 = vmul.f32 -1.442695, %v6643_v36  ;;  %v5309_v30 = vpop.eup %5308  ;;  %v6759_v4 = vpop.f32.mrf.mxu2 }
 0x14a   : > { %4101 = vst [vmem:[%s6188_s25 + $0x118] sm:$0xff] %v2204_v23  ;;  %v2804_v55 = vsel %vm2801_vm8, %v2803_v46, %v2799_v41  ;;  %v3399_v59 = vsel %vm3398_vm11, %v5305_v9, %v3395_v39  ;;  %vm3996_vm12 = vweird.f32 %v6703_v3  ;;  %5312 = vpow2.f32 %v6637_v31  ;;  %743 = vmatmul.bf16.gmra.mxu1 %v5822_v12 }
 0x14b   : > { %4141 = vst [vmem:[%s6188_s25 + $0x258] sm:$0xff] %v2804_v55  ;;  %v949_v10 = vadd.f32 %v6657_v26, %v6603_v40  ;;  %v3404_v57 = vsel %vm3401_vm10, %v3403_v27, %v3399_v59  ;;  %v3992_v60 = vmul.f32 %v5307_v58, %v6703_v3  ;;  %v4000_v61 = vand.u32 2147483647, %v6703_v3 }
 0x14c   : > { %v4002_v24 = vand.u32 2147483648, %v6703_v3  ;;  %4181 = vst [vmem:[%s6188_s25 + $0x398] sm:$0xff] %v3404_v57  ;;  %v4876_v8 = vmul.f32 -1.442695, %v858_v33  ;;  %5314 = vpow2.f32 %v4879_v56  ;;  %v771_v50 = vadd.f32 %v6668_v51, %v6609_v52  ;;  %v6771_v6 = vpop.f32.mrf.mxu0  ;;  %1010 = vmatmul.bf16.gmra.mxu0 %v5822_v12 }
 0x14d   : > { %v4882_v36 = vmul.f32 -1.442695, %v949_v10  ;;  %v3993_v15 = vsub.f32 1.0, %v3992_v60  ;;  %v1682_v31 = vmul.f32 %v5309_v30, %v6709_v63  ;;  %vm1686_vm13 = vweird.f32 %v6709_v63 }
 0x14e   : > { %v860_v26 = vadd.f32 %v6670_v53, %v6649_v38  ;;  %v1690_v2 = vand.u32 2147483647, %v6709_v63  ;;  %5316 = vpow2.f32 %v4876_v8  ;;  %v4880_v5 = vmul.f32 -1.442695, %v771_v50  ;;  %v5311_v51 = vpop.eup %5310 }
 0x14f   : > { %v685_v7 = vadd.f32 %v684_v48, %v6600_v47  ;;  %v3994_v11 = vmul.f32 %v5307_v58, %v3993_v15  ;;  %vm3997_vm14 = vweird.f32 %v5307_v58  ;;  %v1683_v28 = vsub.f32 1.0, %v1682_v31 }
 0x150   : > { %5318 = vpow2.f32 %v4882_v36  ;;  %v5313_v53 = vpop.eup %5312  ;;  %vm1687_vm15 = vweird.f32 %v5309_v30  ;;  %v1692_v16 = vand.u32 2147483648, %v6709_v63  ;;  %v6769_v14 = vadd.f32 1.0, %v5311_v51  ;;  %vm3998_vm0 = vmor %vm3996_vm12, %vm3997_vm14 }
 0x151   : > { %v4881_v1 = vmul.f32 -1.442695, %v860_v26  ;;  %v3995_v9 = vadd.f32 %v5307_v58, %v3994_v11  ;;  %v1684_v19 = vmul.f32 %v5309_v30, %v1683_v28  ;;  %v6773_v17 = vadd.f32 1.0, %v5313_v53  ;;  %vm1688_vm3 = vmor %vm1686_vm13, %vm1687_vm15  ;;  %v6797_v32 = vpop.f32.mrf.mxu2  ;;  %832 = vmatmul.bf16.gmra.mxu2 %v5822_v12 }
 0x152   : > { %5320 = vpow2.f32 %v4880_v5  ;;  %v5315_v20 = vpop.eup %5314  ;;  %vm4001_vm1 = vcmp.eq.f32.partialorder %v4000_v61, 8.507059e+37  ;;  %v4003_v13 = vor.u32 1.1754944e-38, %v4002_v24  ;;  %v4884_v21 = vmul.f32 -1.442695, %v685_v7 }
 0x153   : > { %5322 = vrcp.f32 %v6769_v14  ;;  %v3999_v25 = vsel %vm3998_vm0, %v5307_v58, %v3995_v9  ;;  %v1685_v35 = vadd.f32 %v5309_v30, %v1684_v19  ;;  %vm1691_vm2 = vcmp.eq.f32.partialorder %v1690_v2, 8.507059e+37 }
 0x154   : > { %5324 = vrcp.f32 %v6773_v17  ;;  %v5317_v29 = vpop.eup %5316  ;;  %v4004_v37 = vsel %vm4001_vm1, %v4003_v13, %v3999_v25  ;;  %v1693_v3 = vor.u32 1.1754944e-38, %v1692_v16  ;;  %v952_v42 = vadd.f32 %v6732_v54, %v6603_v40  ;;  %v6799_v54 = vpop.f32.mrf.mxu3  ;;  %921 = vmatmul.bf16.gmra.mxu3 %v5822_v12 }
 0x155   : > { %5326 = vpow2.f32 %v4881_v1  ;;  %4221 = vst [vmem:[%s6188_s25 + $0x4d8] sm:$0xff] %v4004_v37  ;;  %v1689_v43 = vsel %vm1688_vm3, %v5309_v30, %v1685_v35  ;;  %v1735_v34 = vand.u32 2147483647, %v6769_v14  ;;  %v6787_v44 = vadd.f32 1.0, %v5317_v29 }
 0x156   : > { %v5319_v18 = vpop.eup %5318  ;;  %v6789_v45 = vadd.f32 1.0, %v5315_v20  ;;  %v1694_v46 = vsel %vm1691_vm2, %v1693_v3, %v1689_v43  ;;  %v1737_v48 = vand.u32 2147483648, %v6769_v14  ;;  %5328 = vpow2.f32 %v4884_v21 }
 0x157   : > { %4067 = vst [vmem:[%s6188_s25 + $0x8] sm:$0xff] %v1694_v46  ;;  %v1705_v22 = vand.u32 2147483647, %v6773_v17  ;;  %5330 = vrcp.f32 %v6787_v44  ;;  %v6795_v49 = vadd.f32 1.0, %v5319_v18  ;;  %vm1731_vm4 = vweird.f32 %v6769_v14 }
 0x158   : > { %v5321_v63 = vpop.eup %5320  ;;  %v1707_v41 = vand.u32 2147483648, %v6773_v17  ;;  %5332 = vrcp.f32 %v6789_v45  ;;  %v4887_v55 = vmul.f32 -1.442695, %v952_v42  ;;  %vm6805_vm5 = vcmp.eq.f32.partialorder %v1735_v34, 8.507059e+37 }
 0x159   : > { %v5323_v23 = vpop.eup %5322  ;;  %vm1701_vm6 = vweird.f32 %v6773_v17  ;;  %v1722_v56 = vand.u32 2147483648, %v6787_v44  ;;  %v1738_v59 = vor.u32 1.1754944e-38, %v1737_v48  ;;  %v1720_v57 = vand.u32 2147483647, %v6787_v44 }
 0x15a   : > { %v5325_v39 = vpop.eup %5324  ;;  %v1727_v27 = vmul.f32 %v5323_v23, %v6769_v14  ;;  %v1767_v60 = vand.u32 2147483648, %v6789_v45  ;;  %vm6814_vm7 = vcmp.eq.f32.partialorder %v1705_v22, 8.507059e+37  ;;  %v1765_v30 = vand.u32 2147483647, %v6789_v45 }
 0x15b   : > { %v5327_v58 = vpop.eup %5326  ;;  %v1697_v10 = vmul.f32 %v5325_v39, %v6773_v17  ;;  %5334 = vrcp.f32 %v6795_v49  ;;  %v1708_v50 = vor.u32 1.1754944e-38, %v1707_v41  ;;  %vm1716_vm8 = vweird.f32 %v6787_v44 }
 0x15c   : > { %v1728_v61 = vsub.f32 1.0, %v1727_v27  ;;  %v5329_v8 = vpop.eup %5328  ;;  %v6821_v15 = vadd.f32 1.0, %v5321_v63  ;;  %vm1732_vm9 = vweird.f32 %v5323_v23  ;;  %vm1702_vm10 = vweird.f32 %v5325_v39 }
 0x15d   : > { %v1698_v36 = vsub.f32 1.0, %v1697_v10  ;;  %v5331_v31 = vpop.eup %5330  ;;  %v1723_v2 = vor.u32 1.1754944e-38, %v1722_v56  ;;  %vm1761_vm11 = vweird.f32 %v6789_v45  ;;  %vm6825_vm12 = vcmp.eq.f32.partialorder %v1720_v57, 8.507059e+37  ;;  %vm1733_vm14 = vmor %vm1731_vm4, %vm1732_vm9 }
 0x15e   : > { %v1729_v26 = vmul.f32 %v5323_v23, %v1728_v61  ;;  %v5333_v5 = vpop.eup %5332  ;;  %v1712_v51 = vmul.f32 %v5331_v31, %v6787_v44  ;;  %v1768_v28 = vor.u32 1.1754944e-38, %v1767_v60  ;;  %v1810_v12 = vand.u32 2147483647, %v6795_v49  ;;  %vm1703_vm0 = vmor %vm1701_vm6, %vm1702_vm10  ;;  %v6884_v61 = vpop.f32.mrf.mxu0 }
 0x15f   : > { %v1699_v7 = vmul.f32 %v5325_v39, %v1698_v36  ;;  %v1757_v16 = vmul.f32 %v5333_v5, %v6789_v45  ;;  %vm6831_vm13 = vcmp.eq.f32.partialorder %v1765_v30, 8.507059e+37  ;;  %v1812_v9 = vand.u32 2147483648, %v6795_v49 }
 0x160   : > { %v1730_v53 = vadd.f32 %v5323_v23, %v1729_v26  ;;  %5336 = vpow2.f32 %v4887_v55  ;;  %v1713_v20 = vsub.f32 1.0, %v1712_v51  ;;  %vm1806_vm15 = vweird.f32 %v6795_v49 }
 0x161   : > { %v1700_v19 = vadd.f32 %v5325_v39, %v1699_v7  ;;  %5338 = vrcp.f32 %v6821_v15  ;;  %v6841_v13 = vadd.f32 1.0, %v5327_v58  ;;  %v5335_v21 = vpop.eup %5334  ;;  %vm1717_vm1 = vweird.f32 %v5331_v31 }
 0x162   : > { %v1734_v25 = vsel %vm1733_vm14, %v5323_v23, %v1730_v53  ;;  %v1758_v35 = vsub.f32 1.0, %v1757_v16  ;;  %v6846_v14 = vadd.f32 1.0, %v5329_v8  ;;  %v1714_v3 = vmul.f32 %v5331_v31, %v1713_v20  ;;  %vm1718_vm4 = vmor %vm1716_vm8, %vm1717_vm1 }
 0x163   : > { %v1739_v29 = vsel %vm6805_vm5, %v1738_v59, %v1734_v25  ;;  %v1704_v37 = vsel %vm1703_vm0, %v5325_v39, %v1700_v19  ;;  %v1802_v42 = vmul.f32 %v5335_v21, %v6795_v49  ;;  %vm1762_vm2 = vweird.f32 %v5333_v5  ;;  %v6877_v59 = vpop.f32.mrf.mxu1 }
 0x164   : > { %4070 = vst [vmem:[%s6188_s25 + $0x20] sm:$0xff] %v1739_v29  ;;  %v1709_v18 = vsel %vm6814_vm7, %v1708_v50, %v1704_v37  ;;  %v1759_v43 = vmul.f32 %v5333_v5, %v1758_v35  ;;  %v1780_v17 = vand.u32 2147483647, %v6821_v15  ;;  %v1715_v34 = vadd.f32 %v5331_v31, %v1714_v3  ;;  %vm1763_vm6 = vmor %vm1761_vm11, %vm1762_vm2  ;;  %v778_v35 = vpop.f32.mrf.mxu2  ;;  %v6922_v29 = vpop.f32.mrf.mxu3 }
 0x165   : > { %4068 = vst [vmem:[%s6188_s25 + $0x10] sm:$0xff] %v1709_v18  ;;  %v1803_v46 = vsub.f32 1.0, %v1802_v42  ;;  %vm6856_vm3 = vcmp.eq.f32.partialorder %v1810_v12, 8.507059e+37  ;;  %5340 = vrcp.f32 %v6841_v13  ;;  %v1813_v23 = vor.u32 1.1754944e-38, %v1812_v9  ;;  %v5823_v18 = vld [vmem:[%s5987_s11 + $0x70] sm:$0xff] }
 0x166   : > { %v5337_v63 = vpop.eup %5336  ;;  %v1760_v22 = vadd.f32 %v5333_v5, %v1759_v43  ;;  %vm1776_vm5 = vweird.f32 %v6821_v15  ;;  %v1782_v41 = vand.u32 2147483648, %v6821_v15  ;;  %v1719_v39 = vsel %vm1718_vm4, %v5331_v31, %v1715_v34 }
 0x167   : > { %v5339_v55 = vpop.eup %5338  ;;  %v1804_v27 = vmul.f32 %v5335_v21, %v1803_v46  ;;  %vm1807_vm7 = vweird.f32 %v5335_v21  ;;  %5342 = vrcp.f32 %v6846_v14  ;;  %v1724_v44 = vsel %vm6825_vm12, %v1723_v2, %v1719_v39 }
 0x168   : > { %v1764_v33 = vsel %vm1763_vm6, %v5333_v5, %v1760_v22  ;;  %v1772_v56 = vmul.f32 %v5339_v55, %v6821_v15  ;;  %vm6873_vm8 = vcmp.eq.f32.partialorder %v1780_v17, 8.507059e+37  ;;  %4069 = vst [vmem:[%s6188_s25 + $0x18] sm:$0xff] %v1724_v44  ;;  %v1795_v57 = vand.u32 2147483647, %v6841_v13  ;;  %vm1808_vm9 = vmor %vm1806_vm15, %vm1807_vm7 }
 0x169   : > { %v1769_v45 = vsel %vm6831_vm13, %v1768_v28, %v1764_v33  ;;  %v1805_v10 = vadd.f32 %v5335_v21, %v1804_v27  ;;  %v1797_v60 = vand.u32 2147483648, %v6841_v13  ;;  %v1783_v30 = vor.u32 1.1754944e-38, %v1782_v41 }
 0x16a   : > { %4072 = vst [vmem:[%s6188_s25 + $0x30] sm:$0xff] %v1769_v45  ;;  %v1773_v24 = vsub.f32 1.0, %v1772_v56  ;;  %vm1791_vm10 = vweird.f32 %v6841_v13  ;;  %v6890_v8 = vadd.f32 1.0, %v5337_v63  ;;  %vm1777_vm11 = vweird.f32 %v5339_v55  ;;  %v6935_v63 = vpop.f32.mrf.mxu0  ;;  %1015 = vmatmul.bf16.gmra.mxu0 %v5823_v18 }
 0x16b   : > { %v5341_v36 = vpop.eup %5340  ;;  %v1809_v50 = vsel %vm1808_vm9, %v5335_v21, %v1805_v10  ;;  %vm1836_vm12 = vweird.f32 %v6846_v14  ;;  %v774_v31 = vadd.f32 %v6759_v4, %v6609_v52  ;;  %v863_v5 = vadd.f32 %v6761_v62, %v6649_v38  ;;  %vm1778_vm14 = vmor %vm1776_vm5, %vm1777_vm11  ;;  %v6925_v42 = vpop.f32.mrf.mxu1  ;;  %748 = vmatmul.bf16.gmra.mxu1 %v5823_v18 }
 0x16c   : > { %v1814_v26 = vsel %vm6856_vm3, %v1813_v23, %v1809_v50  ;;  %v1774_v49 = vmul.f32 %v5339_v55, %v1773_v24  ;;  %v1787_v2 = vmul.f32 %v5341_v36, %v6841_v13  ;;  %vm6901_vm13 = vcmp.eq.f32.partialorder %v1795_v57, 8.507059e+37 }
 0x16d   : > { %v5343_v7 = vpop.eup %5342  ;;  %4075 = vst [vmem:[%s6188_s25 + $0x48] sm:$0xff] %v1814_v26  ;;  %v1798_v11 = vor.u32 1.1754944e-38, %v1797_v60  ;;  %v1840_v28 = vand.u32 2147483647, %v6846_v14  ;;  %5344 = vrcp.f32 %v6890_v8  ;;  %v687_v16 = vadd.f32 %v6765_v0, %v6600_v47  ;;  %v6965_v26 = vpop.f32.mrf.mxu3  ;;  %926 = vmatmul.bf16.gmra.mxu3 %v5823_v18 }
 0x16e   : > { %v1775_v4 = vadd.f32 %v5339_v55, %v1774_v49  ;;  %v1788_v12 = vsub.f32 1.0, %v1787_v2  ;;  %v1832_v53 = vmul.f32 %v5343_v7, %v6846_v14  ;;  %vm1792_vm15 = vweird.f32 %v5341_v36 }
 0x16f   : > { %v1842_v62 = vand.u32 2147483648, %v6846_v14  ;;  %v4885_v1 = vmul.f32 -1.442695, %v774_v31  ;;  %v954_v9 = vadd.f32 %v6771_v6, %v6603_v40  ;;  %v4886_v25 = vmul.f32 -1.442695, %v863_v5  ;;  %vm1793_vm2 = vmor %vm1791_vm10, %vm1792_vm15  ;;  %v6963_v31 = vpop.f32.mrf.mxu2  ;;  %837 = vmatmul.bf16.gmra.mxu2 %v5823_v18 }
 0x170   : > { %v1779_v19 = vsel %vm1778_vm14, %v5339_v55, %v1775_v4  ;;  %v1789_v20 = vmul.f32 %v5341_v36, %v1788_v12  ;;  %v1833_v21 = vsub.f32 1.0, %v1832_v53  ;;  %vm1837_vm0 = vweird.f32 %v5343_v7 }
 0x171   : > { %v1784_v0 = vsel %vm6873_vm8, %v1783_v30, %v1779_v19  ;;  %vm6918_vm1 = vcmp.eq.f32.partialorder %v1840_v28, 8.507059e+37  ;;  %5346 = vpow2.f32 %v4885_v1  ;;  %v4889_v3 = vmul.f32 -1.442695, %v687_v16  ;;  %vm1838_vm3 = vmor %vm1836_vm12, %vm1837_vm0 }
 0x172   : > { %4073 = vst [vmem:[%s6188_s25 + $0x38] sm:$0xff] %v1784_v0  ;;  %v1790_v37 = vadd.f32 %v5341_v36, %v1789_v20  ;;  %v1834_v6 = vmul.f32 %v5343_v7, %v1833_v21  ;;  %5348 = vpow2.f32 %v4886_v25  ;;  %v1843_v17 = vor.u32 1.1754944e-38, %v1842_v62 }
 0x173   : > { %v5345_v43 = vpop.eup %5344  ;;  %v4892_v34 = vmul.f32 -1.442695, %v954_v9  ;;  %v776_v46 = vadd.f32 %v6797_v32, %v6609_v52  ;;  %v865_v48 = vadd.f32 %v6799_v54, %v6649_v38  ;;  %v690_v13 = vadd.f32 %v6877_v59, %v6600_v47 }
 0x174   : > { %v1794_v22 = vsel %vm1793_vm2, %v5341_v36, %v1790_v37  ;;  %v1835_v23 = vadd.f32 %v5343_v7, %v1834_v6  ;;  %v1877_v41 = vmul.f32 %v5345_v43, %v6890_v8  ;;  %5350 = vpow2.f32 %v4889_v3 }
 0x175   : > { %v1799_v55 = vsel %vm6901_vm13, %v1798_v11, %v1794_v22  ;;  %v4890_v32 = vmul.f32 -1.442695, %v776_v46  ;;  %v4891_v54 = vmul.f32 -1.442695, %v865_v48  ;;  %vm1881_vm4 = vweird.f32 %v6890_v8 }
 0x176   : > { %4074 = vst [vmem:[%s6188_s25 + $0x40] sm:$0xff] %v1799_v55  ;;  %v1839_v39 = vsel %vm1838_vm3, %v5343_v7, %v1835_v23  ;;  %v1878_v27 = vsub.f32 1.0, %v1877_v41  ;;  %5352 = vpow2.f32 %v4892_v34  ;;  %v1885_v56 = vand.u32 2147483647, %v6890_v8 }
 0x177   : > { %v5347_v44 = vpop.eup %5346  ;;  %v1844_v33 = vsel %vm6918_vm1, %v1843_v17, %v1839_v39  ;;  %v1887_v58 = vand.u32 2147483648, %v6890_v8  ;;  %5354 = vpow2.f32 %v4890_v32  ;;  %vm1882_vm5 = vweird.f32 %v5345_v43 }
 0x178   : > { %v5349_v14 = vpop.eup %5348  ;;  %4077 = vst [vmem:[%s6188_s25 + $0x58] sm:$0xff] %v1844_v33  ;;  %v1879_v59 = vmul.f32 %v5345_v43, %v1878_v27  ;;  %v6952_v45 = vadd.f32 1.0, %v5347_v44  ;;  %5356 = vpow2.f32 %v4891_v54  ;;  %v4894_v57 = vmul.f32 -1.442695, %v690_v13  ;;  %vm1883_vm6 = vmor %vm1881_vm4, %vm1882_vm5 }
 0x179   : > { %v6954_v10 = vadd.f32 1.0, %v5349_v14  ;;  %v957_v24 = vadd.f32 %v6884_v61, %v6603_v40  ;;  %v779_v30 = vadd.f32 %v778_v35, %v6609_v52  ;;  %v1888_v50 = vor.u32 1.1754944e-38, %v1887_v58 }
 0x17a   : > { %v1880_v60 = vadd.f32 %v5345_v43, %v1879_v59  ;;  %5358 = vrcp.f32 %v6952_v45  ;;  %v5351_v36 = vpop.eup %5350  ;;  %vm1886_vm7 = vcmp.eq.f32.partialorder %v1885_v56, 8.507059e+37  ;;  %v1855_v8 = vand.u32 2147483647, %v6952_v45 }
 0x17b   : > { %5360 = vrcp.f32 %v6954_v10  ;;  %v6967_v61 = vadd.f32 1.0, %v5351_v36  ;;  %v4897_v28 = vmul.f32 -1.442695, %v957_v24  ;;  %v6974_v4 = vmul.f32 -1.442695, %v779_v30 }
 0x17c   : > { %v5353_v49 = vpop.eup %5352  ;;  %v1884_v2 = vsel %vm1883_vm6, %v5345_v43, %v1880_v60  ;;  %5362 = vpow2.f32 %v4894_v57  ;;  %v6978_v12 = vadd.f32 %v6922_v29, %v6649_v38  ;;  %v1857_v53 = vand.u32 2147483648, %v6952_v45 }
 0x17d   : > { %v5355_v5 = vpop.eup %5354  ;;  %v1889_v7 = vsel %vm1886_vm7, %v1888_v50, %v1884_v2  ;;  %v6970_v51 = vadd.f32 1.0, %v5353_v49  ;;  %5364 = vrcp.f32 %v6967_v61  ;;  %v1870_v16 = vand.u32 2147483647, %v6954_v10 }
 0x17e   : > { %v5357_v11 = vpop.eup %5356  ;;  %4080 = vst [vmem:[%s6188_s25 + $0x70] sm:$0xff] %v1889_v7  ;;  %v1872_v62 = vand.u32 2147483648, %v6954_v10  ;;  %vm1851_vm8 = vweird.f32 %v6952_v45  ;;  %vm1866_vm9 = vweird.f32 %v6954_v10  ;;  %v6986_v9 = vadd.f32 1.0, %v5355_v5 }
 0x17f   : > { %5366 = vrcp.f32 %v6970_v51  ;;  %v6988_v19 = vadd.f32 1.0, %v5357_v11  ;;  %vm6991_vm10 = vcmp.eq.f32.partialorder %v1855_v8, 8.507059e+37  ;;  %v1915_v0 = vand.u32 2147483647, %v6967_v61 }
 0x180   : > { %v5359_v1 = vpop.eup %5358  ;;  %v1917_v15 = vand.u32 2147483648, %v6967_v61  ;;  %v1960_v29 = vand.u32 2147483647, %v6970_v51  ;;  %v1962_v37 = vand.u32 2147483648, %v6970_v51  ;;  %5368 = vrcp.f32 %v6986_v9 }
 0x181   : > { %v5361_v20 = vpop.eup %5360  ;;  %v1847_v21 = vmul.f32 %v5359_v1, %v6952_v45  ;;  %v1858_v18 = vor.u32 1.1754944e-38, %v1857_v53  ;;  %vm7001_vm11 = vcmp.eq.f32.partialorder %v1870_v16, 8.507059e+37  ;;  %v1873_v17 = vor.u32 1.1754944e-38, %v1872_v62  ;;  %v694_v62 = vpop.f32.mrf.mxu1 }
 0x182   : > { %v1862_v35 = vmul.f32 %v5361_v20, %v6954_v10  ;;  %v5363_v6 = vpop.eup %5362  ;;  %vm1911_vm12 = vweird.f32 %v6967_v61  ;;  %vm1956_vm13 = vweird.f32 %v6970_v51  ;;  %5370 = vrcp.f32 %v6988_v19 }
 0x183   : > { %v1848_v3 = vsub.f32 1.0, %v1847_v21  ;;  %v5365_v34 = vpop.eup %5364  ;;  %vm1852_vm14 = vweird.f32 %v5359_v1  ;;  %vm7009_vm15 = vcmp.eq.f32.partialorder %v1915_v0, 8.507059e+37  ;;  %v1918_v13 = vor.u32 1.1754944e-38, %v1917_v15 }
 0x184   : > { %v1863_v46 = vsub.f32 1.0, %v1862_v35  ;;  %v1907_v23 = vmul.f32 %v5365_v34, %v6967_v61  ;;  %vm1867_vm0 = vweird.f32 %v5361_v20  ;;  %vm7014_vm1 = vcmp.eq.f32.partialorder %v1960_v29, 8.507059e+37  ;;  %vm1853_vm3 = vmor %vm1851_vm8, %vm1852_vm14 }
 0x185   : > { %v5367_v48 = vpop.eup %5366  ;;  %v1849_v22 = vmul.f32 %v5359_v1, %v1848_v3  ;;  %v1963_v39 = vor.u32 1.1754944e-38, %v1962_v37  ;;  %vm1926_vm2 = vweird.f32 %v6986_v9  ;;  %v1930_v33 = vand.u32 2147483647, %v6986_v9  ;;  %vm1868_vm4 = vmor %vm1866_vm9, %vm1867_vm0 }
 0x186   : > { %v1864_v55 = vmul.f32 %v5361_v20, %v1863_v46  ;;  %v1952_v32 = vmul.f32 %v5367_v48, %v6970_v51  ;;  %v1908_v44 = vsub.f32 1.0, %v1907_v23  ;;  %v1932_v56 = vand.u32 2147483648, %v6986_v9  ;;  %v5369_v58 = vpop.eup %5368 }
 0x187   : > { %v1850_v27 = vadd.f32 %v5359_v1, %v1849_v22  ;;  %v7024_v57 = vadd.f32 1.0, %v5363_v6  ;;  %5372 = vpow2.f32 %v4897_v28  ;;  %vm1912_vm5 = vweird.f32 %v5365_v34 }
 0x188   : > { %v1865_v14 = vadd.f32 %v5361_v20, %v1864_v55  ;;  %v1953_v59 = vsub.f32 1.0, %v1952_v32  ;;  %v1909_v24 = vmul.f32 %v5365_v34, %v1908_v44  ;;  %v1922_v30 = vmul.f32 %v5369_v58, %v6986_v9  ;;  %v5371_v36 = vpop.eup %5370  ;;  %vm1913_vm7 = vmor %vm1911_vm12, %vm1912_vm5  ;;  %v7077_v55 = vpop.f32.mrf.mxu3 }
 0x189   : > { %v1854_v60 = vsel %vm1853_vm3, %v5359_v1, %v1850_v27  ;;  %vm1957_vm6 = vweird.f32 %v5367_v48  ;;  %v1937_v10 = vmul.f32 %v5371_v36, %v6988_v19  ;;  %vm1941_vm8 = vweird.f32 %v6988_v19  ;;  %v7044_v1 = vpop.f32.mrf.mxu0 }
 0x18a   : > { %v1859_v45 = vsel %vm6991_vm10, %v1858_v18, %v1854_v60  ;;  %v1869_v50 = vsel %vm1868_vm4, %v5361_v20, %v1865_v14  ;;  %v1954_v49 = vmul.f32 %v5367_v48, %v1953_v59  ;;  %v1910_v5 = vadd.f32 %v5365_v34, %v1909_v24  ;;  %vm1958_vm9 = vmor %vm1956_vm13, %vm1957_vm6 }
 0x18b   : > { %4078 = vst [vmem:[%s6188_s25 + $0x60] sm:$0xff] %v1859_v45  ;;  %v1874_v2 = vsel %vm7001_vm11, %v1873_v17, %v1869_v50  ;;  %v1923_v7 = vsub.f32 1.0, %v1922_v30  ;;  %v1945_v11 = vand.u32 2147483647, %v6988_v19  ;;  %5374 = vrcp.f32 %v7024_v57 }
 0x18c   : > { %4079 = vst [vmem:[%s6188_s25 + $0x68] sm:$0xff] %v1874_v2  ;;  %v1955_v8 = vadd.f32 %v5367_v48, %v1954_v49  ;;  %v1914_v28 = vsel %vm1913_vm7, %v5365_v34, %v1910_v5  ;;  %vm1927_vm10 = vweird.f32 %v5369_v58  ;;  %v1938_v16 = vsub.f32 1.0, %v1937_v10 }
 0x18d   : > { %v1924_v53 = vmul.f32 %v5369_v58, %v1923_v7  ;;  %v5373_v61 = vpop.eup %5372  ;;  %v1919_v20 = vsel %vm7009_vm15, %v1918_v13, %v1914_v28  ;;  %v1947_v25 = vand.u32 2147483648, %v6988_v19  ;;  %5376 = vpow2.f32 %v6974_v4  ;;  %vm1928_vm12 = vmor %vm1926_vm2, %vm1927_vm10  ;;  %v783_v13 = vpop.f32.mrf.mxu2 }
 0x18e   : > { %v1959_v21 = vsel %vm1958_vm9, %v5367_v48, %v1955_v8  ;;  %4082 = vst [vmem:[%s6188_s25 + $0x80] sm:$0xff] %v1919_v20  ;;  %v1939_v15 = vmul.f32 %v5371_v36, %v1938_v16  ;;  %vm1942_vm11 = vweird.f32 %v5371_v36  ;;  %v1933_v35 = vor.u32 1.1754944e-38, %v1932_v56 }
 0x18f   : > { %v1964_v51 = vsel %vm7014_vm1, %v1963_v39, %v1959_v21  ;;  %v1925_v0 = vadd.f32 %v5369_v58, %v1924_v53  ;;  %v7057_v29 = vadd.f32 1.0, %v5373_v61  ;;  %v4896_v37 = vmul.f32 -1.442695, %v6978_v12  ;;  %vm1943_vm14 = vmor %vm1941_vm8, %vm1942_vm11 }
 0x190   : > { %4085 = vst [vmem:[%s6188_s25 + $0x98] sm:$0xff] %v1964_v51  ;;  %v692_v4 = vadd.f32 %v6925_v42, %v6600_v47  ;;  %vm1931_vm13 = vcmp.eq.f32.partialorder %v1930_v33, 8.507059e+37  ;;  %v1940_v3 = vadd.f32 %v5371_v36, %v1939_v15  ;;  %v959_v18 = vadd.f32 %v6935_v63, %v6603_v40  ;;  %v7084_v33 = vpop.f32.mrf.mxu1 }
 0x191   : > { %v1929_v6 = vsel %vm1928_vm12, %v5369_v58, %v1925_v0  ;;  %v5375_v43 = vpop.eup %5374  ;;  %v1948_v9 = vor.u32 1.1754944e-38, %v1947_v25  ;;  %5378 = vrcp.f32 %v7057_v29  ;;  %v781_v12 = vadd.f32 %v6963_v31, %v6609_v52  ;;  %v7086_v56 = vpop.f32.mrf.mxu0  ;;  %v5824_v58 = vld [vmem:[%s5987_s11 + $0x78] sm:$0xff] }
 0x192   : > { %v1934_v17 = vsel %vm1931_vm13, %v1933_v35, %v1929_v6  ;;  %v1944_v42 = vsel %vm1943_vm14, %v5371_v36, %v1940_v3  ;;  %vm1946_vm15 = vcmp.eq.f32.partialorder %v1945_v11, 8.507059e+37  ;;  %v1982_v34 = vmul.f32 %v5375_v43, %v7024_v57  ;;  %753 = vmatmul.bf16.gmra.mxu1 %v5824_v58  ;;  %1020 = vmatmul.bf16.gmra.mxu0 %v5824_v58 }
 0x193   : > { %4083 = vst [vmem:[%s6188_s25 + $0x88] sm:$0xff] %v1934_v17  ;;  %vm1986_vm0 = vweird.f32 %v7024_v57  ;;  %v5377_v63 = vpop.eup %5376  ;;  %v1949_v46 = vsel %vm1946_vm15, %v1948_v9, %v1944_v42  ;;  %v1990_v48 = vand.u32 2147483647, %v7024_v57  ;;  %5380 = vpow2.f32 %v4896_v37  ;;  %v7126_v37 = vpop.f32.mrf.mxu3  ;;  %931 = vmatmul.bf16.gmra.mxu3 %v5824_v58 }
 0x194   : > { %v4899_v19 = vmul.f32 -1.442695, %v692_v4  ;;  %4084 = vst [vmem:[%s6188_s25 + $0x90] sm:$0xff] %v1949_v46  ;;  %v1983_v22 = vsub.f32 1.0, %v1982_v34  ;;  %v1992_v23 = vand.u32 2147483648, %v7024_v57  ;;  %v7075_v41 = vadd.f32 1.0, %v5377_v63 }
 0x195   : > { %v4902_v31 = vmul.f32 -1.442695, %v959_v18  ;;  %v2035_v32 = vand.u32 2147483647, %v7057_v29  ;;  %v4900_v54 = vmul.f32 -1.442695, %v781_v12  ;;  %v870_v39 = vadd.f32 %v6965_v26, %v6649_v38  ;;  %v7124_v35 = vpop.f32.mrf.mxu2  ;;  %842 = vmatmul.bf16.gmra.mxu2 %v5824_v58 }
 0x196   : > { %5382 = vpow2.f32 %v4899_v19  ;;  %v1984_v27 = vmul.f32 %v5375_v43, %v1983_v22  ;;  %vm1987_vm1 = vweird.f32 %v5375_v43  ;;  %v695_v44 = vadd.f32 %v694_v62, %v6600_v47 }
 0x197   : > { %5384 = vrcp.f32 %v7075_v41  ;;  %v5379_v14 = vpop.eup %5378  ;;  %vm7089_vm2 = vcmp.eq.f32.partialorder %v1990_v48, 8.507059e+37  ;;  %v2037_v26 = vand.u32 2147483648, %v7057_v29  ;;  %v4901_v60 = vmul.f32 -1.442695, %v870_v39  ;;  %vm1988_vm4 = vmor %vm1986_vm0, %vm1987_vm1 }
 0x198   : > { %5386 = vpow2.f32 %v4902_v31  ;;  %v1985_v24 = vadd.f32 %v5375_v43, %v1984_v27  ;;  %v1993_v30 = vor.u32 1.1754944e-38, %v1992_v23  ;;  %v2027_v36 = vmul.f32 %v5379_v14, %v7057_v29 }
 0x199   : > { %vm2031_vm3 = vweird.f32 %v7057_v29  ;;  %v5381_v45 = vpop.eup %5380  ;;  %vm7099_vm5 = vcmp.eq.f32.partialorder %v2035_v32, 8.507059e+37  ;;  %v2005_v49 = vand.u32 2147483647, %v7075_v41  ;;  %5388 = vpow2.f32 %v4900_v54 }
 0x19a   : > { %v962_v2 = vadd.f32 %v7044_v1, %v6603_v40  ;;  %v1989_v5 = vsel %vm1988_vm4, %v5375_v43, %v1985_v24  ;;  %v2028_v7 = vsub.f32 1.0, %v2027_v36  ;;  %v7106_v10 = vadd.f32 1.0, %v5381_v45 }
 0x19b   : > { %v4904_v8 = vmul.f32 -1.442695, %v695_v44  ;;  %v1994_v57 = vsel %vm7089_vm2, %v1993_v30, %v1989_v5  ;;  %v2038_v28 = vor.u32 1.1754944e-38, %v2037_v26  ;;  %v2007_v53 = vand.u32 2147483648, %v7075_v41 }
 0x19c   : > { %v5383_v11 = vpop.eup %5382  ;;  %5390 = vpow2.f32 %v4901_v60  ;;  %4087 = vst [vmem:[%s6188_s25 + $0xa8] sm:$0xff] %v1994_v57  ;;  %v2029_v62 = vmul.f32 %v5379_v14, %v2028_v7  ;;  %vm2032_vm6 = vweird.f32 %v5379_v14  ;;  %v784_v1 = vadd.f32 %v783_v13, %v6609_v52 }
 0x19d   : > { %v5385_v16 = vpop.eup %5384  ;;  %5392 = vrcp.f32 %v7106_v10  ;;  %vm2001_vm7 = vweird.f32 %v7075_v41  ;;  %v7116_v21 = vadd.f32 1.0, %v5383_v11  ;;  %v4907_v25 = vmul.f32 -1.442695, %v962_v2  ;;  %vm2033_vm9 = vmor %vm2031_vm3, %vm2032_vm6 }
 0x19e   : > { %v5387_v61 = vpop.eup %5386  ;;  %v1997_v20 = vmul.f32 %v5385_v16, %v7075_v41  ;;  %v2030_v51 = vadd.f32 %v5379_v14, %v2029_v62  ;;  %vm7118_vm8 = vcmp.eq.f32.partialorder %v2005_v49, 8.507059e+37  ;;  %5394 = vpow2.f32 %v4904_v8 }
 0x19f   : > { %v7122_v15 = vadd.f32 1.0, %v5387_v61  ;;  %v5389_v4 = vpop.eup %5388  ;;  %v2008_v3 = vor.u32 1.1754944e-38, %v2007_v53  ;;  %v2020_v18 = vand.u32 2147483647, %v7106_v10  ;;  %5396 = vrcp.f32 %v7116_v21 }
 0x1a0   : > { %v1998_v6 = vsub.f32 1.0, %v1997_v20  ;;  %v2034_v43 = vsel %vm2033_vm9, %v5379_v14, %v2030_v51  ;;  %v2022_v17 = vand.u32 2147483648, %v7106_v10  ;;  %v4905_v9 = vmul.f32 -1.442695, %v784_v1 }
 0x1a1   : > { %5398 = vrcp.f32 %v7122_v15  ;;  %v2039_v42 = vsel %vm7099_vm5, %v2038_v28, %v2034_v43  ;;  %vm2002_vm10 = vweird.f32 %v5385_v16  ;;  %vm2016_vm11 = vweird.f32 %v7106_v10 }
 0x1a2   : > { %v5391_v12 = vpop.eup %5390  ;;  %v1999_v34 = vmul.f32 %v5385_v16, %v1998_v6  ;;  %5400 = vpow2.f32 %v4907_v25  ;;  %4090 = vst [vmem:[%s6188_s25 + $0xc0] sm:$0xff] %v2039_v42  ;;  %v2065_v63 = vand.u32 2147483647, %v7116_v21  ;;  %v2067_v46 = vand.u32 2147483648, %v7116_v21  ;;  %vm2003_vm13 = vmor %vm2001_vm7, %vm2002_vm10 }
 0x1a3   : > { %v5393_v29 = vpop.eup %5392  ;;  %v7141_v48 = vadd.f32 1.0, %v5389_v4  ;;  %vm7144_vm12 = vcmp.eq.f32.partialorder %v2020_v18, 8.507059e+37  ;;  %v2110_v31 = vand.u32 2147483647, %v7122_v15  ;;  %v2023_v32 = vor.u32 1.1754944e-38, %v2022_v17 }
 0x1a4   : > { %v2000_v19 = vadd.f32 %v5385_v16, %v1999_v34  ;;  %v2012_v22 = vmul.f32 %v5393_v29, %v7106_v10  ;;  %v5395_v13 = vpop.eup %5394  ;;  %vm2061_vm14 = vweird.f32 %v7116_v21  ;;  %v2112_v54 = vand.u32 2147483648, %v7122_v15 }
 0x1a5   : > { %5402 = vrcp.f32 %v7141_v48  ;;  %v5397_v39 = vpop.eup %5396  ;;  %vm2106_vm15 = vweird.f32 %v7122_v15  ;;  %v7155_v58 = vadd.f32 1.0, %v5391_v12  ;;  %vm7160_vm0 = vcmp.eq.f32.partialorder %v2065_v63, 8.507059e+37 }
 0x1a6   : > { %v2004_v27 = vsel %vm2003_vm13, %v5385_v16, %v2000_v19  ;;  %v2013_v44 = vsub.f32 1.0, %v2012_v22  ;;  %v2057_v59 = vmul.f32 %v5397_v39, %v7116_v21  ;;  %v2068_v60 = vor.u32 1.1754944e-38, %v2067_v46 }
 0x1a7   : > { %v5399_v14 = vpop.eup %5398  ;;  %v2009_v41 = vsel %vm7118_vm8, %v2008_v3, %v2004_v27  ;;  %vm2017_vm1 = vweird.f32 %v5393_v29  ;;  %vm7166_vm2 = vcmp.eq.f32.partialorder %v2110_v31, 8.507059e+37  ;;  %v2113_v49 = vor.u32 1.1754944e-38, %v2112_v54 }
 0x1a8   : > { %v5401_v24 = vpop.eup %5400  ;;  %4088 = vst [vmem:[%s6188_s25 + $0xb0] sm:$0xff] %v2009_v41  ;;  %v2014_v30 = vmul.f32 %v5393_v29, %v2013_v44  ;;  %v2102_v36 = vmul.f32 %v5399_v14, %v7122_v15  ;;  %v2058_v50 = vsub.f32 1.0, %v2057_v59  ;;  %v2080_v2 = vand.u32 2147483647, %v7141_v48  ;;  %vm2018_vm4 = vmor %vm2016_vm11, %vm2017_vm1 }
 0x1a9   : > { %5404 = vrcp.f32 %v7155_v58  ;;  %vm2076_vm3 = vweird.f32 %v7141_v48  ;;  %v2082_v8 = vand.u32 2147483648, %v7141_v48  ;;  %v7174_v11 = vadd.f32 1.0, %v5395_v13 }
 0x1aa   : > { %v2015_v5 = vadd.f32 %v5393_v29, %v2014_v30  ;;  %v2103_v7 = vsub.f32 1.0, %v2102_v36  ;;  %v2059_v28 = vmul.f32 %v5397_v39, %v2058_v50  ;;  %vm2062_vm5 = vweird.f32 %v5397_v39  ;;  %v699_v50 = vpop.f32.mrf.mxu1 }
 0x1ab   : > { %v5403_v57 = vpop.eup %5402  ;;  %v7178_v53 = vadd.f32 1.0, %v5401_v24  ;;  %5406 = vpow2.f32 %v4905_v9  ;;  %vm2107_vm6 = vweird.f32 %v5399_v14  ;;  %v2095_v25 = vand.u32 2147483647, %v7155_v58  ;;  %vm2063_vm7 = vmor %vm2061_vm14, %vm2062_vm5 }
 0x1ac   : > { %v2019_v16 = vsel %vm2018_vm4, %v5393_v29, %v2015_v5  ;;  %v2104_v62 = vmul.f32 %v5399_v14, %v2103_v7  ;;  %v2072_v1 = vmul.f32 %v5403_v57, %v7141_v48  ;;  %v2060_v20 = vadd.f32 %v5397_v39, %v2059_v28  ;;  %vm2108_vm9 = vmor %vm2106_vm15, %vm2107_vm6 }
 0x1ad   : > { %v2024_v61 = vsel %vm7144_vm12, %v2023_v32, %v2019_v16  ;;  %5408 = vrcp.f32 %v7174_v11  ;;  %vm7188_vm8 = vcmp.eq.f32.partialorder %v2080_v2, 8.507059e+37  ;;  %v2097_v4 = vand.u32 2147483648, %v7155_v58 }
 0x1ae   : > { %4089 = vst [vmem:[%s6188_s25 + $0xb8] sm:$0xff] %v2024_v61  ;;  %v2105_v10 = vadd.f32 %v5399_v14, %v2104_v62  ;;  %v2073_v51 = vsub.f32 1.0, %v2072_v1  ;;  %v2064_v3 = vsel %vm2063_vm7, %v5397_v39, %v2060_v20  ;;  %vm2077_vm10 = vweird.f32 %v5403_v57 }
 0x1af   : > { %v5405_v6 = vpop.eup %5404  ;;  %v2083_v18 = vor.u32 1.1754944e-38, %v2082_v8  ;;  %5410 = vrcp.f32 %v7178_v53  ;;  %v2069_v21 = vsel %vm7160_vm0, %v2068_v60, %v2064_v3  ;;  %vm2091_vm11 = vweird.f32 %v7155_v58  ;;  %vm2078_vm14 = vmor %vm2076_vm3, %vm2077_vm10 }
 0x1b0   : > { %v2109_v43 = vsel %vm2108_vm9, %v5399_v14, %v2105_v10  ;;  %v2074_v17 = vmul.f32 %v5403_v57, %v2073_v51  ;;  %v2087_v9 = vmul.f32 %v5405_v6, %v7155_v58  ;;  %4092 = vst [vmem:[%s6188_s25 + $0xd0] sm:$0xff] %v2069_v21  ;;  %vm7203_vm12 = vcmp.eq.f32.partialorder %v2095_v25, 8.507059e+37  ;;  %v788_v21 = vpop.f32.mrf.mxu2 }
 0x1b1   : > { %v5407_v12 = vpop.eup %5406  ;;  %v2114_v42 = vsel %vm7166_vm2, %v2113_v49, %v2109_v43  ;;  %v2140_v34 = vand.u32 2147483647, %v7174_v11  ;;  %v2098_v46 = vor.u32 1.1754944e-38, %v2097_v4  ;;  %vm2136_vm13 = vweird.f32 %v7174_v11 }
 0x1b2   : > { %4095 = vst [vmem:[%s6188_s25 + $0xe8] sm:$0xff] %v2114_v42  ;;  %v2075_v29 = vadd.f32 %v5403_v57, %v2074_v17  ;;  %v2088_v63 = vsub.f32 1.0, %v2087_v9  ;;  %vm2092_vm15 = vweird.f32 %v5405_v6  ;;  %v2142_v22 = vand.u32 2147483648, %v7174_v11  ;;  %v877_v42 = vpop.f32.mrf.mxu3 }
 0x1b3   : > { %v5409_v19 = vpop.eup %5408  ;;  %v7214_v23 = vadd.f32 1.0, %v5407_v12  ;;  %v873_v31 = vadd.f32 %v7077_v55, %v6649_v38  ;;  %v697_v39 = vadd.f32 %v7084_v33, %v6600_v47  ;;  %vm7223_vm0 = vcmp.eq.f32.partialorder %v2140_v34, 8.507059e+37  ;;  %vm2093_vm2 = vmor %vm2091_vm11, %vm2092_vm15 }
 0x1b4   : > { %v2079_v13 = vsel %vm2078_vm14, %v5403_v57, %v2075_v29  ;;  %v2089_v32 = vmul.f32 %v5405_v6, %v2088_v63  ;;  %v2132_v54 = vmul.f32 %v5409_v19, %v7174_v11  ;;  %vm2181_vm1 = vweird.f32 %v7178_v53  ;;  %v966_v11 = vpop.f32.mrf.mxu0 }
 0x1b5   : > { %v5411_v27 = vpop.eup %5410  ;;  %v2084_v48 = vsel %vm7188_vm8, %v2083_v18, %v2079_v13  ;;  %5412 = vrcp.f32 %v7214_v23  ;;  %v964_v33 = vadd.f32 %v7086_v56, %v6603_v40  ;;  %vm2137_vm3 = vweird.f32 %v5409_v19  ;;  %v701_v13 = vpop.f32.mrf.mxu1 }
 0x1b6   : > { %4093 = vst [vmem:[%s6188_s25 + $0xd8] sm:$0xff] %v2084_v48  ;;  %v2090_v55 = vadd.f32 %v5405_v6, %v2089_v32  ;;  %v2133_v14 = vsub.f32 1.0, %v2132_v54  ;;  %v2177_v41 = vmul.f32 %v5411_v27, %v7178_v53  ;;  %v2185_v59 = vand.u32 2147483647, %v7178_v53  ;;  %vm2138_vm5 = vmor %vm2136_vm13, %vm2137_vm3 }
 0x1b7   : > { %v2187_v26 = vand.u32 2147483648, %v7178_v53  ;;  %v4906_v60 = vmul.f32 -1.442695, %v873_v31  ;;  %v4909_v45 = vmul.f32 -1.442695, %v697_v39  ;;  %v2143_v2 = vor.u32 1.1754944e-38, %v2142_v22 }
 0x1b8   : > { %v2094_v24 = vsel %vm2093_vm2, %v5405_v6, %v2090_v55  ;;  %v2134_v30 = vmul.f32 %v5409_v19, %v2133_v14  ;;  %v2178_v36 = vsub.f32 1.0, %v2177_v41  ;;  %vm2182_vm4 = vweird.f32 %v5411_v27 }
 0x1b9   : > { %v2099_v49 = vsel %vm7203_vm12, %v2098_v46, %v2094_v24  ;;  %5414 = vpow2.f32 %v4906_v60  ;;  %v4912_v5 = vmul.f32 -1.442695, %v964_v33  ;;  %vm7244_vm6 = vcmp.eq.f32.partialorder %v2185_v59, 8.507059e+37  ;;  %vm2183_vm7 = vmor %vm2181_vm1, %vm2182_vm4 }
 0x1ba   : > { %4094 = vst [vmem:[%s6188_s25 + $0xe0] sm:$0xff] %v2099_v49  ;;  %v2135_v56 = vadd.f32 %v5409_v19, %v2134_v30  ;;  %v2179_v58 = vmul.f32 %v5411_v27, %v2178_v36  ;;  %5416 = vpow2.f32 %v4909_v45  ;;  %v786_v57 = vadd.f32 %v7124_v35, %v6609_v52 }
 0x1bb   : > { %v5413_v7 = vpop.eup %5412  ;;  %v875_v28 = vadd.f32 %v7126_v37, %v6649_v38  ;;  %v700_v16 = vadd.f32 %v699_v50, %v6600_v47  ;;  %v2188_v61 = vor.u32 1.1754944e-38, %v2187_v26  ;;  %5418 = vpow2.f32 %v4912_v5 }
 0x1bc   : > { %v2139_v62 = vsel %vm2138_vm5, %v5409_v19, %v2135_v56  ;;  %v2180_v1 = vadd.f32 %v5411_v27, %v2179_v58  ;;  %v2147_v20 = vmul.f32 %v5413_v7, %v7214_v23  ;;  %v4910_v35 = vmul.f32 -1.442695, %v786_v57  ;;  %v968_v36 = vpop.f32.mrf.mxu0 }
 0x1bd   : > { %v2144_v25 = vsel %vm7223_vm0, %v2143_v2, %v2139_v62  ;;  %v4911_v10 = vmul.f32 -1.442695, %v875_v28  ;;  %v2155_v0 = vand.u32 2147483647, %v7214_v23  ;;  %v4914_v4 = vmul.f32 -1.442695, %v700_v16  ;;  %v879_v2 = vpop.f32.mrf.mxu3 }
 0x1be   : > { %4097 = vst [vmem:[%s6188_s25 + $0xf8] sm:$0xff] %v2144_v25  ;;  %v2184_v37 = vsel %vm2183_vm7, %v5411_v27, %v2180_v1  ;;  %v2148_v51 = vsub.f32 1.0, %v2147_v20  ;;  %v2157_v18 = vand.u32 2147483648, %v7214_v23  ;;  %5420 = vpow2.f32 %v4910_v35 }
 0x1bf   : > { %v5415_v6 = vpop.eup %5414  ;;  %v2189_v3 = vsel %vm7244_vm6, %v2188_v61, %v2184_v37  ;;  %v967_v53 = vadd.f32 %v966_v11, %v6603_v40  ;;  %vm2152_vm8 = vweird.f32 %v5413_v7  ;;  %5422 = vpow2.f32 %v4911_v10 }
 0x1c0   : > { %v5417_v43 = vpop.eup %5416  ;;  %4100 = vst [vmem:[%s6188_s25 + $0x110] sm:$0xff] %v2189_v3  ;;  %v2149_v17 = vmul.f32 %v5413_v7, %v2148_v51  ;;  %v7266_v9 = vadd.f32 1.0, %v5415_v6  ;;  %5424 = vpow2.f32 %v4914_v4  ;;  %vm2151_vm9 = vweird.f32 %v7214_v23 }
 0x1c1   : > { %v7268_v12 = vadd.f32 1.0, %v5417_v43  ;;  %v789_v34 = vadd.f32 %v788_v21, %v6609_v52  ;;  %v5419_v29 = vpop.eup %5418  ;;  %vm2153_vm10 = vmor %vm2151_vm9, %vm2152_vm8  ;;  %vm2156_vm11 = vcmp.eq.f32.partialorder %v2155_v0, 8.507059e+37  ;;  %v2158_v63 = vor.u32 1.1754944e-38, %v2157_v18 }
 0x1c2   : > { %v2150_v15 = vadd.f32 %v5413_v7, %v2149_v17  ;;  %5426 = vrcp.f32 %v7266_v9  ;;  %v7274_v19 = vadd.f32 1.0, %v5419_v29  ;;  %v4917_v22 = vmul.f32 -1.442695, %v967_v53 }
 0x1c3   : > { %5428 = vrcp.f32 %v7268_v12  ;;  %v878_v31 = vadd.f32 %v877_v42, %v6649_v38  ;;  %v2170_v54 = vand.u32 2147483647, %v7266_v9  ;;  %v2172_v39 = vand.u32 2147483648, %v7266_v9 }
 0x1c4   : > { %v2154_v46 = vsel %vm2153_vm10, %v5413_v7, %v2150_v15  ;;  %v5421_v32 = vpop.eup %5420  ;;  %v2215_v48 = vand.u32 2147483647, %v7268_v12  ;;  %5430 = vrcp.f32 %v7274_v19  ;;  %v4915_v44 = vmul.f32 -1.442695, %v789_v34 }
 0x1c5   : > { %v2159_v23 = vsel %vm2156_vm11, %v2158_v63, %v2154_v46  ;;  %v5423_v27 = vpop.eup %5422  ;;  %v2217_v14 = vand.u32 2147483648, %v7268_v12  ;;  %v7283_v41 = vadd.f32 1.0, %v5421_v32  ;;  %v702_v59 = vadd.f32 %v701_v13, %v6600_v47 }
 0x1c6   : > { %4098 = vst [vmem:[%s6188_s25 + $0x100] sm:$0xff] %v2159_v23  ;;  %v5425_v55 = vpop.eup %5424  ;;  %v7285_v33 = vadd.f32 1.0, %v5423_v27  ;;  %vm2166_vm12 = vweird.f32 %v7266_v9  ;;  %vm2211_vm13 = vweird.f32 %v7268_v12  ;;  %5432 = vpow2.f32 %v4917_v22 }
 0x1c7   : > { %v4916_v60 = vmul.f32 -1.442695, %v878_v31  ;;  %vm7291_vm14 = vcmp.eq.f32.partialorder %v2170_v54, 8.507059e+37  ;;  %v2173_v45 = vor.u32 1.1754944e-38, %v2172_v39  ;;  %v2260_v50 = vand.u32 2147483647, %v7274_v19 }
 0x1c8   : > { %v5427_v26 = vpop.eup %5426  ;;  %5434 = vrcp.f32 %v7283_v41  ;;  %vm7298_vm15 = vcmp.eq.f32.partialorder %v2215_v48, 8.507059e+37  ;;  %v2262_v56 = vand.u32 2147483648, %v7274_v19  ;;  %v7303_v58 = vadd.f32 1.0, %v5425_v55 }
 0x1c9   : > { %v5429_v24 = vpop.eup %5428  ;;  %v2162_v30 = vmul.f32 %v5427_v26, %v7266_v9  ;;  %5436 = vpow2.f32 %v4915_v44  ;;  %v2218_v7 = vor.u32 1.1754944e-38, %v2217_v14  ;;  %vm2256_vm0 = vweird.f32 %v7274_v19 }
 0x1ca   : > { %v2207_v49 = vmul.f32 %v5429_v24, %v7268_v12  ;;  %5438 = vrcp.f32 %v7285_v33  ;;  %v5431_v8 = vpop.eup %5430  ;;  %v2230_v28 = vand.u32 2147483647, %v7283_v41  ;;  %v7308_v16 = vmul.f32 -1.442695, %v702_v59 }
 0x1cb   : > { %v2163_v5 = vsub.f32 1.0, %v2162_v30  ;;  %5440 = vpow2.f32 %v4916_v60  ;;  %vm2167_vm1 = vweird.f32 %v5427_v26  ;;  %v2252_v1 = vmul.f32 %v5431_v8, %v7274_v19 }
 0x1cc   : > { %v2208_v57 = vsub.f32 1.0, %v2207_v49  ;;  %vm7311_vm2 = vcmp.eq.f32.partialorder %v2260_v50, 8.507059e+37  ;;  %v2232_v20 = vand.u32 2147483648, %v7283_v41  ;;  %v5433_v11 = vpop.eup %5432  ;;  %vm2212_vm3 = vweird.f32 %v5429_v24  ;;  %vm2168_vm5 = vmor %vm2166_vm12, %vm2167_vm1  ;;  %v790_v49 = vpop.f32.mrf.mxu2 }
 0x1cd   : > { %v2164_v62 = vmul.f32 %v5427_v26, %v2163_v5  ;;  %v2263_v35 = vor.u32 1.1754944e-38, %v2262_v56  ;;  %5442 = vrcp.f32 %v7303_v58  ;;  %v2253_v51 = vsub.f32 1.0, %v2252_v1  ;;  %vm2213_vm9 = vmor %vm2211_vm13, %vm2212_vm3 }
 0x1ce   : > { %v2209_v25 = vmul.f32 %v5429_v24, %v2208_v57  ;;  %v5435_v10 = vpop.eup %5434  ;;  %vm2226_vm4 = vweird.f32 %v7283_v41  ;;  %v2247_v0 = vand.u32 2147483648, %v7285_v33  ;;  %vm2257_vm6 = vweird.f32 %v5431_v8 }
 0x1cf   : > { %v2165_v37 = vadd.f32 %v5427_v26, %v2164_v62  ;;  %v5437_v4 = vpop.eup %5436  ;;  %v2222_v3 = vmul.f32 %v5435_v10, %v7283_v41  ;;  %vm7323_vm7 = vcmp.eq.f32.partialorder %v2230_v28, 8.507059e+37  ;;  %vm2241_vm8 = vweird.f32 %v7285_v33  ;;  %vm2258_vm11 = vmor %vm2256_vm0, %vm2257_vm6 }
 0x1d0   : > { %v2210_v6 = vadd.f32 %v5429_v24, %v2209_v25  ;;  %v2245_v53 = vand.u32 2147483647, %v7285_v33  ;;  %v5439_v21 = vpop.eup %5438  ;;  %v2254_v17 = vmul.f32 %v5431_v8, %v2253_v51  ;;  %v2233_v9 = vor.u32 1.1754944e-38, %v2232_v20 }
 0x1d1   : > { %v2169_v43 = vsel %vm2168_vm5, %v5427_v26, %v2165_v37  ;;  %v7332_v42 = vadd.f32 1.0, %v5433_v11  ;;  %v5441_v15 = vpop.eup %5440  ;;  %v2223_v63 = vsub.f32 1.0, %v2222_v3  ;;  %v2237_v46 = vmul.f32 %v5439_v21, %v7285_v33  ;;  %v704_v33 = vpop.f32.mrf.mxu1 }
 0x1d2   : > { %v2174_v34 = vsel %vm7291_vm14, %v2173_v45, %v2169_v43  ;;  %v2214_v29 = vsel %vm2213_vm9, %v5429_v24, %v2210_v6  ;;  %v2255_v31 = vadd.f32 %v5431_v8, %v2254_v17  ;;  %v2248_v12 = vor.u32 1.1754944e-38, %v2247_v0 }
 0x1d3   : > { %4099 = vst [vmem:[%s6188_s25 + $0x108] sm:$0xff] %v2174_v34  ;;  %v2219_v22 = vsel %vm7298_vm15, %v2218_v7, %v2214_v29  ;;  %vm2286_vm10 = vweird.f32 %v7303_v58  ;;  %v5443_v13 = vpop.eup %5442  ;;  %v2224_v32 = vmul.f32 %v5435_v10, %v2223_v63  ;;  %vm2227_vm12 = vweird.f32 %v5435_v10 }
 0x1d4   : > { %4102 = vst [vmem:[%s6188_s25 + $0x120] sm:$0xff] %v2219_v22  ;;  %v2238_v23 = vsub.f32 1.0, %v2237_v46  ;;  %5444 = vrcp.f32 %v7332_v42  ;;  %v2259_v54 = vsel %vm2258_vm11, %v5431_v8, %v2255_v31  ;;  %v2282_v39 = vmul.f32 %v5443_v13, %v7303_v58  ;;  %vm2228_vm14 = vmor %vm2226_vm4, %vm2227_vm12  ;;  %v971_v31 = vpop.f32.mrf.mxu0 }
 0x1d5   : > { %v2290_v27 = vand.u32 2147483647, %v7303_v58  ;;  %v2292_v48 = vand.u32 2147483648, %v7303_v58  ;;  %v2264_v44 = vsel %vm7311_vm2, %v2263_v35, %v2259_v54  ;;  %v2225_v55 = vadd.f32 %v5435_v10, %v2224_v32  ;;  %v882_v54 = vpop.f32.mrf.mxu3 }
 0x1d6   : > { %v2239_v14 = vmul.f32 %v5439_v21, %v2238_v23  ;;  %vm2242_vm13 = vweird.f32 %v5439_v21  ;;  %4105 = vst [vmem:[%s6188_s25 + $0x138] sm:$0xff] %v2264_v44  ;;  %v2283_v19 = vsub.f32 1.0, %v2282_v39  ;;  %vm2287_vm15 = vweird.f32 %v5443_v13  ;;  %v793_v23 = vpop.f32.mrf.mxu2 }
 0x1d7   : > { %v7354_v59 = vadd.f32 1.0, %v5437_v4  ;;  %v7356_v26 = vadd.f32 1.0, %v5441_v15  ;;  %v2229_v60 = vsel %vm2228_vm14, %v5435_v10, %v2225_v55  ;;  %v2335_v30 = vand.u32 2147483647, %v7332_v42  ;;  %vm2243_vm0 = vmor %vm2241_vm8, %vm2242_vm13 }
 0x1d8   : > { %v2240_v24 = vadd.f32 %v5439_v21, %v2239_v14  ;;  %5446 = vpow2.f32 %v7308_v16  ;;  %v2234_v45 = vsel %vm7323_vm7, %v2233_v9, %v2229_v60  ;;  %v2284_v41 = vmul.f32 %v5443_v13, %v2283_v19  ;;  %vm2288_vm3 = vmor %vm2286_vm10, %vm2287_vm15 }
 0x1d9   : > { %v2337_v50 = vand.u32 2147483648, %v7332_v42  ;;  %5448 = vrcp.f32 %v7354_v59  ;;  %4103 = vst [vmem:[%s6188_s25 + $0x128] sm:$0xff] %v2234_v45  ;;  %vm2246_vm1 = vcmp.eq.f32.partialorder %v2245_v53, 8.507059e+37  ;;  %vm7367_vm2 = vcmp.eq.f32.partialorder %v2290_v27, 8.507059e+37  ;;  %v706_v27 = vpop.f32.mrf.mxu1 }
 0x1da   : > { %v5445_v56 = vpop.eup %5444  ;;  %v2244_v5 = vsel %vm2243_vm0, %v5439_v21, %v2240_v24  ;;  %5450 = vrcp.f32 %v7356_v26  ;;  %v2285_v57 = vadd.f32 %v5443_v13, %v2284_v41  ;;  %v2293_v28 = vor.u32 1.1754944e-38, %v2292_v48 }
 0x1db   : > { %v2249_v8 = vsel %vm2246_vm1, %v2248_v12, %v2244_v5  ;;  %v2327_v16 = vmul.f32 %v5445_v56, %v7332_v42  ;;  %vm2331_vm4 = vweird.f32 %v7332_v42  ;;  %vm7378_vm5 = vcmp.eq.f32.partialorder %v2335_v30, 8.507059e+37 }
 0x1dc   : > { %4104 = vst [vmem:[%s6188_s25 + $0x130] sm:$0xff] %v2249_v8  ;;  %v2305_v1 = vand.u32 2147483647, %v7354_v59  ;;  %v2307_v61 = vand.u32 2147483648, %v7354_v59  ;;  %v2289_v20 = vsel %vm2288_vm3, %v5443_v13, %v2285_v57  ;;  %v2338_v25 = vor.u32 1.1754944e-38, %v2337_v50 }
 0x1dd   : > { %v2328_v11 = vsub.f32 1.0, %v2327_v16  ;;  %v969_v35 = vadd.f32 %v968_v36, %v6603_v40  ;;  %v2294_v58 = vsel %vm7367_vm2, %v2293_v28, %v2289_v20  ;;  %vm2301_vm6 = vweird.f32 %v7354_v59  ;;  %v973_v20 = vpop.f32.mrf.mxu0 }
 0x1de   : > { %v5447_v10 = vpop.eup %5446  ;;  %v2320_v37 = vand.u32 2147483647, %v7356_v26  ;;  %v791_v51 = vadd.f32 %v790_v49, %v6609_v52  ;;  %v880_v0 = vadd.f32 %v879_v2, %v6649_v38  ;;  %4107 = vst [vmem:[%s6188_s25 + $0x148] sm:$0xff] %v2294_v58  ;;  %vm2332_vm7 = vweird.f32 %v5445_v56 }
 0x1df   : > { %v5449_v4 = vpop.eup %5448  ;;  %v2329_v6 = vmul.f32 %v5445_v56, %v2328_v11  ;;  %v7392_v3 = vadd.f32 1.0, %v5447_v10  ;;  %v4922_v18 = vmul.f32 -1.442695, %v969_v35  ;;  %vm7395_vm8 = vcmp.eq.f32.partialorder %v2305_v1, 8.507059e+37  ;;  %vm2333_vm10 = vmor %vm2331_vm4, %vm2332_vm7 }
 0x1e0   : > { %v5451_v53 = vpop.eup %5450  ;;  %v2297_v21 = vmul.f32 %v5449_v4, %v7354_v59  ;;  %v2308_v17 = vor.u32 1.1754944e-38, %v2307_v61  ;;  %vm2316_vm9 = vweird.f32 %v7356_v26  ;;  %v4920_v34 = vmul.f32 -1.442695, %v791_v51  ;;  %v795_v51 = vpop.f32.mrf.mxu2 }
 0x1e1   : > { %v2330_v9 = vadd.f32 %v5445_v56, %v2329_v6  ;;  %v2312_v15 = vmul.f32 %v5451_v53, %v7356_v26  ;;  %5452 = vrcp.f32 %v7392_v3  ;;  %vm7404_vm11 = vcmp.eq.f32.partialorder %v2320_v37, 8.507059e+37 }
 0x1e2   : > { %v2298_v29 = vsub.f32 1.0, %v2297_v21  ;;  %v2322_v46 = vand.u32 2147483648, %v7356_v26  ;;  %v4921_v22 = vmul.f32 -1.442695, %v880_v0  ;;  %5454 = vpow2.f32 %v4922_v18 }
 0x1e3   : > { %v2334_v12 = vsel %vm2333_vm10, %v5445_v56, %v2330_v9  ;;  %v2313_v13 = vsub.f32 1.0, %v2312_v15  ;;  %v705_v32 = vadd.f32 %v704_v33, %v6600_v47  ;;  %vm2302_vm12 = vweird.f32 %v5449_v4 }
 0x1e4   : > { %v2339_v42 = vsel %vm7378_vm5, %v2338_v25, %v2334_v12  ;;  %v2299_v39 = vmul.f32 %v5449_v4, %v2298_v29  ;;  %vm2317_vm13 = vweird.f32 %v5451_v53  ;;  %5456 = vpow2.f32 %v4920_v34  ;;  %vm2303_vm14 = vmor %vm2301_vm6, %vm2302_vm12 }
 0x1e5   : > { %4110 = vst [vmem:[%s6188_s25 + $0x160] sm:$0xff] %v2339_v42  ;;  %v2314_v48 = vmul.f32 %v5451_v53, %v2313_v13  ;;  %v4924_v44 = vmul.f32 -1.442695, %v705_v32  ;;  %v972_v55 = vadd.f32 %v971_v31, %v6603_v40  ;;  %5458 = vpow2.f32 %v4921_v22  ;;  %vm2318_vm15 = vmor %vm2316_vm9, %vm2317_vm13 }
 0x1e6   : > { %v2300_v14 = vadd.f32 %v5449_v4, %v2299_v39  ;;  %v794_v19 = vadd.f32 %v793_v23, %v6609_v52  ;;  %v883_v60 = vadd.f32 %v882_v54, %v6649_v38  ;;  %v707_v45 = vadd.f32 %v706_v27, %v6600_v47 }
 0x1e7   : > { %v5453_v24 = vpop.eup %5452  ;;  %v2315_v30 = vadd.f32 %v5451_v53, %v2314_v48  ;;  %5460 = vpow2.f32 %v4924_v44  ;;  %v4927_v36 = vmul.f32 -1.442695, %v972_v55  ;;  %v2323_v50 = vor.u32 1.1754944e-38, %v2322_v46 }
 0x1e8   : > { %v2304_v41 = vsel %vm2303_vm14, %v5449_v4, %v2300_v14  ;;  %v2357_v49 = vmul.f32 %v5453_v24, %v7392_v3  ;;  %v4925_v2 = vmul.f32 -1.442695, %v794_v19  ;;  %v5455_v56 = vpop.eup %5454  ;;  %v2367_v7 = vand.u32 2147483648, %v7392_v3 }
 0x1e9   : > { %v2309_v59 = vsel %vm7395_vm8, %v2308_v17, %v2304_v41  ;;  %v2319_v5 = vsel %vm2318_vm15, %v5451_v53, %v2315_v30  ;;  %v4926_v33 = vmul.f32 -1.442695, %v883_v60  ;;  %v7429_v26 = vadd.f32 1.0, %v5455_v56 }
 0x1ea   : > { %4108 = vst [vmem:[%s6188_s25 + $0x150] sm:$0xff] %v2309_v59  ;;  %v2324_v8 = vsel %vm7404_vm11, %v2323_v50, %v2319_v5  ;;  %v2358_v57 = vsub.f32 1.0, %v2357_v49  ;;  %5462 = vpow2.f32 %v4927_v36  ;;  %v5457_v28 = vpop.eup %5456  ;;  %v4929_v16 = vmul.f32 -1.442695, %v707_v45 }
 0x1eb   : > { %4109 = vst [vmem:[%s6188_s25 + $0x158] sm:$0xff] %v2324_v8  ;;  %5464 = vpow2.f32 %v4925_v2  ;;  %v5459_v62 = vpop.eup %5458  ;;  %vm2362_vm0 = vweird.f32 %v5453_v24  ;;  %v2365_v61 = vand.u32 2147483647, %v7392_v3  ;;  %vm2361_vm1 = vweird.f32 %v7392_v3 }
 0x1ec   : > { %v2359_v1 = vmul.f32 %v5453_v24, %v2358_v57  ;;  %5466 = vrcp.f32 %v7429_v26  ;;  %v7435_v25 = vadd.f32 1.0, %v5457_v28  ;;  %v7437_v35 = vadd.f32 1.0, %v5459_v62  ;;  %vm2363_vm2 = vmor %vm2361_vm1, %vm2362_vm0 }
 0x1ed   : > { %v5461_v11 = vpop.eup %5460  ;;  %5468 = vpow2.f32 %v4926_v33  ;;  %v2368_v58 = vor.u32 1.1754944e-38, %v2367_v7  ;;  %v2410_v0 = vand.u32 2147483647, %v7429_v26  ;;  %v2412_v4 = vand.u32 2147483648, %v7429_v26 }
 0x1ee   : > { %v2360_v10 = vadd.f32 %v5453_v24, %v2359_v1  ;;  %v7439_v37 = vadd.f32 1.0, %v5461_v11  ;;  %5470 = vpow2.f32 %v4929_v16  ;;  %v974_v6 = vadd.f32 %v973_v20, %v6603_v40 }
 0x1ef   : > { %5472 = vrcp.f32 %v7435_v25  ;;  %vm2366_vm3 = vcmp.eq.f32.partialorder %v2365_v61, 8.507059e+37  ;;  %v2382_v53 = vand.u32 2147483648, %v7435_v25  ;;  %v7448_v17 = vadd.f32 %v795_v51, %v6609_v52 }
 0x1f0   : > { %v5463_v3 = vpop.eup %5462  ;;  %v2364_v18 = vsel %vm2363_vm2, %v5453_v24, %v2360_v10  ;;  %5474 = vrcp.f32 %v7437_v35  ;;  %vm2406_vm4 = vweird.f32 %v7429_v26  ;;  %v2380_v15 = vand.u32 2147483647, %v7435_v25 }
 0x1f1   : > { %v5465_v21 = vpop.eup %5464  ;;  %v2369_v43 = vsel %vm2366_vm3, %v2368_v58, %v2364_v18  ;;  %v2397_v34 = vand.u32 2147483648, %v7437_v35  ;;  %5476 = vrcp.f32 %v7439_v37  ;;  %vm7456_vm5 = vcmp.eq.f32.partialorder %v2410_v0, 8.507059e+37 }
 0x1f2   : > { %v5467_v9 = vpop.eup %5466  ;;  %4112 = vst [vmem:[%s6188_s25 + $0x170] sm:$0xff] %v2369_v43  ;;  %v2413_v22 = vor.u32 1.1754944e-38, %v2412_v4  ;;  %v2395_v31 = vand.u32 2147483647, %v7437_v35  ;;  %v4932_v12 = vmul.f32 -1.442695, %v974_v6  ;;  %vm2376_vm6 = vweird.f32 %v7435_v25 }
 0x1f3   : > { %v5469_v29 = vpop.eup %5468  ;;  %v2402_v63 = vmul.f32 %v5467_v9, %v7429_v26  ;;  %v2383_v32 = vor.u32 1.1754944e-38, %v2382_v53  ;;  %v7462_v23 = vadd.f32 1.0, %v5463_v3  ;;  %v7464_v54 = vadd.f32 1.0, %v5465_v21  ;;  %v884_v3 = vpop.f32.mrf.mxu3 }
 0x1f4   : > { %v5471_v13 = vpop.eup %5470  ;;  %vm2407_vm7 = vweird.f32 %v5467_v9  ;;  %vm2391_vm8 = vweird.f32 %v7437_v35  ;;  %vm2436_vm9 = vweird.f32 %v7439_v37  ;;  %v2440_v27 = vand.u32 2147483647, %v7439_v37 }
 0x1f5   : > { %v5473_v42 = vpop.eup %5472  ;;  %v2403_v39 = vsub.f32 1.0, %v2402_v63  ;;  %vm7470_vm10 = vcmp.eq.f32.partialorder %v2380_v15, 8.507059e+37  ;;  %v2398_v14 = vor.u32 1.1754944e-38, %v2397_v34  ;;  %v2442_v19 = vand.u32 2147483648, %v7439_v37  ;;  %vm2408_vm14 = vmor %vm2406_vm4, %vm2407_vm7  ;;  %v709_v15 = vpop.f32.mrf.mxu1 }
 0x1f6   : > { %v5475_v48 = vpop.eup %5474  ;;  %v2372_v44 = vmul.f32 %v5473_v42, %v7435_v25  ;;  %5478 = vrcp.f32 %v7462_v23  ;;  %vm7477_vm11 = vcmp.eq.f32.partialorder %v2395_v31, 8.507059e+37  ;;  %v7481_v36 = vadd.f32 1.0, %v5469_v29 }
 0x1f7   : > { %v2404_v60 = vmul.f32 %v5467_v9, %v2403_v39  ;;  %v2387_v24 = vmul.f32 %v5475_v48, %v7437_v35  ;;  %5480 = vpow2.f32 %v4932_v12  ;;  %v5477_v45 = vpop.eup %5476  ;;  %vm2377_vm12 = vweird.f32 %v5473_v42 }
 0x1f8   : > { %v2373_v41 = vsub.f32 1.0, %v2372_v44  ;;  %5482 = vrcp.f32 %v7464_v54  ;;  %v7484_v50 = vadd.f32 1.0, %v5471_v13  ;;  %v2432_v56 = vmul.f32 %v5477_v45, %v7439_v37  ;;  %vm2378_vm2 = vmor %vm2376_vm6, %vm2377_vm12  ;;  %v976_v13 = vpop.f32.mrf.mxu0 }
 0x1f9   : > { %v2405_v49 = vadd.f32 %v5467_v9, %v2404_v60  ;;  %v2388_v2 = vsub.f32 1.0, %v2387_v24  ;;  %vm7487_vm13 = vcmp.eq.f32.partialorder %v2440_v27, 8.507059e+37  ;;  %v2485_v5 = vand.u32 2147483647, %v7462_v23  ;;  %v798_v24 = vpop.f32.mrf.mxu2 }
 0x1fa   : > { %v2374_v7 = vmul.f32 %v5473_v42, %v2373_v41  ;;  %vm2392_vm15 = vweird.f32 %v5475_v48  ;;  %v2443_v33 = vor.u32 1.1754944e-38, %v2442_v19  ;;  %v2487_v8 = vand.u32 2147483648, %v7462_v23 }
 0x1fb   : > { %v2409_v57 = vsel %vm2408_vm14, %v5467_v9, %v2405_v49  ;;  %v2389_v28 = vmul.f32 %v5475_v48, %v2388_v2  ;;  %v2433_v16 = vsub.f32 1.0, %v2432_v56  ;;  %vm2481_vm0 = vweird.f32 %v7462_v23  ;;  %vm2393_vm4 = vmor %vm2391_vm8, %vm2392_vm15 }
 0x1fc   : > { %v5479_v62 = vpop.eup %5478  ;;  %v2414_v1 = vsel %vm7456_vm5, %v2413_v22, %v2409_v57  ;;  %v2375_v61 = vadd.f32 %v5473_v42, %v2374_v7  ;;  %vm2437_vm1 = vweird.f32 %v5477_v45  ;;  %5484 = vrcp.f32 %v7481_v36  ;;  %v887_v7 = vpop.f32.mrf.mxu3 }
 0x1fd   : > { %v5481_v26 = vpop.eup %5480  ;;  %4115 = vst [vmem:[%s6188_s25 + $0x188] sm:$0xff] %v2414_v1  ;;  %v2390_v20 = vadd.f32 %v5475_v48, %v2389_v28  ;;  %v2434_v11 = vmul.f32 %v5477_v45, %v2433_v16  ;;  %v2477_v10 = vmul.f32 %v5479_v62, %v7462_v23  ;;  %vm7505_vm3 = vcmp.eq.f32.partialorder %v2485_v5, 8.507059e+37  ;;  %vm2438_vm5 = vmor %vm2436_vm9, %vm2437_vm1 }
 0x1fe   : > { %v5483_v51 = vpop.eup %5482  ;;  %v2379_v0 = vsel %vm2378_vm2, %v5473_v42, %v2375_v61  ;;  %v2488_v4 = vor.u32 1.1754944e-38, %v2487_v8  ;;  %v2455_v25 = vand.u32 2147483647, %v7464_v54  ;;  %v2457_v6 = vand.u32 2147483648, %v7464_v54 }
 0x1ff   : > { %v2384_v18 = vsel %vm7470_vm10, %v2383_v32, %v2379_v0  ;;  %v2394_v53 = vsel %vm2393_vm4, %v5475_v48, %v2390_v20  ;;  %v2435_v21 = vadd.f32 %v5477_v45, %v2434_v11  ;;  %v2478_v43 = vsub.f32 1.0, %v2477_v10 }
 0x200   : > { %4113 = vst [vmem:[%s6188_s25 + $0x178] sm:$0xff] %v2384_v18  ;;  %v2399_v9 = vsel %vm7477_vm11, %v2398_v14, %v2394_v53  ;;  %vm2482_vm6 = vweird.f32 %v5479_v62  ;;  %v2447_v35 = vmul.f32 %v5483_v51, %v7464_v54  ;;  %vm2451_vm7 = vweird.f32 %v7464_v54  ;;  %v978_v58 = vpop.f32.mrf.mxu0 }
 0x201   : > { %4114 = vst [vmem:[%s6188_s25 + $0x180] sm:$0xff] %v2399_v9  ;;  %v2439_v34 = vsel %vm2438_vm5, %v5477_v45, %v2435_v21  ;;  %v2479_v29 = vmul.f32 %v5479_v62, %v2478_v43  ;;  %v2470_v63 = vand.u32 2147483647, %v7481_v36  ;;  %5486 = vrcp.f32 %v7484_v50  ;;  %vm2483_vm10 = vmor %vm2481_vm0, %vm2482_vm6 }
 0x202   : > { %v5485_v46 = vpop.eup %5484  ;;  %v2444_v22 = vsel %vm7487_vm13, %v2443_v33, %v2439_v34  ;;  %v2448_v37 = vsub.f32 1.0, %v2447_v35  ;;  %vm7529_vm8 = vcmp.eq.f32.partialorder %v2455_v25, 8.507059e+37  ;;  %v2458_v12 = vor.u32 1.1754944e-38, %v2457_v6 }
 0x203   : > { %4117 = vst [vmem:[%s6188_s25 + $0x198] sm:$0xff] %v2444_v22  ;;  %v2480_v32 = vadd.f32 %v5479_v62, %v2479_v29  ;;  %v2462_v42 = vmul.f32 %v5485_v46, %v7481_v36  ;;  %vm2466_vm9 = vweird.f32 %v7481_v36  ;;  %v2472_v39 = vand.u32 2147483648, %v7481_v36 }
 0x204   : > { %v2449_v27 = vmul.f32 %v5483_v51, %v2448_v37  ;;  %vm2452_vm11 = vweird.f32 %v5483_v51  ;;  %v2515_v48 = vand.u32 2147483647, %v7484_v50  ;;  %v7541_v44 = vadd.f32 1.0, %v5481_v26  ;;  %v889_v31 = vpop.f32.mrf.mxu3 }
 0x205   : > { %v2484_v55 = vsel %vm2483_vm10, %v5479_v62, %v2480_v32  ;;  %v2463_v14 = vsub.f32 1.0, %v2462_v42  ;;  %vm7543_vm12 = vcmp.eq.f32.partialorder %v2470_v63, 8.507059e+37  ;;  %v4930_v60 = vmul.f32 -1.442695, %v7448_v17  ;;  %vm2453_vm14 = vmor %vm2451_vm7, %vm2452_vm11  ;;  %v711_v62 = vpop.f32.mrf.mxu1 }
 0x206   : > { %v2489_v23 = vsel %vm7505_vm3, %v2488_v4, %v2484_v55  ;;  %v2450_v30 = vadd.f32 %v5483_v51, %v2449_v27  ;;  %vm2511_vm13 = vweird.f32 %v7484_v50  ;;  %v885_v45 = vadd.f32 %v884_v3, %v6649_v38 }
 0x207   : > { %v5487_v41 = vpop.eup %5486  ;;  %4120 = vst [vmem:[%s6188_s25 + $0x1b0] sm:$0xff] %v2489_v23  ;;  %v2464_v49 = vmul.f32 %v5485_v46, %v2463_v14  ;;  %vm2467_vm15 = vweird.f32 %v5485_v46  ;;  %v2473_v2 = vor.u32 1.1754944e-38, %v2472_v39  ;;  %5488 = vrcp.f32 %v7541_v44 }
 0x208   : > { %v2454_v17 = vsel %vm2453_vm14, %v5483_v51, %v2450_v30  ;;  %v2507_v56 = vmul.f32 %v5487_v41, %v7484_v50  ;;  %vm7557_vm0 = vcmp.eq.f32.partialorder %v2515_v48, 8.507059e+37  ;;  %v2517_v5 = vand.u32 2147483648, %v7484_v50  ;;  %vm2468_vm1 = vmor %vm2466_vm9, %vm2467_vm15 }
 0x209   : > { %v2459_v33 = vsel %vm7529_vm8, %v2458_v12, %v2454_v17  ;;  %v2465_v54 = vadd.f32 %v5485_v46, %v2464_v49  ;;  %v2560_v8 = vand.u32 2147483647, %v7541_v44  ;;  %5490 = vpow2.f32 %v4930_v60 }
 0x20a   : > { %4118 = vst [vmem:[%s6188_s25 + $0x1a0] sm:$0xff] %v2459_v33  ;;  %v2508_v57 = vsub.f32 1.0, %v2507_v56  ;;  %vm2512_vm2 = vweird.f32 %v5487_v41  ;;  %v4931_v28 = vmul.f32 -1.442695, %v885_v45  ;;  %v710_v16 = vadd.f32 %v709_v15, %v6600_v47  ;;  %v800_v15 = vpop.f32.mrf.mxu2 }
 0x20b   : > { %v2469_v1 = vsel %vm2468_vm1, %v5485_v46, %v2465_v54  ;;  %v977_v61 = vadd.f32 %v976_v13, %v6603_v40  ;;  %v799_v26 = vadd.f32 %v798_v24, %v6609_v52  ;;  %v888_v20 = vadd.f32 %v887_v7, %v6649_v38  ;;  %vm2513_vm3 = vmor %vm2511_vm13, %vm2512_vm2 }
 0x20c   : > { %v2474_v11 = vsel %vm7543_vm12, %v2473_v2, %v2469_v1  ;;  %v2509_v10 = vmul.f32 %v5487_v41, %v2508_v57  ;;  %5492 = vpow2.f32 %v4931_v28  ;;  %v4934_v36 = vmul.f32 -1.442695, %v710_v16  ;;  %v981_v1 = vpop.f32.mrf.mxu0 }
 0x20d   : > { %v5489_v51 = vpop.eup %5488  ;;  %4119 = vst [vmem:[%s6188_s25 + $0x1a8] sm:$0xff] %v2474_v11  ;;  %v2518_v0 = vor.u32 1.1754944e-38, %v2517_v5  ;;  %v4937_v4 = vmul.f32 -1.442695, %v977_v61  ;;  %v4935_v25 = vmul.f32 -1.442695, %v799_v26  ;;  %v712_v6 = vadd.f32 %v711_v62, %v6600_v47  ;;  %v714_v59 = vpop.f32.mrf.mxu1 }
 0x20e   : > { %v2510_v3 = vadd.f32 %v5487_v41, %v2509_v10  ;;  %v2552_v18 = vmul.f32 %v5489_v51, %v7541_v44  ;;  %v2562_v53 = vand.u32 2147483648, %v7541_v44  ;;  %5494 = vpow2.f32 %v4934_v36 }
 0x20f   : > { %v5491_v21 = vpop.eup %5490  ;;  %5496 = vpow2.f32 %v4937_v4  ;;  %v4936_v43 = vmul.f32 -1.442695, %v888_v20  ;;  %v4939_v9 = vmul.f32 -1.442695, %v712_v6  ;;  %v979_v35 = vadd.f32 %v978_v58, %v6603_v40 }
 0x210   : > { %v2514_v34 = vsel %vm2513_vm3, %v5487_v41, %v2510_v3  ;;  %v2553_v29 = vsub.f32 1.0, %v2552_v18  ;;  %v7582_v63 = vadd.f32 1.0, %v5491_v21  ;;  %5498 = vpow2.f32 %v4935_v25 }
 0x211   : > { %v2519_v46 = vsel %vm7557_vm0, %v2518_v0, %v2514_v34  ;;  %vm2557_vm4 = vweird.f32 %v5489_v51  ;;  %v801_v50 = vadd.f32 %v800_v15, %v6609_v52  ;;  %vm2556_vm5 = vweird.f32 %v7541_v44 }
 0x212   : > { %v5493_v22 = vpop.eup %5492  ;;  %4122 = vst [vmem:[%s6188_s25 + $0x1c0] sm:$0xff] %v2519_v46  ;;  %v2554_v37 = vmul.f32 %v5489_v51, %v2553_v29  ;;  %5500 = vrcp.f32 %v7582_v63  ;;  %v4942_v13 = vmul.f32 -1.442695, %v979_v35  ;;  %vm2561_vm6 = vcmp.eq.f32.partialorder %v2560_v8, 8.507059e+37  ;;  %vm2558_vm7 = vmor %vm2556_vm5, %vm2557_vm4 }
 0x213   : > { %v7590_v12 = vadd.f32 1.0, %v5493_v22  ;;  %5502 = vpow2.f32 %v4936_v43  ;;  %v2563_v39 = vor.u32 1.1754944e-38, %v2562_v53  ;;  %v2530_v48 = vand.u32 2147483647, %v7582_v63 }
 0x214   : > { %v5495_v32 = vpop.eup %5494  ;;  %v2555_v42 = vadd.f32 %v5489_v51, %v2554_v37  ;;  %5504 = vpow2.f32 %v4939_v9  ;;  %v2532_v55 = vand.u32 2147483648, %v7582_v63  ;;  %v890_v44 = vadd.f32 %v889_v31, %v6649_v38 }
 0x215   : > { %v5497_v27 = vpop.eup %5496  ;;  %5506 = vrcp.f32 %v7590_v12  ;;  %v7596_v60 = vadd.f32 1.0, %v5495_v32  ;;  %v4940_v23 = vmul.f32 -1.442695, %v801_v50  ;;  %vm2526_vm8 = vweird.f32 %v7582_v63 }
 0x216   : > { %v5499_v14 = vpop.eup %5498  ;;  %v2559_v19 = vsel %vm2558_vm7, %v5489_v51, %v2555_v42  ;;  %v7598_v24 = vadd.f32 1.0, %v5497_v27  ;;  %5508 = vpow2.f32 %v4942_v13  ;;  %v2545_v49 = vand.u32 2147483647, %v7590_v12 }
 0x217   : > { %v2564_v30 = vsel %vm2561_vm6, %v2563_v39, %v2559_v19  ;;  %v7600_v45 = vadd.f32 1.0, %v5499_v14  ;;  %v2547_v2 = vand.u32 2147483648, %v7590_v12  ;;  %5510 = vrcp.f32 %v7596_v60 }
 0x218   : > { %v5501_v41 = vpop.eup %5500  ;;  %4125 = vst [vmem:[%s6188_s25 + $0x1d8] sm:$0xff] %v2564_v30  ;;  %vm7608_vm9 = vcmp.eq.f32.partialorder %v2530_v48, 8.507059e+37  ;;  %5512 = vrcp.f32 %v7598_v24  ;;  %v7613_v5 = vmul.f32 -1.442695, %v890_v44  ;;  %v2533_v33 = vor.u32 1.1754944e-38, %v2532_v55 }
 0x219   : > { %v5503_v17 = vpop.eup %5502  ;;  %v2522_v56 = vmul.f32 %v5501_v41, %v7582_v63  ;;  %vm2541_vm10 = vweird.f32 %v7590_v12  ;;  %v2592_v54 = vand.u32 2147483648, %v7596_v60  ;;  %5514 = vpow2.f32 %v4940_v23 }
 0x21a   : > { %v5505_v7 = vpop.eup %5504  ;;  %v2590_v28 = vand.u32 2147483647, %v7596_v60  ;;  %v2637_v16 = vand.u32 2147483648, %v7598_v24  ;;  %5516 = vrcp.f32 %v7600_v45  ;;  %vm7621_vm11 = vcmp.eq.f32.partialorder %v2545_v49, 8.507059e+37 }
 0x21b   : > { %v5507_v8 = vpop.eup %5506  ;;  %v2523_v57 = vsub.f32 1.0, %v2522_v56  ;;  %v2548_v61 = vor.u32 1.1754944e-38, %v2547_v2  ;;  %v2635_v26 = vand.u32 2147483647, %v7598_v24  ;;  %vm2527_vm12 = vweird.f32 %v5501_v41 }
 0x21c   : > { %v2537_v62 = vmul.f32 %v5507_v8, %v7590_v12  ;;  %v5509_v20 = vpop.eup %5508  ;;  %vm2586_vm13 = vweird.f32 %v7596_v60  ;;  %v7627_v10 = vadd.f32 1.0, %v5503_v17  ;;  %vm2542_vm14 = vweird.f32 %v5507_v8  ;;  %vm2528_vm1 = vmor %vm2526_vm8, %vm2527_vm12 }
 0x21d   : > { %v2524_v11 = vmul.f32 %v5501_v41, %v2523_v57  ;;  %v5511_v36 = vpop.eup %5510  ;;  %v2593_v51 = vor.u32 1.1754944e-38, %v2592_v54  ;;  %vm2631_vm15 = vweird.f32 %v7598_v24  ;;  %vm7631_vm0 = vcmp.eq.f32.partialorder %v2590_v28, 8.507059e+37  ;;  %vm2543_vm4 = vmor %vm2541_vm10, %vm2542_vm14 }
 0x21e   : > { %v2538_v58 = vsub.f32 1.0, %v2537_v62  ;;  %v5513_v0 = vpop.eup %5512  ;;  %v2582_v25 = vmul.f32 %v5511_v36, %v7596_v60  ;;  %v2638_v3 = vor.u32 1.1754944e-38, %v2637_v16  ;;  %v2605_v18 = vand.u32 2147483647, %v7600_v45 }
 0x21f   : > { %v2525_v4 = vadd.f32 %v5501_v41, %v2524_v11  ;;  %v5515_v53 = vpop.eup %5514  ;;  %v2627_v43 = vmul.f32 %v5513_v0, %v7598_v24  ;;  %vm7640_vm2 = vcmp.eq.f32.partialorder %v2635_v26, 8.507059e+37  ;;  %vm2601_vm3 = vweird.f32 %v7600_v45 }
 0x220   : > { %v2539_v21 = vmul.f32 %v5507_v8, %v2538_v58  ;;  %v2607_v35 = vand.u32 2147483648, %v7600_v45  ;;  %v7646_v15 = vadd.f32 1.0, %v5505_v7  ;;  %v5517_v34 = vpop.eup %5516  ;;  %v2583_v46 = vsub.f32 1.0, %v2582_v25 }
 0x221   : > { %v2529_v29 = vsel %vm2528_vm1, %v5501_v41, %v2525_v4  ;;  %5518 = vrcp.f32 %v7627_v10  ;;  %v7649_v63 = vadd.f32 1.0, %v5509_v20  ;;  %v2628_v50 = vsub.f32 1.0, %v2627_v43 }
 0x222   : > { %v2534_v22 = vsel %vm7608_vm9, %v2533_v33, %v2529_v29  ;;  %v2540_v37 = vadd.f32 %v5507_v8, %v2539_v21  ;;  %v2597_v31 = vmul.f32 %v5517_v34, %v7600_v45  ;;  %v2584_v13 = vmul.f32 %v5511_v36, %v2583_v46 }
 0x223   : > { %4123 = vst [vmem:[%s6188_s25 + $0x1c8] sm:$0xff] %v2534_v22  ;;  %vm2587_vm5 = vweird.f32 %v5511_v36  ;;  %vm2632_vm6 = vweird.f32 %v5513_v0  ;;  %v7658_v32 = vadd.f32 1.0, %v5515_v53  ;;  %v2629_v39 = vmul.f32 %v5513_v0, %v2628_v50 }
 0x224   : > { %v2544_v42 = vsel %vm2543_vm4, %v5507_v8, %v2540_v37  ;;  %v2598_v27 = vsub.f32 1.0, %v2597_v31  ;;  %5520 = vrcp.f32 %v7646_v15  ;;  %v2585_v55 = vadd.f32 %v5511_v36, %v2584_v13  ;;  %vm2588_vm8 = vmor %vm2586_vm13, %vm2587_vm5  ;;  %v716_v13 = vpop.f32.mrf.mxu1 }
 0x225   : > { %v2549_v48 = vsel %vm7621_vm11, %v2548_v61, %v2544_v42  ;;  %vm7663_vm7 = vcmp.eq.f32.partialorder %v2605_v18, 8.507059e+37  ;;  %v2620_v12 = vand.u32 2147483647, %v7627_v10  ;;  %v2630_v14 = vadd.f32 %v5513_v0, %v2629_v39  ;;  %vm2633_vm10 = vmor %vm2631_vm15, %vm2632_vm6 }
 0x226   : > { %4124 = vst [vmem:[%s6188_s25 + $0x1d0] sm:$0xff] %v2549_v48  ;;  %v2599_v19 = vmul.f32 %v5517_v34, %v2598_v27  ;;  %vm2602_vm9 = vweird.f32 %v5517_v34  ;;  %v2622_v23 = vand.u32 2147483648, %v7627_v10  ;;  %v2589_v41 = vsel %vm2588_vm8, %v5511_v36, %v2585_v55 }
 0x227   : > { %v5519_v30 = vpop.eup %5518  ;;  %v2608_v49 = vor.u32 1.1754944e-38, %v2607_v35  ;;  %vm2616_vm11 = vweird.f32 %v7627_v10  ;;  %5522 = vrcp.f32 %v7649_v63  ;;  %v2594_v60 = vsel %vm7631_vm0, %v2593_v51, %v2589_v41  ;;  %vm2603_vm12 = vmor %vm2601_vm3, %vm2602_vm9 }
 0x228   : > { %v2634_v2 = vsel %vm2633_vm10, %v5513_v0, %v2630_v14  ;;  %v2600_v17 = vadd.f32 %v5517_v34, %v2599_v19  ;;  %v2612_v56 = vmul.f32 %v5519_v30, %v7627_v10  ;;  %4127 = vst [vmem:[%s6188_s25 + $0x1e8] sm:$0xff] %v2594_v60  ;;  %vm7686_vm13 = vcmp.eq.f32.partialorder %v2620_v12, 8.507059e+37  ;;  %v803_v0 = vpop.f32.mrf.mxu2 }
 0x229   : > { %v2639_v7 = vsel %vm7640_vm2, %v2638_v3, %v2634_v2  ;;  %v2665_v33 = vand.u32 2147483647, %v7646_v15  ;;  %v2667_v54 = vand.u32 2147483648, %v7646_v15  ;;  %v2623_v16 = vor.u32 1.1754944e-38, %v2622_v23  ;;  %v892_v3 = vpop.f32.mrf.mxu3 }
 0x22a   : > { %v5521_v8 = vpop.eup %5520  ;;  %4130 = vst [vmem:[%s6188_s25 + $0x200] sm:$0xff] %v2639_v7  ;;  %v2604_v57 = vsel %vm2603_vm12, %v5517_v34, %v2600_v17  ;;  %v2613_v28 = vsub.f32 1.0, %v2612_v56  ;;  %v2710_v62 = vand.u32 2147483647, %v7649_v63  ;;  %v2712_v26 = vand.u32 2147483648, %v7649_v63 }
 0x22b   : > { %v2609_v45 = vsel %vm7663_vm7, %v2608_v49, %v2604_v57  ;;  %v2657_v61 = vmul.f32 %v5521_v8, %v7646_v15  ;;  %5524 = vrcp.f32 %v7658_v32  ;;  %vm2617_vm14 = vweird.f32 %v5519_v30 }
 0x22c   : > { %4128 = vst [vmem:[%s6188_s25 + $0x1f0] sm:$0xff] %v2609_v45  ;;  %v2614_v20 = vmul.f32 %v5519_v30, %v2613_v28  ;;  %vm2661_vm15 = vweird.f32 %v7646_v15  ;;  %vm2706_vm0 = vweird.f32 %v7649_v63  ;;  %vm7702_vm1 = vcmp.eq.f32.partialorder %v2665_v33, 8.507059e+37  ;;  %vm2618_vm3 = vmor %vm2616_vm11, %vm2617_vm14  ;;  %v983_v15 = vpop.f32.mrf.mxu0 }
 0x22d   : > { %v5523_v11 = vpop.eup %5522  ;;  %v2658_v36 = vsub.f32 1.0, %v2657_v61  ;;  %v2668_v51 = vor.u32 1.1754944e-38, %v2667_v54  ;;  %5526 = vpow2.f32 %v7613_v5  ;;  %vm2662_vm2 = vweird.f32 %v5521_v8 }
 0x22e   : > { %v2615_v4 = vadd.f32 %v5519_v30, %v2614_v20  ;;  %v2702_v25 = vmul.f32 %v5523_v11, %v7649_v63  ;;  %v715_v6 = vadd.f32 %v714_v59, %v6600_v47  ;;  %vm7711_vm4 = vcmp.eq.f32.partialorder %v2710_v62, 8.507059e+37  ;;  %vm2663_vm5 = vmor %vm2661_vm15, %vm2662_vm2 }
 0x22f   : > { %v2659_v18 = vmul.f32 %v5521_v8, %v2658_v36  ;;  %v2713_v21 = vor.u32 1.1754944e-38, %v2712_v26  ;;  %v982_v5 = vadd.f32 %v981_v1, %v6603_v40  ;;  %v804_v34 = vadd.f32 %v803_v0, %v6609_v52 }
 0x230   : > { %v2619_v43 = vsel %vm2618_vm3, %v5519_v30, %v2615_v4  ;;  %v2703_v9 = vsub.f32 1.0, %v2702_v25  ;;  %v4944_v35 = vmul.f32 -1.442695, %v715_v6  ;;  %v893_v37 = vadd.f32 %v892_v3, %v6649_v38  ;;  %v805_v54 = vpop.f32.mrf.mxu2 }
 0x231   : > { %v5525_v29 = vpop.eup %5524  ;;  %v2624_v46 = vsel %vm7686_vm13, %v2623_v16, %v2619_v43  ;;  %v2660_v22 = vadd.f32 %v5521_v8, %v2659_v18  ;;  %v4947_v10 = vmul.f32 -1.442695, %v982_v5  ;;  %vm2707_vm6 = vweird.f32 %v5523_v11  ;;  %v719_v43 = vpop.f32.mrf.mxu1 }
 0x232   : > { %4129 = vst [vmem:[%s6188_s25 + $0x1f8] sm:$0xff] %v2624_v46  ;;  %v2704_v50 = vmul.f32 %v5523_v11, %v2703_v9  ;;  %v2672_v31 = vmul.f32 %v5525_v29, %v7658_v32  ;;  %5528 = vpow2.f32 %v4944_v35  ;;  %v4945_v27 = vmul.f32 -1.442695, %v804_v34  ;;  %vm2708_vm7 = vmor %vm2706_vm0, %vm2707_vm6 }
 0x233   : > { %v5527_v42 = vpop.eup %5526  ;;  %v2664_v39 = vsel %vm2663_vm5, %v5521_v8, %v2660_v22  ;;  %5530 = vpow2.f32 %v4947_v10  ;;  %v4946_v48 = vmul.f32 -1.442695, %v893_v37  ;;  %v2680_v19 = vand.u32 2147483647, %v7658_v32  ;;  %v894_v8 = vpop.f32.mrf.mxu3 }
 0x234   : > { %v2669_v55 = vsel %vm7702_vm1, %v2668_v51, %v2664_v39  ;;  %v2705_v44 = vadd.f32 %v5523_v11, %v2704_v50  ;;  %v2673_v12 = vsub.f32 1.0, %v2672_v31  ;;  %v7727_v14 = vadd.f32 1.0, %v5527_v42 }
 0x235   : > { %4132 = vst [vmem:[%s6188_s25 + $0x210] sm:$0xff] %v2669_v55  ;;  %v2682_v23 = vand.u32 2147483648, %v7658_v32  ;;  %5532 = vpow2.f32 %v4945_v27  ;;  %v717_v30 = vadd.f32 %v716_v13, %v6600_v47  ;;  %vm2677_vm8 = vweird.f32 %v5525_v29 }
 0x236   : > { %v2709_v41 = vsel %vm2708_vm7, %v5523_v11, %v2705_v44  ;;  %v2674_v49 = vmul.f32 %v5525_v29, %v2673_v12  ;;  %5534 = vrcp.f32 %v7727_v14  ;;  %v984_v2 = vadd.f32 %v983_v15, %v6603_v40 }
 0x237   : > { %v2714_v60 = vsel %vm7711_vm4, %v2713_v21, %v2709_v41  ;;  %5536 = vpow2.f32 %v4946_v48  ;;  %vm2676_vm9 = vweird.f32 %v7658_v32  ;;  %v4949_v56 = vmul.f32 -1.442695, %v717_v30 }
 0x238   : > { %v5529_v63 = vpop.eup %5528  ;;  %4135 = vst [vmem:[%s6188_s25 + $0x228] sm:$0xff] %v2714_v60  ;;  %v2675_v17 = vadd.f32 %v5525_v29, %v2674_v49  ;;  %vm2678_vm10 = vmor %vm2676_vm9, %vm2677_vm8  ;;  %v2683_v7 = vor.u32 1.1754944e-38, %v2682_v23  ;;  %v2695_v24 = vand.u32 2147483647, %v7727_v14  ;;  %vm2681_vm11 = vcmp.eq.f32.partialorder %v2680_v19, 8.507059e+37  ;;  %v808_v46 = vpop.f32.mrf.mxu2 }
 0x239   : > { %v5531_v59 = vpop.eup %5530  ;;  %v7743_v33 = vadd.f32 1.0, %v5529_v63  ;;  %5538 = vpow2.f32 %v4949_v56  ;;  %v4952_v32 = vmul.f32 -1.442695, %v984_v2  ;;  %v2697_v45 = vand.u32 2147483648, %v7727_v14  ;;  %v721_v2 = vpop.f32.mrf.mxu1 }
 0x23a   : > { %v2679_v57 = vsel %vm2678_vm10, %v5525_v29, %v2675_v17  ;;  %v7745_v28 = vadd.f32 1.0, %v5531_v59  ;;  %v806_v61 = vadd.f32 %v805_v54, %v6609_v52  ;;  %v895_v26 = vadd.f32 %v894_v8, %v6649_v38 }
 0x23b   : > { %v5533_v16 = vpop.eup %5532  ;;  %v2684_v62 = vsel %vm2681_vm11, %v2683_v7, %v2679_v57  ;;  %5540 = vrcp.f32 %v7743_v33  ;;  %vm2691_vm12 = vweird.f32 %v7727_v14  ;;  %vm7755_vm13 = vcmp.eq.f32.partialorder %v2695_v24, 8.507059e+37 }
 0x23c   : > { %v5535_v1 = vpop.eup %5534  ;;  %4133 = vst [vmem:[%s6188_s25 + $0x218] sm:$0xff] %v2684_v62  ;;  %5542 = vrcp.f32 %v7745_v28  ;;  %v2740_v58 = vand.u32 2147483647, %v7743_v33  ;;  %v2742_v51 = vand.u32 2147483648, %v7743_v33  ;;  %v7761_v0 = vadd.f32 1.0, %v5533_v16 }
 0x23d   : > { %v5537_v20 = vpop.eup %5536  ;;  %v2687_v11 = vmul.f32 %v5535_v1, %v7727_v14  ;;  %v2785_v6 = vand.u32 2147483647, %v7745_v28  ;;  %v2787_v3 = vand.u32 2147483648, %v7745_v28  ;;  %5544 = vpow2.f32 %v4952_v32 }
 0x23e   : > { %v7763_v4 = vadd.f32 1.0, %v5537_v20  ;;  %v2698_v53 = vor.u32 1.1754944e-38, %v2697_v45  ;;  %5546 = vrcp.f32 %v7761_v0  ;;  %v4950_v21 = vmul.f32 -1.442695, %v806_v61 }
 0x23f   : > { %v2688_v25 = vsub.f32 1.0, %v2687_v11  ;;  %v5539_v18 = vpop.eup %5538  ;;  %v4951_v5 = vmul.f32 -1.442695, %v895_v26  ;;  %vm2692_vm14 = vweird.f32 %v5535_v1  ;;  %vm2736_vm15 = vweird.f32 %v7743_v33 }
 0x240   : > { %5548 = vrcp.f32 %v7763_v4  ;;  %vm7771_vm0 = vcmp.eq.f32.partialorder %v2740_v58, 8.507059e+37  ;;  %v2743_v22 = vor.u32 1.1754944e-38, %v2742_v51  ;;  %vm2781_vm1 = vweird.f32 %v7745_v28  ;;  %vm2693_vm3 = vmor %vm2691_vm12, %vm2692_vm14 }
 0x241   : > { %v5541_v9 = vpop.eup %5540  ;;  %v2689_v35 = vmul.f32 %v5535_v1, %v2688_v25  ;;  %vm7777_vm2 = vcmp.eq.f32.partialorder %v2785_v6, 8.507059e+37  ;;  %v2788_v31 = vor.u32 1.1754944e-38, %v2787_v3  ;;  %v720_v13 = vadd.f32 %v719_v43, %v6600_v47  ;;  %v986_v3 = vpop.f32.mrf.mxu0 }
 0x242   : > { %v5543_v34 = vpop.eup %5542  ;;  %v2732_v29 = vmul.f32 %v5541_v9, %v7743_v33  ;;  %v2755_v39 = vand.u32 2147483647, %v7761_v0  ;;  %v7785_v27 = vadd.f32 1.0, %v5539_v18  ;;  %5550 = vpow2.f32 %v4950_v21 }
 0x243   : > { %v2690_v10 = vadd.f32 %v5535_v1, %v2689_v35  ;;  %v2777_v37 = vmul.f32 %v5543_v34, %v7745_v28  ;;  %v5545_v48 = vpop.eup %5544  ;;  %vm2751_vm4 = vweird.f32 %v7761_v0  ;;  %v2757_v12 = vand.u32 2147483648, %v7761_v0 }
 0x244   : > { %v2733_v42 = vsub.f32 1.0, %v2732_v29  ;;  %5552 = vpow2.f32 %v4951_v5  ;;  %v5547_v15 = vpop.eup %5546  ;;  %vm2737_vm5 = vweird.f32 %v5541_v9  ;;  %vm2766_vm6 = vweird.f32 %v7763_v4 }
 0x245   : > { %v2694_v55 = vsel %vm2693_vm3, %v5535_v1, %v2690_v10  ;;  %v2778_v44 = vsub.f32 1.0, %v2777_v37  ;;  %5554 = vrcp.f32 %v7785_v27  ;;  %vm2782_vm7 = vweird.f32 %v5543_v34  ;;  %vm2738_vm9 = vmor %vm2736_vm15, %vm2737_vm5  ;;  %v724_v10 = vpop.f32.mrf.mxu1 }
 0x246   : > { %v2699_v14 = vsel %vm7755_vm13, %v2698_v53, %v2694_v55  ;;  %v2734_v19 = vmul.f32 %v5541_v9, %v2733_v42  ;;  %v5549_v23 = vpop.eup %5548  ;;  %v2747_v41 = vmul.f32 %v5547_v15, %v7761_v0  ;;  %v4954_v49 = vmul.f32 -1.442695, %v720_v13  ;;  %vm2783_vm10 = vmor %vm2781_vm1, %vm2782_vm7 }
 0x247   : > { %4134 = vst [vmem:[%s6188_s25 + $0x220] sm:$0xff] %v2699_v14  ;;  %v2779_v30 = vmul.f32 %v5543_v34, %v2778_v44  ;;  %vm7795_vm8 = vcmp.eq.f32.partialorder %v2755_v39, 8.507059e+37  ;;  %v2762_v63 = vmul.f32 %v5549_v23, %v7763_v4  ;;  %v2770_v17 = vand.u32 2147483647, %v7763_v4  ;;  %v897_v14 = vpop.f32.mrf.mxu3 }
 0x248   : > { %v2735_v60 = vadd.f32 %v5541_v9, %v2734_v19  ;;  %v2748_v59 = vsub.f32 1.0, %v2747_v41  ;;  %v2758_v7 = vor.u32 1.1754944e-38, %v2757_v12  ;;  %v7803_v24 = vadd.f32 1.0, %v5545_v48  ;;  %v5551_v54 = vpop.eup %5550 }
 0x249   : > { %v2780_v56 = vadd.f32 %v5543_v34, %v2779_v30  ;;  %vm2752_vm11 = vweird.f32 %v5547_v15  ;;  %v2763_v57 = vsub.f32 1.0, %v2762_v63  ;;  %v2772_v16 = vand.u32 2147483648, %v7763_v4 }
 0x24a   : > { %v2739_v8 = vsel %vm2738_vm9, %v5541_v9, %v2735_v60  ;;  %v5553_v62 = vpop.eup %5552  ;;  %v2749_v1 = vmul.f32 %v5547_v15, %v2748_v59  ;;  %5556 = vpow2.f32 %v4954_v49  ;;  %vm2767_vm12 = vweird.f32 %v5549_v23  ;;  %vm2753_vm14 = vmor %vm2751_vm4, %vm2752_vm11 }
 0x24b   : > { %v2744_v33 = vsel %vm7771_vm0, %v2743_v22, %v2739_v8  ;;  %v2784_v32 = vsel %vm2783_vm10, %v5543_v34, %v2780_v56  ;;  %v5555_v45 = vpop.eup %5554  ;;  %v2764_v26 = vmul.f32 %v5549_v23, %v2763_v57  ;;  %5558 = vrcp.f32 %v7803_v24  ;;  %vm2768_vm15 = vmor %vm2766_vm6, %vm2767_vm12 }
 0x24c   : > { %4137 = vst [vmem:[%s6188_s25 + $0x238] sm:$0xff] %v2744_v33  ;;  %v2789_v61 = vsel %vm7777_vm2, %v2788_v31, %v2784_v32  ;;  %v2750_v28 = vadd.f32 %v5547_v15, %v2749_v1  ;;  %vm7815_vm13 = vcmp.eq.f32.partialorder %v2770_v17, 8.507059e+37  ;;  %v2807_v11 = vmul.f32 %v5555_v45, %v7785_v27 }
 0x24d   : > { %4140 = vst [vmem:[%s6188_s25 + $0x250] sm:$0xff] %v2789_v61  ;;  %v2815_v36 = vand.u32 2147483647, %v7785_v27  ;;  %v2765_v58 = vadd.f32 %v5549_v23, %v2764_v26  ;;  %v2817_v51 = vand.u32 2147483648, %v7785_v27  ;;  %v7825_v25 = vadd.f32 1.0, %v5551_v54  ;;  %v810_v26 = vpop.f32.mrf.mxu2 }
 0x24e   : > { %v7827_v6 = vadd.f32 1.0, %v5553_v62  ;;  %v2754_v18 = vsel %vm2753_vm14, %v5547_v15, %v2750_v28  ;;  %v2773_v53 = vor.u32 1.1754944e-38, %v2772_v16  ;;  %v2808_v21 = vsub.f32 1.0, %v2807_v11  ;;  %v988_v16 = vpop.f32.mrf.mxu0 }
 0x24f   : > { %v2860_v5 = vand.u32 2147483647, %v7803_v24  ;;  %v2759_v0 = vsel %vm7795_vm8, %v2758_v7, %v2754_v18  ;;  %v2769_v43 = vsel %vm2768_vm15, %v5549_v23, %v2765_v58  ;;  %v2862_v9 = vand.u32 2147483648, %v7803_v24 }
 0x250   : > { %5560 = vrcp.f32 %v7825_v25  ;;  %v5557_v35 = vpop.eup %5556  ;;  %4138 = vst [vmem:[%s6188_s25 + $0x240] sm:$0xff] %v2759_v0  ;;  %v2774_v34 = vsel %vm7815_vm13, %v2773_v53, %v2769_v43  ;;  %v2809_v4 = vmul.f32 %v5555_v45, %v2808_v21  ;;  %vm2812_vm0 = vweird.f32 %v5555_v45 }
 0x251   : > { %v987_v29 = vadd.f32 %v986_v3, %v6603_v40  ;;  %v5559_v22 = vpop.eup %5558  ;;  %4139 = vst [vmem:[%s6188_s25 + $0x248] sm:$0xff] %v2774_v34  ;;  %vm2811_vm1 = vweird.f32 %v7785_v27  ;;  %vm7842_vm2 = vcmp.eq.f32.partialorder %v2815_v36, 8.507059e+37  ;;  %v2818_v37 = vor.u32 1.1754944e-38, %v2817_v51  ;;  %v899_v34 = vpop.f32.mrf.mxu3 }
 0x252   : > { %5562 = vrcp.f32 %v7827_v6  ;;  %v2810_v50 = vadd.f32 %v5555_v45, %v2809_v4  ;;  %v2852_v31 = vmul.f32 %v5559_v22, %v7803_v24  ;;  %vm2856_vm3 = vweird.f32 %v7803_v24  ;;  %vm2813_vm4 = vmor %vm2811_vm1, %vm2812_vm0 }
 0x253   : > { %v2830_v13 = vand.u32 2147483647, %v7825_v25  ;;  %vm7850_vm5 = vcmp.eq.f32.partialorder %v2860_v5, 8.507059e+37  ;;  %v2863_v39 = vor.u32 1.1754944e-38, %v2862_v9  ;;  %v2832_v27 = vand.u32 2147483648, %v7825_v25 }
 0x254   : > { %v7855_v48 = vadd.f32 1.0, %v5557_v35  ;;  %v2814_v55 = vsel %vm2813_vm4, %v5555_v45, %v2810_v50  ;;  %v2853_v44 = vsub.f32 1.0, %v2852_v31  ;;  %v4957_v12 = vmul.f32 -1.442695, %v987_v29 }
 0x255   : > { %v809_v15 = vadd.f32 %v808_v46, %v6609_v52  ;;  %v2819_v23 = vsel %vm7842_vm2, %v2818_v37, %v2814_v55  ;;  %vm2826_vm6 = vweird.f32 %v7825_v25  ;;  %v2845_v30 = vand.u32 2147483647, %v7827_v6 }
 0x256   : > { %v5561_v19 = vpop.eup %5560  ;;  %5564 = vrcp.f32 %v7855_v48  ;;  %4142 = vst [vmem:[%s6188_s25 + $0x260] sm:$0xff] %v2819_v23  ;;  %v2854_v41 = vmul.f32 %v5559_v22, %v2853_v44  ;;  %vm2857_vm7 = vweird.f32 %v5559_v22  ;;  %vm7865_vm8 = vcmp.eq.f32.partialorder %v2830_v13, 8.507059e+37 }
 0x257   : > { %v2822_v49 = vmul.f32 %v5561_v19, %v7825_v25  ;;  %vm2841_vm9 = vweird.f32 %v7827_v6  ;;  %v2847_v17 = vand.u32 2147483648, %v7827_v6  ;;  %5566 = vpow2.f32 %v4957_v12  ;;  %vm2858_vm10 = vmor %vm2856_vm3, %vm2857_vm7 }
 0x258   : > { %v5563_v63 = vpop.eup %5562  ;;  %v4955_v56 = vmul.f32 -1.442695, %v809_v15  ;;  %v898_v59 = vadd.f32 %v897_v14, %v6649_v38  ;;  %v2855_v7 = vadd.f32 %v5559_v22, %v2854_v41  ;;  %v2833_v8 = vor.u32 1.1754944e-38, %v2832_v27 }
 0x259   : > { %v2823_v54 = vsub.f32 1.0, %v2822_v49  ;;  %v2837_v57 = vmul.f32 %v5563_v63, %v7827_v6  ;;  %vm2827_vm11 = vweird.f32 %v5561_v19  ;;  %vm7876_vm12 = vcmp.eq.f32.partialorder %v2845_v30, 8.507059e+37 }
 0x25a   : > { %5568 = vpow2.f32 %v4955_v56  ;;  %v4956_v33 = vmul.f32 -1.442695, %v898_v59  ;;  %v2859_v32 = vsel %vm2858_vm10, %v5559_v22, %v2855_v7  ;;  %v722_v61 = vadd.f32 %v721_v2, %v6600_v47  ;;  %vm2828_vm14 = vmor %vm2826_vm6, %vm2827_vm11 }
 0x25b   : > { %v2824_v1 = vmul.f32 %v5561_v19, %v2823_v54  ;;  %v2838_v45 = vsub.f32 1.0, %v2837_v57  ;;  %v2864_v20 = vsel %vm7850_vm5, %v2863_v39, %v2859_v32  ;;  %v2848_v24 = vor.u32 1.1754944e-38, %v2847_v17 }
 0x25c   : > { %v5565_v28 = vpop.eup %5564  ;;  %5570 = vpow2.f32 %v4956_v33  ;;  %v989_v11 = vadd.f32 %v988_v16, %v6603_v40  ;;  %4145 = vst [vmem:[%s6188_s25 + $0x278] sm:$0xff] %v2864_v20  ;;  %vm2842_vm13 = vweird.f32 %v5563_v63  ;;  %v2892_v18 = vand.u32 2147483648, %v7855_v48 }
 0x25d   : > { %v2825_v36 = vadd.f32 %v5561_v19, %v2824_v1  ;;  %v2839_v58 = vmul.f32 %v5563_v63, %v2838_v45  ;;  %v2882_v51 = vmul.f32 %v5565_v28, %v7855_v48  ;;  %v5567_v3 = vpop.eup %5566  ;;  %v4959_v53 = vmul.f32 -1.442695, %v722_v61  ;;  %vm2843_vm15 = vmor %vm2841_vm9, %vm2842_vm13 }
 0x25e   : > { %v4962_v21 = vmul.f32 -1.442695, %v989_v11  ;;  %v811_v5 = vadd.f32 %v810_v26, %v6609_v52  ;;  %v7891_v35 = vadd.f32 1.0, %v5567_v3  ;;  %vm2886_vm0 = vweird.f32 %v7855_v48  ;;  %v991_v26 = vpop.f32.mrf.mxu0 }
 0x25f   : > { %v2829_v0 = vsel %vm2828_vm14, %v5561_v19, %v2825_v36  ;;  %v2840_v43 = vadd.f32 %v5563_v63, %v2839_v58  ;;  %v2883_v9 = vsub.f32 1.0, %v2882_v51  ;;  %v2890_v25 = vand.u32 2147483647, %v7855_v48 }
 0x260   : > { %v5569_v4 = vpop.eup %5568  ;;  %v2834_v29 = vsel %vm7865_vm8, %v2833_v8, %v2829_v0  ;;  %5572 = vpow2.f32 %v4959_v53  ;;  %vm2887_vm1 = vweird.f32 %v5565_v28  ;;  %v2893_v31 = vor.u32 1.1754944e-38, %v2892_v18 }
 0x261   : > { %4143 = vst [vmem:[%s6188_s25 + $0x268] sm:$0xff] %v2834_v29  ;;  %v2844_v46 = vsel %vm2843_vm15, %v5563_v63, %v2840_v43  ;;  %v2884_v22 = vmul.f32 %v5565_v28, %v2883_v9  ;;  %5574 = vrcp.f32 %v7891_v35  ;;  %v7904_v6 = vadd.f32 1.0, %v5569_v4  ;;  %vm2888_vm2 = vmor %vm2886_vm0, %vm2887_vm1 }
 0x262   : > { %v5571_v37 = vpop.eup %5570  ;;  %v2849_v50 = vsel %vm7876_vm12, %v2848_v24, %v2844_v46  ;;  %v900_v13 = vadd.f32 %v899_v34, %v6649_v38  ;;  %5576 = vpow2.f32 %v4962_v21  ;;  %v4960_v27 = vmul.f32 -1.442695, %v811_v5 }
 0x263   : > { %4144 = vst [vmem:[%s6188_s25 + $0x270] sm:$0xff] %v2849_v50  ;;  %v2885_v42 = vadd.f32 %v5565_v28, %v2884_v22  ;;  %v7908_v39 = vadd.f32 1.0, %v5571_v37  ;;  %v2935_v55 = vand.u32 2147483647, %v7891_v35  ;;  %v2937_v44 = vand.u32 2147483648, %v7891_v35  ;;  %v813_v50 = vpop.f32.mrf.mxu2 }
 0x264   : > { %5578 = vrcp.f32 %v7904_v6  ;;  %v725_v12 = vadd.f32 %v724_v10, %v6600_v47  ;;  %vm2891_vm3 = vcmp.eq.f32.partialorder %v2890_v25, 8.507059e+37  ;;  %vm2931_vm4 = vweird.f32 %v7891_v35 }
 0x265   : > { %v2889_v15 = vsel %vm2888_vm2, %v5565_v28, %v2885_v42  ;;  %5580 = vrcp.f32 %v7908_v39  ;;  %v4961_v23 = vmul.f32 -1.442695, %v900_v13  ;;  %v2905_v48 = vand.u32 2147483647, %v7904_v6 }
 0x266   : > { %v5573_v14 = vpop.eup %5572  ;;  %v2894_v19 = vsel %vm2891_vm3, %v2893_v31, %v2889_v15  ;;  %v2907_v41 = vand.u32 2147483648, %v7904_v6  ;;  %5582 = vpow2.f32 %v4960_v27  ;;  %vm7924_vm5 = vcmp.eq.f32.partialorder %v2935_v55, 8.507059e+37  ;;  %v993_v24 = vpop.f32.mrf.mxu0 }
 0x267   : > { %v5575_v30 = vpop.eup %5574  ;;  %4147 = vst [vmem:[%s6188_s25 + $0x288] sm:$0xff] %v2894_v19  ;;  %v7921_v49 = vadd.f32 1.0, %v5573_v14  ;;  %v2938_v63 = vor.u32 1.1754944e-38, %v2937_v44  ;;  %v4964_v17 = vmul.f32 -1.442695, %v725_v12  ;;  %vm2901_vm6 = vweird.f32 %v7904_v6 }
 0x268   : > { %v2927_v60 = vmul.f32 %v5575_v30, %v7891_v35  ;;  %v5577_v56 = vpop.eup %5576  ;;  %v2920_v59 = vand.u32 2147483647, %v7908_v39  ;;  %v2922_v7 = vand.u32 2147483648, %v7908_v39  ;;  %vm2916_vm7 = vweird.f32 %v7908_v39 }
 0x269   : > { %5584 = vrcp.f32 %v7921_v49  ;;  %v7933_v57 = vadd.f32 1.0, %v5577_v56  ;;  %vm2932_vm8 = vweird.f32 %v5575_v30  ;;  %vm7936_vm9 = vcmp.eq.f32.partialorder %v2905_v48, 8.507059e+37 }
 0x26a   : > { %v5579_v54 = vpop.eup %5578  ;;  %v2928_v8 = vsub.f32 1.0, %v2927_v60  ;;  %5586 = vpow2.f32 %v4961_v23  ;;  %v2908_v32 = vor.u32 1.1754944e-38, %v2907_v41  ;;  %v2965_v61 = vand.u32 2147483647, %v7921_v49  ;;  %vm2933_vm11 = vmor %vm2931_vm4, %vm2932_vm8 }
 0x26b   : > { %v5581_v16 = vpop.eup %5580  ;;  %v2897_v62 = vmul.f32 %v5579_v54, %v7904_v6  ;;  %5588 = vrcp.f32 %v7933_v57  ;;  %vm7943_vm10 = vcmp.eq.f32.partialorder %v2920_v59, 8.507059e+37  ;;  %v2923_v11 = vor.u32 1.1754944e-38, %v2922_v7  ;;  %v726_v7 = vpop.f32.mrf.mxu1 }
 0x26c   : > { %v2929_v1 = vmul.f32 %v5575_v30, %v2928_v8  ;;  %v2912_v45 = vmul.f32 %v5581_v16, %v7908_v39  ;;  %v5583_v28 = vpop.eup %5582  ;;  %v2967_v36 = vand.u32 2147483648, %v7921_v49  ;;  %5590 = vpow2.f32 %v4964_v17 }
 0x26d   : > { %v2898_v20 = vsub.f32 1.0, %v2897_v62  ;;  %v7948_v3 = vadd.f32 1.0, %v5583_v28  ;;  %vm2902_vm12 = vweird.f32 %v5579_v54  ;;  %vm2961_vm13 = vweird.f32 %v7921_v49 }
 0x26e   : > { %v2930_v58 = vadd.f32 %v5575_v30, %v2929_v1  ;;  %v2913_v51 = vsub.f32 1.0, %v2912_v45  ;;  %v992_v21 = vadd.f32 %v991_v26, %v6603_v40  ;;  %vm2917_vm14 = vweird.f32 %v5581_v16  ;;  %vm2903_vm0 = vmor %vm2901_vm6, %vm2902_vm12  ;;  %v996_v17 = vpop.f32.mrf.mxu0 }
 0x26f   : > { %v5585_v18 = vpop.eup %5584  ;;  %v2899_v53 = vmul.f32 %v5579_v54, %v2898_v20  ;;  %vm7956_vm15 = vcmp.eq.f32.partialorder %v2965_v61, 8.507059e+37  ;;  %v2968_v29 = vor.u32 1.1754944e-38, %v2967_v36  ;;  %5592 = vrcp.f32 %v7948_v3  ;;  %vm2918_vm1 = vmor %vm2916_vm7, %vm2917_vm14 }
 0x270   : > { %v5587_v5 = vpop.eup %5586  ;;  %v2934_v0 = vsel %vm2933_vm11, %v5575_v30, %v2930_v58  ;;  %v2914_v43 = vmul.f32 %v5581_v16, %v2913_v51  ;;  %v2957_v9 = vmul.f32 %v5585_v18, %v7921_v49  ;;  %v3010_v10 = vand.u32 2147483647, %v7933_v57  ;;  %v902_v30 = vpop.f32.mrf.mxu3 }
 0x271   : > { %v2939_v35 = vsel %vm7924_vm5, %v2938_v63, %v2934_v0  ;;  %v2900_v4 = vadd.f32 %v5579_v54, %v2899_v53  ;;  %v5589_v25 = vpop.eup %5588  ;;  %v3012_v37 = vand.u32 2147483648, %v7933_v57  ;;  %v7973_v42 = vadd.f32 1.0, %v5587_v5 }
 0x272   : > { %4150 = vst [vmem:[%s6188_s25 + $0x2a0] sm:$0xff] %v2939_v35  ;;  %v2915_v46 = vadd.f32 %v5581_v16, %v2914_v43  ;;  %v2958_v22 = vsub.f32 1.0, %v2957_v9  ;;  %v3002_v13 = vmul.f32 %v5589_v25, %v7933_v57  ;;  %v4967_v6 = vmul.f32 -1.442695, %v992_v21  ;;  %v5591_v27 = vpop.eup %5590 }
 0x273   : > { %v2904_v31 = vsel %vm2903_vm0, %v5579_v54, %v2900_v4  ;;  %vm2962_vm2 = vweird.f32 %v5585_v18  ;;  %vm3006_vm3 = vweird.f32 %v7933_v57  ;;  %5594 = vrcp.f32 %v7973_v42 }
 0x274   : > { %v2909_v55 = vsel %vm7936_vm9, %v2908_v32, %v2904_v31  ;;  %v2919_v44 = vsel %vm2918_vm1, %v5581_v16, %v2915_v46  ;;  %v2959_v12 = vmul.f32 %v5585_v18, %v2958_v22  ;;  %v3003_v14 = vsub.f32 1.0, %v3002_v13  ;;  %vm2963_vm5 = vmor %vm2961_vm13, %vm2962_vm2 }
 0x275   : > { %4148 = vst [vmem:[%s6188_s25 + $0x290] sm:$0xff] %v2909_v55  ;;  %v2924_v15 = vsel %vm7943_vm10, %v2923_v11, %v2919_v44  ;;  %vm3007_vm4 = vweird.f32 %v5589_v25  ;;  %v2980_v19 = vand.u32 2147483647, %v7948_v3  ;;  %v2982_v23 = vand.u32 2147483648, %v7948_v3  ;;  %v5593_v48 = vpop.eup %5592  ;;  %v815_v11 = vpop.f32.mrf.mxu2 }
 0x276   : > { %4149 = vst [vmem:[%s6188_s25 + $0x298] sm:$0xff] %v2924_v15  ;;  %v2960_v39 = vadd.f32 %v5585_v18, %v2959_v12  ;;  %v3004_v41 = vmul.f32 %v5589_v25, %v3003_v14  ;;  %v7987_v60 = vadd.f32 1.0, %v5591_v27  ;;  %5596 = vpow2.f32 %v4967_v6  ;;  %vm3008_vm8 = vmor %vm3006_vm3, %vm3007_vm4  ;;  %v729_v15 = vpop.f32.mrf.mxu1 }
 0x277   : > { %v814_v2 = vadd.f32 %v813_v50, %v6609_v52  ;;  %vm7990_vm6 = vcmp.eq.f32.partialorder %v3010_v10, 8.507059e+37  ;;  %v3013_v56 = vor.u32 1.1754944e-38, %v3012_v37  ;;  %v2972_v59 = vmul.f32 %v5593_v48, %v7948_v3 }
 0x278   : > { %v2964_v63 = vsel %vm2963_vm5, %v5585_v18, %v2960_v39  ;;  %v3005_v49 = vadd.f32 %v5589_v25, %v3004_v41  ;;  %vm2976_vm7 = vweird.f32 %v7948_v3  ;;  %5598 = vrcp.f32 %v7987_v60 }
 0x279   : > { %v2969_v54 = vsel %vm7956_vm15, %v2968_v29, %v2964_v63  ;;  %v2973_v8 = vsub.f32 1.0, %v2972_v59  ;;  %vm8003_vm9 = vcmp.eq.f32.partialorder %v2980_v19, 8.507059e+37  ;;  %v2983_v62 = vor.u32 1.1754944e-38, %v2982_v23  ;;  %v5595_v32 = vpop.eup %5594 }
 0x27a   : > { %4152 = vst [vmem:[%s6188_s25 + $0x2b0] sm:$0xff] %v2969_v54  ;;  %v2995_v33 = vand.u32 2147483647, %v7973_v42  ;;  %v3009_v1 = vsel %vm3008_vm8, %v5589_v25, %v3005_v49  ;;  %v4965_v45 = vmul.f32 -1.442695, %v814_v2  ;;  %v903_v61 = vadd.f32 %v902_v30, %v6649_v38  ;;  %v904_v25 = vpop.f32.mrf.mxu3 }
 0x27b   : > { %v727_v26 = vadd.f32 %v726_v7, %v6600_v47  ;;  %v3014_v57 = vsel %vm7990_vm6, %v3013_v56, %v3009_v1  ;;  %v2974_v28 = vmul.f32 %v5593_v48, %v2973_v8  ;;  %vm2977_vm10 = vweird.f32 %v5593_v48 }
 0x27c   : > { %v2987_v20 = vmul.f32 %v5595_v32, %v7973_v42  ;;  %v5597_v36 = vpop.eup %5596  ;;  %4155 = vst [vmem:[%s6188_s25 + $0x2c8] sm:$0xff] %v3014_v57  ;;  %vm2991_vm11 = vweird.f32 %v7973_v42  ;;  %v2997_v58 = vand.u32 2147483648, %v7973_v42  ;;  %5600 = vpow2.f32 %v4965_v45  ;;  %vm2978_vm12 = vmor %vm2976_vm7, %vm2977_vm10 }
 0x27d   : > { %v4966_v51 = vmul.f32 -1.442695, %v903_v61  ;;  %v2975_v18 = vadd.f32 %v5593_v48, %v2974_v28  ;;  %v8016_v21 = vadd.f32 1.0, %v5597_v36  ;;  %v4969_v5 = vmul.f32 -1.442695, %v727_v26  ;;  %v818_v28 = vpop.f32.mrf.mxu2 }
 0x27e   : > { %v2988_v53 = vsub.f32 1.0, %v2987_v20  ;;  %v5599_v0 = vpop.eup %5598  ;;  %vm8021_vm13 = vcmp.eq.f32.partialorder %v2995_v33, 8.507059e+37  ;;  %v994_v9 = vadd.f32 %v993_v24, %v6603_v40  ;;  %v816_v34 = vadd.f32 %v815_v11, %v6609_v52 }
 0x27f   : > { %5602 = vpow2.f32 %v4966_v51  ;;  %v2979_v35 = vsel %vm2978_vm12, %v5593_v48, %v2975_v18  ;;  %vm2992_vm14 = vweird.f32 %v5595_v32  ;;  %v3032_v29 = vmul.f32 %v5599_v0, %v7987_v60 }
 0x280   : > { %v2989_v4 = vmul.f32 %v5595_v32, %v2988_v53  ;;  %v2984_v46 = vsel %vm8003_vm9, %v2983_v62, %v2979_v35  ;;  %v2998_v3 = vor.u32 1.1754944e-38, %v2997_v58  ;;  %v3042_v22 = vand.u32 2147483648, %v7987_v60  ;;  %vm2993_vm0 = vmor %vm2991_vm11, %vm2992_vm14 }
 0x281   : > { %5604 = vrcp.f32 %v8016_v21  ;;  %4153 = vst [vmem:[%s6188_s25 + $0x2b8] sm:$0xff] %v2984_v46  ;;  %v3033_v37 = vsub.f32 1.0, %v3032_v29  ;;  %vm3036_vm15 = vweird.f32 %v7987_v60  ;;  %v3040_v31 = vand.u32 2147483647, %v7987_v60 }
 0x282   : > { %v2990_v10 = vadd.f32 %v5595_v32, %v2989_v4  ;;  %5606 = vpow2.f32 %v4969_v5  ;;  %v5601_v50 = vpop.eup %5600  ;;  %v4972_v13 = vmul.f32 -1.442695, %v994_v9  ;;  %v4970_v6 = vmul.f32 -1.442695, %v816_v34  ;;  %v907_v51 = vpop.f32.mrf.mxu3 }
 0x283   : > { %v905_v27 = vadd.f32 %v904_v25, %v6649_v38  ;;  %v3034_v44 = vmul.f32 %v5599_v0, %v3033_v37  ;;  %vm3037_vm1 = vweird.f32 %v5599_v0  ;;  %v8038_v12 = vadd.f32 1.0, %v5601_v50 }
 0x284   : > { %v2994_v55 = vsel %vm2993_vm0, %v5595_v32, %v2990_v10  ;;  %v3043_v19 = vor.u32 1.1754944e-38, %v3042_v22  ;;  %5608 = vpow2.f32 %v4972_v13  ;;  %v3085_v23 = vand.u32 2147483647, %v8016_v21  ;;  %vm3038_vm2 = vmor %vm3036_vm15, %vm3037_vm1 }
 0x285   : > { %v5603_v14 = vpop.eup %5602  ;;  %v2999_v39 = vsel %vm8021_vm13, %v2998_v3, %v2994_v55  ;;  %v3035_v42 = vadd.f32 %v5599_v0, %v3034_v44  ;;  %v3087_v30 = vand.u32 2147483648, %v8016_v21  ;;  %5610 = vrcp.f32 %v8038_v12 }
 0x286   : > { %4154 = vst [vmem:[%s6188_s25 + $0x2c0] sm:$0xff] %v2999_v39  ;;  %v8048_v41 = vadd.f32 1.0, %v5603_v14  ;;  %5612 = vpow2.f32 %v4970_v6  ;;  %v4971_v2 = vmul.f32 -1.442695, %v905_v27  ;;  %v730_v63 = vadd.f32 %v729_v15, %v6600_v47 }
 0x287   : > { %v5605_v48 = vpop.eup %5604  ;;  %v3039_v59 = vsel %vm3038_vm2, %v5599_v0, %v3035_v42  ;;  %vm3041_vm3 = vcmp.eq.f32.partialorder %v3040_v31, 8.507059e+37  ;;  %vm3081_vm4 = vweird.f32 %v8016_v21  ;;  %v3055_v49 = vand.u32 2147483647, %v8038_v12 }
 0x288   : > { %v5607_v56 = vpop.eup %5606  ;;  %v3077_v7 = vmul.f32 %v5605_v48, %v8016_v21  ;;  %v3044_v54 = vsel %vm3041_vm3, %v3043_v19, %v3039_v59  ;;  %v3057_v60 = vand.u32 2147483648, %v8038_v12  ;;  %5614 = vrcp.f32 %v8048_v41 }
 0x289   : > { %4157 = vst [vmem:[%s6188_s25 + $0x2d8] sm:$0xff] %v3044_v54  ;;  %vm8057_vm5 = vcmp.eq.f32.partialorder %v3085_v23, 8.507059e+37  ;;  %v8061_v62 = vadd.f32 1.0, %v5607_v56  ;;  %v997_v33 = vadd.f32 %v996_v17, %v6603_v40  ;;  %v3088_v1 = vor.u32 1.1754944e-38, %v3087_v30 }
 0x28a   : > { %v3078_v8 = vsub.f32 1.0, %v3077_v7  ;;  %v5609_v32 = vpop.eup %5608  ;;  %vm3051_vm6 = vweird.f32 %v8038_v12  ;;  %5616 = vpow2.f32 %v4971_v2  ;;  %v4974_v45 = vmul.f32 -1.442695, %v730_v63 }
 0x28b   : > { %v5611_v61 = vpop.eup %5610  ;;  %vm3082_vm7 = vweird.f32 %v5605_v48  ;;  %v3070_v57 = vand.u32 2147483647, %v8048_v41  ;;  %5618 = vrcp.f32 %v8061_v62  ;;  %vm8068_vm8 = vcmp.eq.f32.partialorder %v3055_v49, 8.507059e+37 }
 0x28c   : > { %v3079_v26 = vmul.f32 %v5605_v48, %v3078_v8  ;;  %v5613_v20 = vpop.eup %5612  ;;  %v3047_v24 = vmul.f32 %v5611_v61, %v8038_v12  ;;  %v3058_v36 = vor.u32 1.1754944e-38, %v3057_v60  ;;  %v3072_v58 = vand.u32 2147483648, %v8048_v41  ;;  %vm3083_vm10 = vmor %vm3081_vm4, %vm3082_vm7 }
 0x28d   : > { %vm3066_vm9 = vweird.f32 %v8048_v41  ;;  %v8074_v53 = vadd.f32 1.0, %v5609_v32  ;;  %v8076_v5 = vadd.f32 1.0, %v5613_v20  ;;  %v8078_v0 = vmul.f32 -1.442695, %v997_v33 }
 0x28e   : > { %v3080_v18 = vadd.f32 %v5605_v48, %v3079_v26  ;;  %v5615_v43 = vpop.eup %5614  ;;  %v3048_v9 = vsub.f32 1.0, %v3047_v24  ;;  %v3115_v34 = vand.u32 2147483647, %v8061_v62  ;;  %5620 = vpow2.f32 %v4974_v45  ;;  %v998_v24 = vpop.f32.mrf.mxu0 }
 0x28f   : > { %v819_v35 = vadd.f32 %v818_v28, %v6609_v52  ;;  %v3062_v29 = vmul.f32 %v5615_v43, %v8048_v41  ;;  %vm8086_vm11 = vcmp.eq.f32.partialorder %v3070_v57, 8.507059e+37  ;;  %v8091_v46 = vadd.f32 %v907_v51, %v6649_v38  ;;  %v820_v51 = vpop.f32.mrf.mxu2 }
 0x290   : > { %v3084_v4 = vsel %vm3083_vm10, %v5605_v48, %v3080_v18  ;;  %v5617_v3 = vpop.eup %5616  ;;  %v3049_v22 = vmul.f32 %v5611_v61, %v3048_v9  ;;  %vm3052_vm12 = vweird.f32 %v5611_v61  ;;  %5622 = vrcp.f32 %v8074_v53 }
 0x291   : > { %v3089_v21 = vsel %vm8057_vm5, %v3088_v1, %v3084_v4  ;;  %v5619_v10 = vpop.eup %5618  ;;  %v3063_v37 = vsub.f32 1.0, %v3062_v29  ;;  %v3073_v50 = vor.u32 1.1754944e-38, %v3072_v58  ;;  %vm3111_vm13 = vweird.f32 %v8061_v62  ;;  %vm3053_vm15 = vmor %vm3051_vm6, %vm3052_vm12  ;;  %v731_v1 = vpop.f32.mrf.mxu1 }
 0x292   : > { %4160 = vst [vmem:[%s6188_s25 + $0x2f0] sm:$0xff] %v3089_v21  ;;  %5624 = vrcp.f32 %v8076_v5  ;;  %v3050_v31 = vadd.f32 %v5611_v61, %v3049_v22  ;;  %v3107_v13 = vmul.f32 %v5619_v10, %v8061_v62  ;;  %vm8100_vm14 = vcmp.eq.f32.partialorder %v3115_v34, 8.507059e+37 }
 0x293   : > { %v3117_v27 = vand.u32 2147483648, %v8061_v62  ;;  %v3064_v55 = vmul.f32 %v5615_v43, %v3063_v37  ;;  %vm3067_vm0 = vweird.f32 %v5615_v43  ;;  %v3160_v44 = vand.u32 2147483647, %v8074_v53 }
 0x294   : > { %v4975_v15 = vmul.f32 -1.442695, %v819_v35  ;;  %v5621_v14 = vpop.eup %5620  ;;  %v3054_v39 = vsel %vm3053_vm15, %v5611_v61, %v3050_v31  ;;  %v3108_v19 = vsub.f32 1.0, %v3107_v13  ;;  %v3162_v42 = vand.u32 2147483648, %v8074_v53  ;;  %vm3068_vm2 = vmor %vm3066_vm9, %vm3067_vm0 }
 0x295   : > { %v8109_v23 = vadd.f32 1.0, %v5617_v3  ;;  %v3059_v30 = vsel %vm8068_vm8, %v3058_v36, %v3054_v39  ;;  %v3065_v48 = vadd.f32 %v5615_v43, %v3064_v55  ;;  %vm3112_vm1 = vweird.f32 %v5619_v10 }
 0x296   : > { %v8113_v12 = vadd.f32 1.0, %v5621_v14  ;;  %v5623_v2 = vpop.eup %5622  ;;  %4158 = vst [vmem:[%s6188_s25 + $0x2e0] sm:$0xff] %v3059_v30  ;;  %v3109_v63 = vmul.f32 %v5619_v10, %v3108_v19  ;;  %v3130_v17 = vand.u32 2147483647, %v8076_v5  ;;  %v3132_v56 = vand.u32 2147483648, %v8076_v5  ;;  %vm3113_vm5 = vmor %vm3111_vm13, %vm3112_vm1 }
 0x297   : > { %5626 = vrcp.f32 %v8109_v23  ;;  %v3069_v7 = vsel %vm3068_vm2, %v5615_v43, %v3065_v48  ;;  %v3118_v54 = vor.u32 1.1754944e-38, %v3117_v27  ;;  %v3152_v49 = vmul.f32 %v5623_v2, %v8074_v53 }
 0x298   : > { %v5625_v59 = vpop.eup %5624  ;;  %vm3156_vm3 = vweird.f32 %v8074_v53  ;;  %v3074_v60 = vsel %vm8086_vm11, %v3073_v50, %v3069_v7  ;;  %v3110_v8 = vadd.f32 %v5619_v10, %v3109_v63  ;;  %vm3126_vm4 = vweird.f32 %v8076_v5  ;;  %v1001_v63 = vpop.f32.mrf.mxu0 }
 0x299   : > { %v3122_v41 = vmul.f32 %v5625_v59, %v8076_v5  ;;  %4159 = vst [vmem:[%s6188_s25 + $0x2e8] sm:$0xff] %v3074_v60  ;;  %v3153_v16 = vsub.f32 1.0, %v3152_v49  ;;  %vm8131_vm6 = vcmp.eq.f32.partialorder %v3160_v44, 8.507059e+37  ;;  %v3163_v32 = vor.u32 1.1754944e-38, %v3162_v42  ;;  %v734_v39 = vpop.f32.mrf.mxu1 }
 0x29a   : > { %5628 = vrcp.f32 %v8113_v12  ;;  %v3114_v45 = vsel %vm3113_vm5, %v5619_v10, %v3110_v8  ;;  %vm8136_vm7 = vcmp.eq.f32.partialorder %v3130_v17, 8.507059e+37  ;;  %v3133_v57 = vor.u32 1.1754944e-38, %v3132_v56  ;;  %v909_v10 = vpop.f32.mrf.mxu3 }
 0x29b   : > { %v3123_v61 = vsub.f32 1.0, %v3122_v41  ;;  %v3119_v62 = vsel %vm8100_vm14, %v3118_v54, %v3114_v45  ;;  %v3154_v28 = vmul.f32 %v5623_v2, %v3153_v16  ;;  %vm3157_vm8 = vweird.f32 %v5623_v2 }
 0x29c   : > { %vm3141_vm9 = vweird.f32 %v8109_v23  ;;  %v3145_v20 = vand.u32 2147483647, %v8109_v23  ;;  %4162 = vst [vmem:[%s6188_s25 + $0x300] sm:$0xff] %v3119_v62  ;;  %vm3127_vm10 = vweird.f32 %v5625_v59  ;;  %5630 = vpow2.f32 %v8078_v0  ;;  %vm3158_vm11 = vmor %vm3156_vm3, %vm3157_vm8 }
 0x29d   : > { %v5627_v11 = vpop.eup %5626  ;;  %v3124_v36 = vmul.f32 %v5625_v59, %v3123_v61  ;;  %v4976_v58 = vmul.f32 -1.442695, %v8091_v46  ;;  %v3155_v18 = vadd.f32 %v5623_v2, %v3154_v28  ;;  %v3147_v9 = vand.u32 2147483648, %v8109_v23  ;;  %vm3128_vm12 = vmor %vm3126_vm4, %vm3127_vm10 }
 0x29e   : > { %v3137_v43 = vmul.f32 %v5627_v11, %v8109_v23  ;;  %v3190_v34 = vand.u32 2147483647, %v8113_v12  ;;  %5632 = vpow2.f32 %v4975_v15  ;;  %v732_v4 = vadd.f32 %v731_v1, %v6600_v47 }
 0x29f   : > { %v3125_v35 = vadd.f32 %v5625_v59, %v3124_v36  ;;  %v999_v0 = vadd.f32 %v998_v24, %v6603_v40  ;;  %v3159_v25 = vsel %vm3158_vm11, %v5623_v2, %v3155_v18  ;;  %5634 = vpow2.f32 %v4976_v58 }
 0x2a0   : > { %v5629_v29 = vpop.eup %5628  ;;  %v3138_v46 = vsub.f32 1.0, %v3137_v43  ;;  %v821_v3 = vadd.f32 %v820_v51, %v6609_v52  ;;  %v3164_v53 = vsel %vm8131_vm6, %v3163_v32, %v3159_v25  ;;  %vm3142_vm13 = vweird.f32 %v5627_v11  ;;  %v1003_v25 = vpop.f32.mrf.mxu0 }
 0x2a1   : > { %v3129_v21 = vsel %vm3128_vm12, %v5625_v59, %v3125_v35  ;;  %v3182_v22 = vmul.f32 %v5629_v29, %v8113_v12  ;;  %4165 = vst [vmem:[%s6188_s25 + $0x318] sm:$0xff] %v3164_v53  ;;  %v4979_v5 = vmul.f32 -1.442695, %v732_v4  ;;  %v4982_v31 = vmul.f32 -1.442695, %v999_v0  ;;  %vm3143_vm15 = vmor %vm3141_vm9, %vm3142_vm13 }
 0x2a2   : > { %v3134_v37 = vsel %vm8136_vm7, %v3133_v57, %v3129_v21  ;;  %v3139_v50 = vmul.f32 %v5627_v11, %v3138_v46  ;;  %v5631_v13 = vpop.eup %5630  ;;  %vm3186_vm14 = vweird.f32 %v8113_v12  ;;  %v3192_v27 = vand.u32 2147483648, %v8113_v12 }
 0x2a3   : > { %4163 = vst [vmem:[%s6188_s25 + $0x308] sm:$0xff] %v3134_v37  ;;  %v3183_v6 = vsub.f32 1.0, %v3182_v22  ;;  %v4980_v55 = vmul.f32 -1.442695, %v821_v3  ;;  %v8168_v15 = vadd.f32 1.0, %v5631_v13  ;;  %5636 = vpow2.f32 %v4979_v5 }
 0x2a4   : > { %v3140_v44 = vadd.f32 %v5627_v11, %v3139_v50  ;;  %v910_v14 = vadd.f32 %v909_v10, %v6649_v38  ;;  %v5633_v19 = vpop.eup %5632  ;;  %v3148_v42 = vor.u32 1.1754944e-38, %v3147_v9  ;;  %vm3187_vm0 = vweird.f32 %v5629_v29 }
 0x2a5   : > { %v3184_v30 = vmul.f32 %v5629_v29, %v3183_v6  ;;  %5638 = vpow2.f32 %v4982_v31  ;;  %v5635_v48 = vpop.eup %5634  ;;  %vm3146_vm1 = vcmp.eq.f32.partialorder %v3145_v20, 8.507059e+37  ;;  %v8175_v59 = vadd.f32 1.0, %v5633_v19  ;;  %vm3188_vm2 = vmor %vm3186_vm14, %vm3187_vm0 }
 0x2a6   : > { %v3144_v2 = vsel %vm3143_vm15, %v5627_v11, %v3140_v44  ;;  %5640 = vrcp.f32 %v8168_v15  ;;  %v735_v7 = vadd.f32 %v734_v39, %v6600_v47  ;;  %v3193_v23 = vor.u32 1.1754944e-38, %v3192_v27 }
 0x2a7   : > { %v3149_v17 = vsel %vm3146_vm1, %v3148_v42, %v3144_v2  ;;  %v3185_v56 = vadd.f32 %v5629_v29, %v3184_v30  ;;  %v8181_v54 = vadd.f32 1.0, %v5635_v48  ;;  %5642 = vpow2.f32 %v4980_v55 }
 0x2a8   : > { %4164 = vst [vmem:[%s6188_s25 + $0x310] sm:$0xff] %v3149_v17  ;;  %v4981_v49 = vmul.f32 -1.442695, %v910_v14  ;;  %vm3191_vm3 = vcmp.eq.f32.partialorder %v3190_v34, 8.507059e+37  ;;  %5644 = vrcp.f32 %v8175_v59  ;;  %v1002_v8 = vadd.f32 %v1001_v63, %v6603_v40  ;;  %v823_v17 = vpop.f32.mrf.mxu2 }
 0x2a9   : > { %v3189_v60 = vsel %vm3188_vm2, %v5629_v29, %v3185_v56  ;;  %v5637_v41 = vpop.eup %5636  ;;  %v3235_v33 = vand.u32 2147483647, %v8168_v15  ;;  %v3237_v32 = vand.u32 2147483648, %v8168_v15  ;;  %5646 = vrcp.f32 %v8181_v54 }
 0x2aa   : > { %v3194_v16 = vsel %vm3191_vm3, %v3193_v23, %v3189_v60  ;;  %v8189_v1 = vadd.f32 1.0, %v5637_v41  ;;  %v4984_v45 = vmul.f32 -1.442695, %v735_v7  ;;  %v3205_v26 = vand.u32 2147483647, %v8175_v59 }
 0x2ab   : > { %v5639_v12 = vpop.eup %5638  ;;  %4167 = vst [vmem:[%s6188_s25 + $0x328] sm:$0xff] %v3194_v16  ;;  %v3207_v57 = vand.u32 2147483648, %v8175_v59  ;;  %5648 = vpow2.f32 %v4981_v49  ;;  %vm3231_vm4 = vweird.f32 %v8168_v15  ;;  %v3220_v20 = vand.u32 2147483647, %v8181_v54  ;;  %v912_v16 = vpop.f32.mrf.mxu3 }
 0x2ac   : > { %v5641_v61 = vpop.eup %5640  ;;  %v8193_v62 = vadd.f32 1.0, %v5639_v12  ;;  %v3222_v24 = vand.u32 2147483648, %v8181_v54  ;;  %vm8199_vm5 = vcmp.eq.f32.partialorder %v3235_v33, 8.507059e+37  ;;  %v3238_v58 = vor.u32 1.1754944e-38, %v3237_v32 }
 0x2ad   : > { %v3227_v28 = vmul.f32 %v5641_v61, %v8168_v15  ;;  %v5643_v11 = vpop.eup %5642  ;;  %5650 = vrcp.f32 %v8189_v1  ;;  %v4987_v51 = vmul.f32 -1.442695, %v1002_v8  ;;  %vm3201_vm6 = vweird.f32 %v8175_v59 }
 0x2ae   : > { %v5645_v18 = vpop.eup %5644  ;;  %vm3216_vm7 = vweird.f32 %v8181_v54  ;;  %5652 = vrcp.f32 %v8193_v62  ;;  %vm3232_vm8 = vweird.f32 %v5641_v61  ;;  %vm8208_vm9 = vcmp.eq.f32.partialorder %v3205_v26, 8.507059e+37 }
 0x2af   : > { %v3228_v43 = vsub.f32 1.0, %v3227_v28  ;;  %v5647_v9 = vpop.eup %5646  ;;  %v3197_v34 = vmul.f32 %v5645_v18, %v8175_v59  ;;  %v3208_v4 = vor.u32 1.1754944e-38, %v3207_v57  ;;  %vm8213_vm10 = vcmp.eq.f32.partialorder %v3220_v20, 8.507059e+37  ;;  %vm3233_vm12 = vmor %vm3231_vm4, %vm3232_vm8 }
 0x2b0   : > { %v3212_v29 = vmul.f32 %v5647_v9, %v8181_v54  ;;  %v3223_v46 = vor.u32 1.1754944e-38, %v3222_v24  ;;  %v3265_v3 = vand.u32 2147483647, %v8189_v1  ;;  %v3267_v22 = vand.u32 2147483648, %v8189_v1 }
 0x2b1   : > { %v3229_v0 = vmul.f32 %v5641_v61, %v3228_v43  ;;  %v5649_v53 = vpop.eup %5648  ;;  %v3198_v21 = vsub.f32 1.0, %v3197_v34  ;;  %v8219_v10 = vadd.f32 1.0, %v5643_v11  ;;  %5654 = vpow2.f32 %v4984_v45 }
 0x2b2   : > { %v3213_v50 = vsub.f32 1.0, %v3212_v29  ;;  %vm3261_vm11 = vweird.f32 %v8189_v1  ;;  %v3310_v5 = vand.u32 2147483647, %v8193_v62  ;;  %5656 = vpow2.f32 %v4987_v51 }
 0x2b3   : > { %v3230_v37 = vadd.f32 %v5641_v61, %v3229_v0  ;;  %v5651_v31 = vpop.eup %5650  ;;  %v3199_v13 = vmul.f32 %v5645_v18, %v3198_v21  ;;  %vm3202_vm13 = vweird.f32 %v5645_v18  ;;  %vm3306_vm14 = vweird.f32 %v8193_v62 }
 0x2b4   : > { %5658 = vrcp.f32 %v8219_v10  ;;  %v8228_v6 = vadd.f32 1.0, %v5649_v53  ;;  %v5653_v27 = vpop.eup %5652  ;;  %v3214_v44 = vmul.f32 %v5647_v9, %v3213_v50  ;;  %vm3217_vm15 = vweird.f32 %v5647_v9  ;;  %vm3203_vm0 = vmor %vm3201_vm6, %vm3202_vm13 }
 0x2b5   : > { %v3234_v55 = vsel %vm3233_vm12, %v5641_v61, %v3230_v37  ;;  %v3257_v14 = vmul.f32 %v5651_v31, %v8189_v1  ;;  %v3200_v15 = vadd.f32 %v5645_v18, %v3199_v13  ;;  %v3302_v19 = vmul.f32 %v5653_v27, %v8193_v62  ;;  %vm3218_vm2 = vmor %vm3216_vm7, %vm3217_vm15  ;;  %v736_v1 = vpop.f32.mrf.mxu1 }
 0x2b6   : > { %v3239_v39 = vsel %vm8199_vm5, %v3238_v58, %v3234_v55  ;;  %v3312_v42 = vand.u32 2147483648, %v8193_v62  ;;  %v3215_v30 = vadd.f32 %v5647_v9, %v3214_v44  ;;  %vm8238_vm1 = vcmp.eq.f32.partialorder %v3265_v3, 8.507059e+37  ;;  %v914_v55 = vpop.f32.mrf.mxu3 }
 0x2b7   : > { %4170 = vst [vmem:[%s6188_s25 + $0x340] sm:$0xff] %v3239_v39  ;;  %v3258_v48 = vsub.f32 1.0, %v3257_v14  ;;  %v3268_v63 = vor.u32 1.1754944e-38, %v3267_v22  ;;  %v5655_v56 = vpop.eup %5654  ;;  %v3204_v7 = vsel %vm3203_vm0, %v5645_v18, %v3200_v15  ;;  %v3303_v23 = vsub.f32 1.0, %v3302_v19  ;;  %v825_v22 = vpop.f32.mrf.mxu2 }
 0x2b8   : > { %vm8245_vm3 = vcmp.eq.f32.partialorder %v3310_v5, 8.507059e+37  ;;  %5660 = vrcp.f32 %v8228_v6  ;;  %v5657_v49 = vpop.eup %5656  ;;  %v3209_v60 = vsel %vm8208_vm9, %v3208_v4, %v3204_v7  ;;  %v3219_v8 = vsel %vm3218_vm2, %v5647_v9, %v3215_v30 }
 0x2b9   : > { %v3259_v41 = vmul.f32 %v5651_v31, %v3258_v48  ;;  %vm3262_vm4 = vweird.f32 %v5651_v31  ;;  %4168 = vst [vmem:[%s6188_s25 + $0x330] sm:$0xff] %v3209_v60  ;;  %v3224_v54 = vsel %vm8213_vm10, %v3223_v46, %v3219_v8  ;;  %v3304_v32 = vmul.f32 %v5653_v27, %v3303_v23 }
 0x2ba   : > { %v5659_v33 = vpop.eup %5658  ;;  %vm3307_vm5 = vweird.f32 %v5653_v27  ;;  %v3313_v12 = vor.u32 1.1754944e-38, %v3312_v42  ;;  %4169 = vst [vmem:[%s6188_s25 + $0x338] sm:$0xff] %v3224_v54  ;;  %vm3276_vm6 = vweird.f32 %v8219_v10  ;;  %v3280_v26 = vand.u32 2147483647, %v8219_v10  ;;  %vm3263_vm7 = vmor %vm3261_vm11, %vm3262_vm4 }
 0x2bb   : > { %v3260_v45 = vadd.f32 %v5651_v31, %v3259_v41  ;;  %v3272_v61 = vmul.f32 %v5659_v33, %v8219_v10  ;;  %v3305_v57 = vadd.f32 %v5653_v27, %v3304_v32  ;;  %v3282_v28 = vand.u32 2147483648, %v8219_v10  ;;  %vm3308_vm8 = vmor %vm3306_vm14, %vm3307_vm5 }
 0x2bc   : > { %v8262_v20 = vadd.f32 1.0, %v5655_v56  ;;  %v8264_v24 = vadd.f32 1.0, %v5657_v49  ;;  %v3295_v58 = vand.u32 2147483647, %v8228_v6  ;;  %v3297_v51 = vand.u32 2147483648, %v8228_v6 }
 0x2bd   : > { %v3264_v11 = vsel %vm3263_vm7, %v5651_v31, %v3260_v45  ;;  %v3273_v36 = vsub.f32 1.0, %v3272_v61  ;;  %v3309_v9 = vsel %vm3308_vm8, %v5653_v27, %v3305_v57  ;;  %v824_v34 = vadd.f32 %v823_v17, %v6609_v52  ;;  %v739_v59 = vpop.f32.mrf.mxu1 }
 0x2be   : > { %v5661_v18 = vpop.eup %5660  ;;  %v3269_v43 = vsel %vm8238_vm1, %v3268_v63, %v3264_v11  ;;  %5662 = vrcp.f32 %v8262_v20  ;;  %v3314_v62 = vsel %vm8245_vm3, %v3313_v12, %v3309_v9  ;;  %vm3277_vm9 = vweird.f32 %v5659_v33  ;;  %v1006_v12 = vpop.f32.mrf.mxu0 }
 0x2bf   : > { %4172 = vst [vmem:[%s6188_s25 + $0x350] sm:$0xff] %v3269_v43  ;;  %v3274_v35 = vmul.f32 %v5659_v33, %v3273_v36  ;;  %v3287_v4 = vmul.f32 %v5661_v18, %v8228_v6  ;;  %vm8279_vm10 = vcmp.eq.f32.partialorder %v3280_v26, 8.507059e+37  ;;  %v3283_v29 = vor.u32 1.1754944e-38, %v3282_v28  ;;  %vm3278_vm13 = vmor %vm3276_vm6, %vm3277_vm9  ;;  %v828_v57 = vpop.f32.mrf.mxu2 }
 0x2c0   : > { %4175 = vst [vmem:[%s6188_s25 + $0x368] sm:$0xff] %v3314_v62  ;;  %vm3291_vm11 = vweird.f32 %v8228_v6  ;;  %5664 = vrcp.f32 %v8264_v24  ;;  %vm8285_vm12 = vcmp.eq.f32.partialorder %v3295_v58, 8.507059e+37  ;;  %v3298_v21 = vor.u32 1.1754944e-38, %v3297_v51 }
 0x2c1   : > { %v3275_v46 = vadd.f32 %v5659_v33, %v3274_v35  ;;  %v3288_v3 = vsub.f32 1.0, %v3287_v4  ;;  %vm3292_vm14 = vweird.f32 %v5661_v18  ;;  %vm3336_vm15 = vweird.f32 %v8262_v20 }
 0x2c2   : > { %v4985_v37 = vmul.f32 -1.442695, %v824_v34  ;;  %v913_v50 = vadd.f32 %v912_v16, %v6649_v38  ;;  %v3340_v13 = vand.u32 2147483647, %v8262_v20  ;;  %v3342_v27 = vand.u32 2147483648, %v8262_v20  ;;  %vm3293_vm1 = vmor %vm3291_vm11, %vm3292_vm14 }
 0x2c3   : > { %v3279_v5 = vsel %vm3278_vm13, %v5659_v33, %v3275_v46  ;;  %v3289_v31 = vmul.f32 %v5661_v18, %v3288_v3  ;;  %v737_v39 = vadd.f32 %v736_v1, %v6600_v47  ;;  %vm3381_vm0 = vweird.f32 %v8264_v24 }
 0x2c4   : > { %v5663_v44 = vpop.eup %5662  ;;  %v3284_v14 = vsel %vm8279_vm10, %v3283_v29, %v3279_v5  ;;  %5666 = vpow2.f32 %v4985_v37  ;;  %v4986_v10 = vmul.f32 -1.442695, %v913_v50  ;;  %v1004_v42 = vadd.f32 %v1003_v25, %v6603_v40 }
 0x2c5   : > { %4173 = vst [vmem:[%s6188_s25 + $0x358] sm:$0xff] %v3284_v14  ;;  %v3290_v15 = vadd.f32 %v5661_v18, %v3289_v31  ;;  %v3332_v19 = vmul.f32 %v5663_v44, %v8262_v20  ;;  %v4989_v48 = vmul.f32 -1.442695, %v737_v39  ;;  %v826_v2 = vadd.f32 %v825_v22, %v6609_v52 }
 0x2c6   : > { %v5665_v30 = vpop.eup %5664  ;;  %5668 = vpow2.f32 %v4986_v10  ;;  %v915_v63 = vadd.f32 %v914_v55, %v6649_v38  ;;  %v3387_v23 = vand.u32 2147483648, %v8264_v24  ;;  %v4992_v60 = vmul.f32 -1.442695, %v1004_v42 }
 0x2c7   : > { %v3294_v17 = vsel %vm3293_vm1, %v5661_v18, %v3290_v15  ;;  %v3333_v56 = vsub.f32 1.0, %v3332_v19  ;;  %v3377_v7 = vmul.f32 %v5665_v30, %v8264_v24  ;;  %5670 = vpow2.f32 %v4989_v48  ;;  %v917_v18 = vpop.f32.mrf.mxu3 }
 0x2c8   : > { %v3299_v49 = vsel %vm8285_vm12, %v3298_v21, %v3294_v17  ;;  %v4990_v6 = vmul.f32 -1.442695, %v826_v2  ;;  %vm3337_vm2 = vweird.f32 %v5663_v44  ;;  %v4991_v16 = vmul.f32 -1.442695, %v915_v63 }
 0x2c9   : > { %4174 = vst [vmem:[%s6188_s25 + $0x360] sm:$0xff] %v3299_v49  ;;  %v3334_v8 = vmul.f32 %v5663_v44, %v3333_v56  ;;  %v3378_v41 = vsub.f32 1.0, %v3377_v7  ;;  %vm3382_vm3 = vweird.f32 %v5665_v30  ;;  %v3385_v54 = vand.u32 2147483647, %v8264_v24  ;;  %vm3338_vm4 = vmor %vm3336_vm15, %vm3337_vm2 }
 0x2ca   : > { %v5667_v33 = vpop.eup %5666  ;;  %5672 = vpow2.f32 %v4992_v60  ;;  %v740_v32 = vadd.f32 %v739_v59, %v6600_v47  ;;  %vm3341_vm5 = vcmp.eq.f32.partialorder %v3340_v13, 8.507059e+37  ;;  %v3343_v11 = vor.u32 1.1754944e-38, %v3342_v27  ;;  %vm3383_vm6 = vmor %vm3381_vm0, %vm3382_vm3 }
 0x2cb   : > { %v3335_v45 = vadd.f32 %v5663_v44, %v3334_v8  ;;  %v3379_v61 = vmul.f32 %v5665_v30, %v3378_v41  ;;  %v8314_v26 = vadd.f32 1.0, %v5667_v33  ;;  %5674 = vpow2.f32 %v4990_v6 }
 0x2cc   : > { %v5669_v28 = vpop.eup %5668  ;;  %v3388_v36 = vor.u32 1.1754944e-38, %v3387_v23  ;;  %5676 = vpow2.f32 %v4991_v16  ;;  %v1007_v1 = vadd.f32 %v1006_v12, %v6603_v40  ;;  %v4994_v34 = vmul.f32 -1.442695, %v740_v32 }
 0x2cd   : > { %v3339_v58 = vsel %vm3338_vm4, %v5663_v44, %v3335_v45  ;;  %v3380_v51 = vadd.f32 %v5665_v30, %v3379_v61  ;;  %5678 = vrcp.f32 %v8314_v26  ;;  %v5671_v43 = vpop.eup %5670  ;;  %v8324_v20 = vadd.f32 1.0, %v5669_v28 }
 0x2ce   : > { %v3344_v9 = vsel %vm3341_vm5, %v3343_v11, %v3339_v58  ;;  %v829_v62 = vadd.f32 %v828_v57, %v6609_v52  ;;  %vm3386_vm7 = vcmp.eq.f32.partialorder %v3385_v54, 8.507059e+37  ;;  %v8328_v4 = vadd.f32 1.0, %v5671_v43 }
 0x2cf   : > { %4177 = vst [vmem:[%s6188_s25 + $0x378] sm:$0xff] %v3344_v9  ;;  %v3384_v35 = vsel %vm3383_vm6, %v5665_v30, %v3380_v51  ;;  %v3355_v25 = vand.u32 2147483647, %v8314_v26  ;;  %5680 = vrcp.f32 %v8324_v20  ;;  %v918_v46 = vadd.f32 %v917_v18, %v6649_v38 }
 0x2d0   : > { %v5673_v0 = vpop.eup %5672  ;;  %v3389_v29 = vsel %vm3386_vm7, %v3388_v36, %v3384_v35  ;;  %v3357_v3 = vand.u32 2147483648, %v8314_v26  ;;  %5682 = vrcp.f32 %v8328_v4  ;;  %v4997_v22 = vmul.f32 -1.442695, %v1007_v1 }
 0x2d1   : > { %v5675_v24 = vpop.eup %5674  ;;  %4180 = vst [vmem:[%s6188_s25 + $0x390] sm:$0xff] %v3389_v29  ;;  %v8336_v21 = vadd.f32 1.0, %v5673_v0  ;;  %5684 = vpow2.f32 %v4994_v34  ;;  %v8338_v37 = vmul.f32 -1.442695, %v829_v62  ;;  %vm3351_vm8 = vweird.f32 %v8314_v26 }
 0x2d2   : > { %v5677_v53 = vpop.eup %5676  ;;  %v3370_v5 = vand.u32 2147483647, %v8324_v20  ;;  %v3372_v31 = vand.u32 2147483648, %v8324_v20  ;;  %v8343_v13 = vadd.f32 1.0, %v5675_v24  ;;  %vm8346_vm9 = vcmp.eq.f32.partialorder %v3355_v25, 8.507059e+37 }
 0x2d3   : > { %v5679_v50 = vpop.eup %5678  ;;  %v3415_v44 = vand.u32 2147483647, %v8328_v4  ;;  %v8351_v14 = vmul.f32 -1.442695, %v918_v46  ;;  %v3358_v10 = vor.u32 1.1754944e-38, %v3357_v3  ;;  %v3417_v39 = vand.u32 2147483648, %v8328_v4 }
 0x2d4   : > { %v3347_v27 = vmul.f32 %v5679_v50, %v8314_v26  ;;  %5686 = vrcp.f32 %v8336_v21  ;;  %v8355_v15 = vadd.f32 1.0, %v5677_v53  ;;  %vm3366_vm10 = vweird.f32 %v8324_v20 }
 0x2d5   : > { %v5681_v19 = vpop.eup %5680  ;;  %vm3411_vm11 = vweird.f32 %v8328_v4  ;;  %5688 = vrcp.f32 %v8343_v13  ;;  %vm3352_vm12 = vweird.f32 %v5679_v50  ;;  %vm8361_vm13 = vcmp.eq.f32.partialorder %v3370_v5, 8.507059e+37 }
 0x2d6   : > { %v3348_v42 = vsub.f32 1.0, %v3347_v27  ;;  %v5683_v30 = vpop.eup %5682  ;;  %v3362_v48 = vmul.f32 %v5681_v19, %v8324_v20  ;;  %v3373_v63 = vor.u32 1.1754944e-38, %v3372_v31  ;;  %v3462_v17 = vand.u32 2147483648, %v8336_v21  ;;  %vm3353_vm1 = vmor %vm3351_vm8, %vm3352_vm12  ;;  %v741_v20 = vpop.f32.mrf.mxu1 }
 0x2d7   : > { %v5685_v56 = vpop.eup %5684  ;;  %v3407_v23 = vmul.f32 %v5683_v30, %v8328_v4  ;;  %vm8367_vm14 = vcmp.eq.f32.partialorder %v3415_v44, 8.507059e+37  ;;  %v3460_v49 = vand.u32 2147483647, %v8336_v21  ;;  %v3418_v6 = vor.u32 1.1754944e-38, %v3417_v39 }
 0x2d8   : > { %v3349_v7 = vmul.f32 %v5679_v50, %v3348_v42  ;;  %v3363_v60 = vsub.f32 1.0, %v3362_v48  ;;  %v3430_v8 = vand.u32 2147483647, %v8343_v13  ;;  %5690 = vrcp.f32 %v8355_v15  ;;  %v830_v48 = vpop.f32.mrf.mxu2 }
 0x2d9   : > { %vm3367_vm15 = vweird.f32 %v5681_v19  ;;  %v3408_v16 = vsub.f32 1.0, %v3407_v23  ;;  %vm3456_vm0 = vweird.f32 %v8336_v21  ;;  %v3463_v32 = vor.u32 1.1754944e-38, %v3462_v17  ;;  %v919_v17 = vpop.f32.mrf.mxu3 }
 0x2da   : > { %v3350_v41 = vadd.f32 %v5679_v50, %v3349_v7  ;;  %v5687_v33 = vpop.eup %5686  ;;  %v3364_v54 = vmul.f32 %v5681_v19, %v3363_v60  ;;  %vm3426_vm2 = vweird.f32 %v8343_v13  ;;  %v8379_v12 = vadd.f32 1.0, %v5685_v56  ;;  %vm3368_vm6 = vmor %vm3366_vm10, %vm3367_vm15 }
 0x2db   : > { %5692 = vpow2.f32 %v4997_v22  ;;  %v5689_v45 = vpop.eup %5688  ;;  %v3409_v57 = vmul.f32 %v5683_v30, %v3408_v16  ;;  %vm3412_vm3 = vweird.f32 %v5683_v30  ;;  %v3452_v28 = vmul.f32 %v5687_v33, %v8336_v21 }
 0x2dc   : > { %v3354_v61 = vsel %vm3353_vm1, %v5679_v50, %v3350_v41  ;;  %vm8382_vm4 = vcmp.eq.f32.partialorder %v3460_v49, 8.507059e+37  ;;  %v3365_v36 = vadd.f32 %v5681_v19, %v3364_v54  ;;  %v3422_v58 = vmul.f32 %v5689_v45, %v8343_v13  ;;  %vm3413_vm7 = vmor %vm3411_vm11, %vm3412_vm3 }
 0x2dd   : > { %v3359_v26 = vsel %vm8346_vm9, %v3358_v10, %v3354_v61  ;;  %vm8389_vm5 = vcmp.eq.f32.partialorder %v3430_v8, 8.507059e+37  ;;  %v3410_v1 = vadd.f32 %v5683_v30, %v3409_v57  ;;  %v3453_v18 = vsub.f32 1.0, %v3452_v28 }
 0x2de   : > { %4178 = vst [vmem:[%s6188_s25 + $0x380] sm:$0xff] %v3359_v26  ;;  %v3432_v43 = vand.u32 2147483648, %v8343_v13  ;;  %v3445_v9 = vand.u32 2147483647, %v8355_v15  ;;  %v5691_v34 = vpop.eup %5690  ;;  %v3369_v62 = vsel %vm3368_vm6, %v5681_v19, %v3365_v36  ;;  %vm3457_vm8 = vweird.f32 %v5687_v33  ;;  %v744_v16 = vpop.f32.mrf.mxu1 }
 0x2df   : > { %v3423_v35 = vsub.f32 1.0, %v3422_v58  ;;  %5694 = vrcp.f32 %v8379_v12  ;;  %v3374_v0 = vsel %vm8361_vm13, %v3373_v63, %v3369_v62  ;;  %v3414_v29 = vsel %vm3413_vm7, %v5683_v30, %v3410_v1  ;;  %vm3458_vm11 = vmor %vm3456_vm0, %vm3457_vm8  ;;  %v1008_v30 = vpop.f32.mrf.mxu0 }
 0x2e0   : > { %v3454_v25 = vmul.f32 %v5687_v33, %v3453_v18  ;;  %v3437_v46 = vmul.f32 %v5691_v34, %v8355_v15  ;;  %4179 = vst [vmem:[%s6188_s25 + $0x388] sm:$0xff] %v3374_v0  ;;  %v3419_v3 = vsel %vm8367_vm14, %v3418_v6, %v3414_v29  ;;  %vm3427_vm9 = vweird.f32 %v5689_v45 }
 0x2e1   : > { %v5693_v24 = vpop.eup %5692  ;;  %v3424_v4 = vmul.f32 %v5689_v45, %v3423_v35  ;;  %v3447_v53 = vand.u32 2147483648, %v8355_v15  ;;  %4182 = vst [vmem:[%s6188_s25 + $0x3a0] sm:$0xff] %v3419_v3  ;;  %vm3441_vm10 = vweird.f32 %v8355_v15  ;;  %v3433_v27 = vor.u32 1.1754944e-38, %v3432_v43  ;;  %vm3428_vm12 = vmor %vm3426_vm2, %vm3427_vm9 }
 0x2e2   : > { %v3455_v22 = vadd.f32 %v5687_v33, %v3454_v25  ;;  %v3438_v50 = vsub.f32 1.0, %v3437_v46  ;;  %v8412_v5 = vadd.f32 1.0, %v5693_v24  ;;  %5696 = vpow2.f32 %v8338_v37 }
 0x2e3   : > { %v3425_v31 = vadd.f32 %v5689_v45, %v3424_v4  ;;  %v742_v55 = vadd.f32 %v741_v20, %v6600_v47  ;;  %vm3442_vm13 = vweird.f32 %v5691_v34  ;;  %vm8424_vm14 = vcmp.eq.f32.partialorder %v3445_v9, 8.507059e+37 }
 0x2e4   : > { %v3459_v44 = vsel %vm3458_vm11, %v5687_v33, %v3455_v22  ;;  %v3439_v10 = vmul.f32 %v5691_v34, %v3438_v50  ;;  %5698 = vrcp.f32 %v8412_v5  ;;  %v3448_v37 = vor.u32 1.1754944e-38, %v3447_v53  ;;  %vm3443_vm0 = vmor %vm3441_vm10, %vm3442_vm13 }
 0x2e5   : > { %v5695_v39 = vpop.eup %5694  ;;  %v3464_v21 = vsel %vm8382_vm4, %v3463_v32, %v3459_v44  ;;  %v3429_v19 = vsel %vm3428_vm12, %v5689_v45, %v3425_v31  ;;  %vm3486_vm15 = vweird.f32 %v8379_v12  ;;  %v3490_v56 = vand.u32 2147483647, %v8379_v12 }
 0x2e6   : > { %4185 = vst [vmem:[%s6188_s25 + $0x3b8] sm:$0xff] %v3464_v21  ;;  %v3434_v13 = vsel %vm8389_vm5, %v3433_v27, %v3429_v19  ;;  %v3440_v2 = vadd.f32 %v5691_v34, %v3439_v10  ;;  %v3482_v63 = vmul.f32 %v5695_v39, %v8379_v12  ;;  %v3492_v7 = vand.u32 2147483648, %v8379_v12 }
 0x2e7   : > { %4183 = vst [vmem:[%s6188_s25 + $0x3a8] sm:$0xff] %v3434_v13  ;;  %5700 = vpow2.f32 %v8351_v14  ;;  %v4999_v23 = vmul.f32 -1.442695, %v742_v55  ;;  %v1009_v60 = vadd.f32 %v1008_v30, %v6603_v40  ;;  %v831_v6 = vadd.f32 %v830_v48, %v6609_v52  ;;  %v1011_v46 = vpop.f32.mrf.mxu0  ;;  %v922_v48 = vpop.f32.mrf.mxu3 }
 0x2e8   : > { %v3444_v59 = vsel %vm3443_vm0, %v5691_v34, %v3440_v2  ;;  %v3483_v49 = vsub.f32 1.0, %v3482_v63  ;;  %v5697_v8 = vpop.eup %5696  ;;  %vm3487_vm1 = vweird.f32 %v5695_v39  ;;  %v920_v15 = vadd.f32 %v919_v17, %v6649_v38 }
 0x2e9   : > { %v3449_v41 = vsel %vm8424_vm14, %v3448_v37, %v3444_v59  ;;  %5702 = vpow2.f32 %v4999_v23  ;;  %v8446_v14 = vadd.f32 1.0, %v5697_v8  ;;  %v5002_v32 = vmul.f32 -1.442695, %v1009_v60  ;;  %vm3488_vm4 = vmor %vm3486_vm15, %vm3487_vm1 }
 0x2ea   : > { %v5699_v33 = vpop.eup %5698  ;;  %4184 = vst [vmem:[%s6188_s25 + $0x3b0] sm:$0xff] %v3449_v41  ;;  %v3484_v54 = vmul.f32 %v5695_v39, %v3483_v49  ;;  %v5000_v45 = vmul.f32 -1.442695, %v831_v6  ;;  %vm8448_vm2 = vcmp.eq.f32.partialorder %v3490_v56, 8.507059e+37  ;;  %v3493_v57 = vor.u32 1.1754944e-38, %v3492_v7 }
 0x2eb   : > { %v3527_v28 = vmul.f32 %v5699_v33, %v8412_v5  ;;  %v5001_v11 = vmul.f32 -1.442695, %v920_v15  ;;  %vm3531_vm3 = vweird.f32 %v8412_v5  ;;  %5704 = vrcp.f32 %v8446_v14 }
 0x2ec   : > { %v3485_v26 = vadd.f32 %v5695_v39, %v3484_v54  ;;  %v745_v36 = vadd.f32 %v744_v16, %v6600_v47  ;;  %v3535_v1 = vand.u32 2147483647, %v8412_v5  ;;  %v3537_v18 = vand.u32 2147483648, %v8412_v5  ;;  %v833_v5 = vpop.f32.mrf.mxu2 }
 0x2ed   : > { %v5701_v58 = vpop.eup %5700  ;;  %v3528_v51 = vsub.f32 1.0, %v3527_v28  ;;  %5706 = vpow2.f32 %v5002_v32  ;;  %vm3532_vm5 = vweird.f32 %v5699_v33  ;;  %v3505_v20 = vand.u32 2147483647, %v8446_v14 }
 0x2ee   : > { %v3489_v43 = vsel %vm3488_vm4, %v5695_v39, %v3485_v26  ;;  %v8461_v9 = vadd.f32 1.0, %v5701_v58  ;;  %5708 = vpow2.f32 %v5000_v45  ;;  %v3507_v12 = vand.u32 2147483648, %v8446_v14  ;;  %vm3533_vm6 = vmor %vm3531_vm3, %vm3532_vm5 }
 0x2ef   : > { %v5703_v34 = vpop.eup %5702  ;;  %v3494_v62 = vsel %vm8448_vm2, %v3493_v57, %v3489_v43  ;;  %v3529_v35 = vmul.f32 %v5699_v33, %v3528_v51  ;;  %5710 = vpow2.f32 %v5001_v11  ;;  %v5004_v0 = vmul.f32 -1.442695, %v745_v36 }
 0x2f0   : > { %4187 = vst [vmem:[%s6188_s25 + $0x3c8] sm:$0xff] %v3494_v62  ;;  %5712 = vrcp.f32 %v8461_v9  ;;  %v8469_v25 = vadd.f32 1.0, %v5703_v34  ;;  %vm3536_vm7 = vcmp.eq.f32.partialorder %v3535_v1, 8.507059e+37  ;;  %v3538_v3 = vor.u32 1.1754944e-38, %v3537_v18 }
 0x2f1   : > { %v3530_v29 = vadd.f32 %v5699_v33, %v3529_v35  ;;  %v5705_v24 = vpop.eup %5704  ;;  %vm3501_vm8 = vweird.f32 %v8446_v14  ;;  %v3522_v4 = vand.u32 2147483648, %v8461_v9  ;;  %vm8477_vm9 = vcmp.eq.f32.partialorder %v3505_v20, 8.507059e+37 }
 0x2f2   : > { %v3497_v50 = vmul.f32 %v5705_v24, %v8446_v14  ;;  %v3520_v27 = vand.u32 2147483647, %v8461_v9  ;;  %5714 = vrcp.f32 %v8469_v25  ;;  %v3508_v10 = vor.u32 1.1754944e-38, %v3507_v12 }
 0x2f3   : > { %v5707_v53 = vpop.eup %5706  ;;  %v3534_v22 = vsel %vm3533_vm6, %v5699_v33, %v3530_v29  ;;  %5716 = vpow2.f32 %v5004_v0  ;;  %v1012_v39 = vadd.f32 %v1011_v46, %v6603_v40  ;;  %v3567_v42 = vand.u32 2147483648, %v8469_v25  ;;  %v746_v29 = vpop.f32.mrf.mxu1 }
 0x2f4   : > { %v5709_v55 = vpop.eup %5708  ;;  %v3539_v44 = vsel %vm3536_vm7, %v3538_v3, %v3534_v22  ;;  %v3498_v19 = vsub.f32 1.0, %v3497_v50  ;;  %v8486_v37 = vadd.f32 1.0, %v5707_v53  ;;  %vm3516_vm10 = vweird.f32 %v8461_v9 }
 0x2f5   : > { %v5711_v21 = vpop.eup %5710  ;;  %4190 = vst [vmem:[%s6188_s25 + $0x3e0] sm:$0xff] %v3539_v44  ;;  %v8488_v30 = vadd.f32 1.0, %v5709_v55  ;;  %v3523_v2 = vor.u32 1.1754944e-38, %v3522_v4  ;;  %v3565_v63 = vand.u32 2147483647, %v8469_v25  ;;  %v834_v17 = vadd.f32 %v833_v5, %v6609_v52  ;;  %v1013_v44 = vpop.f32.mrf.mxu0 }
 0x2f6   : > { %v5713_v13 = vpop.eup %5712  ;;  %v3499_v56 = vmul.f32 %v5705_v24, %v3498_v19  ;;  %vm3502_vm11 = vweird.f32 %v5705_v24  ;;  %vm8494_vm12 = vcmp.eq.f32.partialorder %v3520_v27, 8.507059e+37  ;;  %5718 = vrcp.f32 %v8486_v37 }
 0x2f7   : > { %v3512_v7 = vmul.f32 %v5713_v13, %v8461_v9  ;;  %vm3561_vm13 = vweird.f32 %v8469_v25  ;;  %5720 = vrcp.f32 %v8488_v30  ;;  %v8501_v59 = vadd.f32 1.0, %v5711_v21  ;;  %vm3503_vm14 = vmor %vm3501_vm8, %vm3502_vm11 }
 0x2f8   : > { %v8504_v49 = vadd.f32 %v922_v48, %v6649_v38  ;;  %v5715_v60 = vpop.eup %5714  ;;  %v3500_v6 = vadd.f32 %v5705_v24, %v3499_v56  ;;  %v3568_v41 = vor.u32 1.1754944e-38, %v3567_v42  ;;  %v5007_v15 = vmul.f32 -1.442695, %v1012_v39 }
 0x2f9   : > { %v3513_v8 = vsub.f32 1.0, %v3512_v7  ;;  %v5717_v16 = vpop.eup %5716  ;;  %v3557_v33 = vmul.f32 %v5715_v60, %v8469_v25  ;;  %vm8509_vm15 = vcmp.eq.f32.partialorder %v3565_v63, 8.507059e+37  ;;  %v3610_v32 = vand.u32 2147483647, %v8486_v37 }
 0x2fa   : > { %v3612_v45 = vand.u32 2147483648, %v8486_v37  ;;  %v5005_v61 = vmul.f32 -1.442695, %v834_v17  ;;  %v3504_v57 = vsel %vm3503_vm14, %v5705_v24, %v3500_v6  ;;  %vm3517_vm0 = vweird.f32 %v5713_v13 }
 0x2fb   : > { %v3514_v28 = vmul.f32 %v5713_v13, %v3513_v8  ;;  %v3580_v11 = vand.u32 2147483647, %v8488_v30  ;;  %v3509_v14 = vsel %vm8477_vm9, %v3508_v10, %v3504_v57  ;;  %v3558_v26 = vsub.f32 1.0, %v3557_v33  ;;  %vm3518_vm4 = vmor %vm3516_vm10, %vm3517_vm0  ;;  %v835_v10 = vpop.f32.mrf.mxu2 }
 0x2fc   : > { %vm3606_vm1 = vweird.f32 %v8486_v37  ;;  %5722 = vrcp.f32 %v8501_v59  ;;  %v5719_v36 = vpop.eup %5718  ;;  %4188 = vst [vmem:[%s6188_s25 + $0x3d0] sm:$0xff] %v3509_v14  ;;  %vm3562_vm2 = vweird.f32 %v5715_v60  ;;  %vm3576_vm3 = vweird.f32 %v8488_v30 }
 0x2fd   : > { %v3515_v58 = vadd.f32 %v5713_v13, %v3514_v28  ;;  %v3582_v51 = vand.u32 2147483648, %v8488_v30  ;;  %v5721_v1 = vpop.eup %5720  ;;  %v3559_v18 = vmul.f32 %v5715_v60, %v3558_v26  ;;  %v3602_v43 = vmul.f32 %v5719_v36, %v8486_v37  ;;  %vm3563_vm7 = vmor %vm3561_vm13, %vm3562_vm2  ;;  %v1016_v34 = vpop.f32.mrf.mxu0 }
 0x2fe   : > { %vm8526_vm5 = vcmp.eq.f32.partialorder %v3610_v32, 8.507059e+37  ;;  %v3613_v62 = vor.u32 1.1754944e-38, %v3612_v45  ;;  %v8530_v35 = vadd.f32 1.0, %v5717_v16  ;;  %v3572_v12 = vmul.f32 %v5721_v1, %v8488_v30  ;;  %v749_v32 = vpop.f32.mrf.mxu1 }
 0x2ff   : > { %v3519_v20 = vsel %vm3518_vm4, %v5713_v13, %v3515_v58  ;;  %vm8533_vm6 = vcmp.eq.f32.partialorder %v3580_v11, 8.507059e+37  ;;  %v3595_v9 = vand.u32 2147483647, %v8501_v59  ;;  %v3560_v24 = vadd.f32 %v5715_v60, %v3559_v18 }
 0x300   : > { %v3524_v46 = vsel %vm8494_vm12, %v3523_v2, %v3519_v20  ;;  %v3603_v3 = vsub.f32 1.0, %v3602_v43  ;;  %v3597_v4 = vand.u32 2147483648, %v8501_v59  ;;  %v3573_v53 = vsub.f32 1.0, %v3572_v12 }
 0x301   : > { %4189 = vst [vmem:[%s6188_s25 + $0x3d8] sm:$0xff] %v3524_v46  ;;  %v3583_v22 = vor.u32 1.1754944e-38, %v3582_v51  ;;  %vm3591_vm8 = vweird.f32 %v8501_v59  ;;  %5724 = vrcp.f32 %v8530_v35  ;;  %v3564_v31 = vsel %vm3563_vm7, %v5715_v60, %v3560_v24 }
 0x302   : > { %v5723_v50 = vpop.eup %5722  ;;  %v3604_v27 = vmul.f32 %v5719_v36, %v3603_v3  ;;  %vm3607_vm9 = vweird.f32 %v5719_v36  ;;  %5726 = vpow2.f32 %v5007_v15  ;;  %v3569_v5 = vsel %vm8509_vm15, %v3568_v41, %v3564_v31 }
 0x303   : > { %v3574_v55 = vmul.f32 %v5721_v1, %v3573_v53  ;;  %vm3577_vm10 = vweird.f32 %v5721_v1  ;;  %v3587_v25 = vmul.f32 %v5723_v50, %v8501_v59  ;;  %4192 = vst [vmem:[%s6188_s25 + $0x3f0] sm:$0xff] %v3569_v5  ;;  %vm8551_vm11 = vcmp.eq.f32.partialorder %v3595_v9, 8.507059e+37  ;;  %vm3608_vm12 = vmor %vm3606_vm1, %vm3607_vm9  ;;  %v838_v46 = vpop.f32.mrf.mxu2 }
 0x304   : > { %v3605_v39 = vadd.f32 %v5719_v36, %v3604_v27  ;;  %v3598_v19 = vor.u32 1.1754944e-38, %v3597_v4  ;;  %5728 = vpow2.f32 %v5005_v61  ;;  %v5006_v13 = vmul.f32 -1.442695, %v8504_v49  ;;  %vm3578_vm13 = vmor %vm3576_vm3, %vm3577_vm10  ;;  %v924_v49 = vpop.f32.mrf.mxu3 }
 0x305   : > { %v3575_v42 = vadd.f32 %v5721_v1, %v3574_v55  ;;  %v3588_v48 = vsub.f32 1.0, %v3587_v25  ;;  %v747_v2 = vadd.f32 %v746_v29, %v6600_v47  ;;  %vm3592_vm14 = vweird.f32 %v5723_v50 }
 0x306   : > { %v3609_v63 = vsel %vm3608_vm12, %v5719_v36, %v3605_v39  ;;  %v1014_v17 = vadd.f32 %v1013_v44, %v6603_v40  ;;  %v836_v56 = vadd.f32 %v835_v10, %v6609_v52  ;;  %5730 = vpow2.f32 %v5006_v13  ;;  %vm3593_vm0 = vmor %vm3591_vm8, %vm3592_vm14 }
 0x307   : > { %v5725_v37 = vpop.eup %5724  ;;  %v3614_v7 = vsel %vm8526_vm5, %v3613_v62, %v3609_v63  ;;  %v3579_v23 = vsel %vm3578_vm13, %v5721_v1, %v3575_v42  ;;  %v3589_v60 = vmul.f32 %v5723_v50, %v3588_v48  ;;  %vm3636_vm15 = vweird.f32 %v8530_v35 }
 0x308   : > { %v5727_v6 = vpop.eup %5726  ;;  %4195 = vst [vmem:[%s6188_s25 + $0x408] sm:$0xff] %v3614_v7  ;;  %v3584_v30 = vsel %vm8533_vm6, %v3583_v22, %v3579_v23  ;;  %v3632_v8 = vmul.f32 %v5725_v37, %v8530_v35  ;;  %v5009_v41 = vmul.f32 -1.442695, %v747_v2  ;;  %v3640_v16 = vand.u32 2147483647, %v8530_v35 }
 0x309   : > { %4193 = vst [vmem:[%s6188_s25 + $0x3f8] sm:$0xff] %v3584_v30  ;;  %v3590_v15 = vadd.f32 %v5723_v50, %v3589_v60  ;;  %v8573_v33 = vadd.f32 1.0, %v5727_v6  ;;  %v5012_v54 = vmul.f32 -1.442695, %v1014_v17  ;;  %v3642_v57 = vand.u32 2147483648, %v8530_v35 }
 0x30a   : > { %v5729_v45 = vpop.eup %5728  ;;  %v3633_v61 = vsub.f32 1.0, %v3632_v8  ;;  %5732 = vpow2.f32 %v5009_v41  ;;  %v925_v28 = vadd.f32 %v924_v49, %v6649_v38  ;;  %vm3637_vm1 = vweird.f32 %v5725_v37 }
 0x30b   : > { %v3594_v11 = vsel %vm3593_vm0, %v5723_v50, %v3590_v15  ;;  %5734 = vrcp.f32 %v8573_v33  ;;  %v5010_v14 = vmul.f32 -1.442695, %v836_v56  ;;  %v8583_v58 = vadd.f32 1.0, %v5729_v45  ;;  %vm3638_vm2 = vmor %vm3636_vm15, %vm3637_vm1 }
 0x30c   : > { %v3599_v26 = vsel %vm8551_vm11, %v3598_v19, %v3594_v11  ;;  %v3634_v36 = vmul.f32 %v5725_v37, %v3633_v61  ;;  %v750_v59 = vadd.f32 %v749_v32, %v6600_v47  ;;  %v5731_v51 = vpop.eup %5730  ;;  %5736 = vpow2.f32 %v5012_v54 }
 0x30d   : > { %4194 = vst [vmem:[%s6188_s25 + $0x400] sm:$0xff] %v3599_v26  ;;  %v3685_v18 = vand.u32 2147483647, %v8573_v33  ;;  %5738 = vrcp.f32 %v8583_v58  ;;  %v5011_v43 = vmul.f32 -1.442695, %v925_v28  ;;  %v3643_v62 = vor.u32 1.1754944e-38, %v3642_v57 }
 0x30e   : > { %v3635_v1 = vadd.f32 %v5725_v37, %v3634_v36  ;;  %v3687_v20 = vand.u32 2147483648, %v8573_v33  ;;  %v8593_v12 = vadd.f32 1.0, %v5731_v51  ;;  %vm3641_vm3 = vcmp.eq.f32.partialorder %v3640_v16, 8.507059e+37 }
 0x30f   : > { %5740 = vpow2.f32 %v5010_v14  ;;  %v5014_v29 = vmul.f32 -1.442695, %v750_v59  ;;  %vm3681_vm4 = vweird.f32 %v8573_v33  ;;  %v1017_v35 = vadd.f32 %v1016_v34, %v6603_v40 }
 0x310   : > { %v5733_v0 = vpop.eup %5732  ;;  %v3639_v9 = vsel %vm3638_vm2, %v5725_v37, %v3635_v1  ;;  %5742 = vrcp.f32 %v8593_v12  ;;  %vm8600_vm5 = vcmp.eq.f32.partialorder %v3685_v18, 8.507059e+37  ;;  %v3655_v22 = vand.u32 2147483647, %v8583_v58 }
 0x311   : > { %v5735_v24 = vpop.eup %5734  ;;  %v3644_v3 = vsel %vm3641_vm3, %v3643_v62, %v3639_v9  ;;  %5744 = vpow2.f32 %v5011_v43  ;;  %v3688_v31 = vor.u32 1.1754944e-38, %v3687_v20  ;;  %v3657_v27 = vand.u32 2147483648, %v8583_v58 }
 0x312   : > { %4197 = vst [vmem:[%s6188_s25 + $0x418] sm:$0xff] %v3644_v3  ;;  %v3677_v4 = vmul.f32 %v5735_v24, %v8573_v33  ;;  %v5737_v50 = vpop.eup %5736  ;;  %v8606_v5 = vadd.f32 1.0, %v5733_v0  ;;  %v839_v55 = vadd.f32 %v838_v46, %v6609_v52  ;;  %v3670_v10 = vand.u32 2147483647, %v8593_v12 }
 0x313   : > { %v5739_v25 = vpop.eup %5738  ;;  %v8610_v39 = vadd.f32 1.0, %v5737_v50  ;;  %5746 = vpow2.f32 %v5014_v29  ;;  %v3672_v19 = vand.u32 2147483648, %v8593_v12  ;;  %v5017_v42 = vmul.f32 -1.442695, %v1017_v35 }
 0x314   : > { %v3678_v44 = vsub.f32 1.0, %v3677_v4  ;;  %v3647_v21 = vmul.f32 %v5739_v25, %v8583_v58  ;;  %5748 = vrcp.f32 %v8606_v5  ;;  %vm3682_vm6 = vweird.f32 %v5735_v24 }
 0x315   : > { %v5741_v48 = vpop.eup %5740  ;;  %vm3651_vm7 = vweird.f32 %v8583_v58  ;;  %vm8616_vm8 = vcmp.eq.f32.partialorder %v3655_v22, 8.507059e+37  ;;  %v3658_v56 = vor.u32 1.1754944e-38, %v3657_v27  ;;  %vm3666_vm9 = vweird.f32 %v8593_v12  ;;  %vm3683_vm11 = vmor %vm3681_vm4, %vm3682_vm6 }
 0x316   : > { %v3679_v13 = vmul.f32 %v5735_v24, %v3678_v44  ;;  %v5743_v63 = vpop.eup %5742  ;;  %v3648_v17 = vsub.f32 1.0, %v3647_v21  ;;  %5750 = vrcp.f32 %v8610_v39  ;;  %vm8623_vm10 = vcmp.eq.f32.partialorder %v3670_v10, 8.507059e+37  ;;  %v751_v21 = vpop.f32.mrf.mxu1 }
 0x317   : > { %v5745_v37 = vpop.eup %5744  ;;  %v3662_v23 = vmul.f32 %v5743_v63, %v8593_v12  ;;  %v8627_v49 = vmul.f32 -1.442695, %v839_v55  ;;  %vm3652_vm12 = vweird.f32 %v5739_v25  ;;  %v3673_v30 = vor.u32 1.1754944e-38, %v3672_v19 }
 0x318   : > { %v3680_v7 = vadd.f32 %v5735_v24, %v3679_v13  ;;  %v3649_v6 = vmul.f32 %v5739_v25, %v3648_v17  ;;  %5752 = vpow2.f32 %v5017_v42  ;;  %vm3711_vm13 = vweird.f32 %v8606_v5  ;;  %vm3653_vm14 = vmor %vm3651_vm7, %vm3652_vm12  ;;  %v1018_v17 = vpop.f32.mrf.mxu0 }
 0x319   : > { %v5747_v8 = vpop.eup %5746  ;;  %v3663_v15 = vsub.f32 1.0, %v3662_v23  ;;  %v3715_v16 = vand.u32 2147483647, %v8606_v5  ;;  %v8633_v54 = vadd.f32 1.0, %v5741_v48  ;;  %v3717_v61 = vand.u32 2147483648, %v8606_v5 }
 0x31a   : > { %v3684_v41 = vsel %vm3683_vm11, %v5735_v24, %v3680_v7  ;;  %v5749_v32 = vpop.eup %5748  ;;  %v3650_v33 = vadd.f32 %v5739_v25, %v3649_v6  ;;  %v8638_v57 = vadd.f32 1.0, %v5745_v37  ;;  %vm3667_vm15 = vweird.f32 %v5743_v63  ;;  %v927_v24 = vpop.f32.mrf.mxu3 }
 0x31b   : > { %v3689_v45 = vsel %vm8600_vm5, %v3688_v31, %v3684_v41  ;;  %v3664_v28 = vmul.f32 %v5743_v63, %v3663_v15  ;;  %v3707_v11 = vmul.f32 %v5749_v32, %v8606_v5  ;;  %vm3756_vm0 = vweird.f32 %v8610_v39  ;;  %vm3668_vm1 = vmor %vm3666_vm9, %vm3667_vm15 }
 0x31c   : > { %4200 = vst [vmem:[%s6188_s25 + $0x430] sm:$0xff] %v3689_v45  ;;  %5754 = vrcp.f32 %v8633_v54  ;;  %v5751_v14 = vpop.eup %5750  ;;  %v3654_v26 = vsel %vm3653_vm14, %v5739_v25, %v3650_v33  ;;  %v3760_v36 = vand.u32 2147483647, %v8610_v39  ;;  %v3762_v59 = vand.u32 2147483648, %v8610_v39  ;;  %v840_v45 = vpop.f32.mrf.mxu2 }
 0x31d   : > { %v8649_v51 = vadd.f32 1.0, %v5747_v8  ;;  %v3659_v58 = vsel %vm8616_vm8, %v3658_v56, %v3654_v26  ;;  %v3665_v1 = vadd.f32 %v5743_v63, %v3664_v28  ;;  %v3708_v18 = vsub.f32 1.0, %v3707_v11 }
 0x31e   : > { %v3752_v43 = vmul.f32 %v5751_v14, %v8610_v39  ;;  %v5753_v34 = vpop.eup %5752  ;;  %4198 = vst [vmem:[%s6188_s25 + $0x420] sm:$0xff] %v3659_v58  ;;  %vm8658_vm2 = vcmp.eq.f32.partialorder %v3715_v16, 8.507059e+37  ;;  %v3730_v20 = vand.u32 2147483647, %v8633_v54  ;;  %v3732_v0 = vand.u32 2147483648, %v8633_v54 }
 0x31f   : > { %5756 = vrcp.f32 %v8638_v57  ;;  %v3669_v9 = vsel %vm3668_vm1, %v5743_v63, %v3665_v1  ;;  %v3709_v29 = vmul.f32 %v5749_v32, %v3708_v18  ;;  %vm3712_vm3 = vweird.f32 %v5749_v32 }
 0x320   : > { %v3753_v46 = vsub.f32 1.0, %v3752_v43  ;;  %v3674_v12 = vsel %vm8623_vm10, %v3673_v30, %v3669_v9  ;;  %v3718_v3 = vor.u32 1.1754944e-38, %v3717_v61  ;;  %vm8667_vm4 = vcmp.eq.f32.partialorder %v3760_v36, 8.507059e+37  ;;  %vm3713_vm6 = vmor %vm3711_vm13, %vm3712_vm3 }
 0x321   : > { %5758 = vrcp.f32 %v8649_v51  ;;  %4199 = vst [vmem:[%s6188_s25 + $0x428] sm:$0xff] %v3674_v12  ;;  %v3710_v53 = vadd.f32 %v5749_v32, %v3709_v29  ;;  %vm3757_vm5 = vweird.f32 %v5751_v14  ;;  %v3763_v50 = vor.u32 1.1754944e-38, %v3762_v59 }
 0x322   : > { %v5755_v4 = vpop.eup %5754  ;;  %v3754_v22 = vmul.f32 %v5751_v14, %v3753_v46  ;;  %vm3726_vm7 = vweird.f32 %v8633_v54  ;;  %vm8677_vm8 = vcmp.eq.f32.partialorder %v3730_v20, 8.507059e+37  ;;  %v3733_v55 = vor.u32 1.1754944e-38, %v3732_v0  ;;  %vm3758_vm10 = vmor %vm3756_vm0, %vm3757_vm5  ;;  %v929_v33 = vpop.f32.mrf.mxu3 }
 0x323   : > { %v3722_v31 = vmul.f32 %v5755_v4, %v8633_v54  ;;  %v3714_v25 = vsel %vm3713_vm6, %v5749_v32, %v3710_v53  ;;  %vm3741_vm9 = vweird.f32 %v8638_v57  ;;  %v3745_v10 = vand.u32 2147483647, %v8638_v57  ;;  %v754_v0 = vpop.f32.mrf.mxu1 }
 0x324   : > { %v3755_v44 = vadd.f32 %v5751_v14, %v3754_v22  ;;  %v3719_v5 = vsel %vm8658_vm2, %v3718_v3, %v3714_v25  ;;  %v8687_v48 = vadd.f32 1.0, %v5753_v34  ;;  %5760 = vpow2.f32 %v8627_v49  ;;  %v1021_v3 = vpop.f32.mrf.mxu0 }
 0x325   : > { %v5757_v19 = vpop.eup %5756  ;;  %v3723_v42 = vsub.f32 1.0, %v3722_v31  ;;  %4202 = vst [vmem:[%s6188_s25 + $0x440] sm:$0xff] %v3719_v5  ;;  %v3747_v63 = vand.u32 2147483648, %v8638_v57  ;;  %vm3786_vm11 = vweird.f32 %v8649_v51  ;;  %vm3727_vm12 = vweird.f32 %v5755_v4 }
 0x326   : > { %v3759_v13 = vsel %vm3758_vm10, %v5751_v14, %v3755_v44  ;;  %v3737_v2 = vmul.f32 %v5757_v19, %v8638_v57  ;;  %5762 = vrcp.f32 %v8687_v48  ;;  %vm8698_vm13 = vcmp.eq.f32.partialorder %v3745_v10, 8.507059e+37  ;;  %vm3728_vm14 = vmor %vm3726_vm7, %vm3727_vm12  ;;  %v843_v10 = vpop.f32.mrf.mxu2 }
 0x327   : > { %v5759_v56 = vpop.eup %5758  ;;  %v3764_v39 = vsel %vm8667_vm4, %v3763_v50, %v3759_v13  ;;  %v3724_v37 = vmul.f32 %v5755_v4, %v3723_v42  ;;  %v3790_v49 = vand.u32 2147483647, %v8649_v51  ;;  %v3792_v30 = vand.u32 2147483648, %v8649_v51 }
 0x328   : > { %4205 = vst [vmem:[%s6188_s25 + $0x458] sm:$0xff] %v3764_v39  ;;  %v3738_v7 = vsub.f32 1.0, %v3737_v2  ;;  %v3782_v60 = vmul.f32 %v5759_v56, %v8649_v51  ;;  %v928_v8 = vadd.f32 %v927_v24, %v6649_v38  ;;  %v752_v41 = vadd.f32 %v751_v21, %v6600_v47 }
 0x329   : > { %v3725_v6 = vadd.f32 %v5755_v4, %v3724_v37  ;;  %vm3742_vm15 = vweird.f32 %v5757_v19  ;;  %v1019_v32 = vadd.f32 %v1018_v17, %v6603_v40  ;;  %vm3787_vm0 = vweird.f32 %v5759_v56 }
 0x32a   : > { %v3739_v15 = vmul.f32 %v5757_v19, %v3738_v7  ;;  %v3783_v16 = vsub.f32 1.0, %v3782_v60  ;;  %v5761_v61 = vpop.eup %5760  ;;  %v5016_v11 = vmul.f32 -1.442695, %v928_v8  ;;  %v5019_v14 = vmul.f32 -1.442695, %v752_v41  ;;  %vm3743_vm1 = vmor %vm3741_vm9, %vm3742_vm15  ;;  %v932_v21 = vpop.f32.mrf.mxu3 }
 0x32b   : > { %v3729_v28 = vsel %vm3728_vm14, %v5755_v4, %v3725_v6  ;;  %v8712_v54 = vadd.f32 1.0, %v5761_v61  ;;  %v3748_v1 = vor.u32 1.1754944e-38, %v3747_v63  ;;  %v5022_v18 = vmul.f32 -1.442695, %v1019_v32  ;;  %vm3788_vm3 = vmor %vm3786_vm11, %vm3787_vm0  ;;  %v756_v6 = vpop.f32.mrf.mxu1 }
 0x32c   : > { %v3734_v26 = vsel %vm8677_vm8, %v3733_v55, %v3729_v28  ;;  %v3740_v36 = vadd.f32 %v5757_v19, %v3739_v15  ;;  %v3784_v59 = vmul.f32 %v5759_v56, %v3783_v16  ;;  %v5763_v58 = vpop.eup %5762  ;;  %5764 = vpow2.f32 %v5016_v11 }
 0x32d   : > { %4203 = vst [vmem:[%s6188_s25 + $0x448] sm:$0xff] %v3734_v26  ;;  %v841_v43 = vadd.f32 %v840_v45, %v6609_v52  ;;  %vm3791_vm2 = vcmp.eq.f32.partialorder %v3790_v49, 8.507059e+37  ;;  %v3827_v20 = vmul.f32 %v5763_v58, %v8687_v48  ;;  %v3793_v57 = vor.u32 1.1754944e-38, %v3792_v30 }
 0x32e   : > { %v3744_v34 = vsel %vm3743_vm1, %v5757_v19, %v3740_v36  ;;  %v3785_v62 = vadd.f32 %v5759_v56, %v3784_v59  ;;  %5766 = vrcp.f32 %v8712_v54  ;;  %v930_v29 = vadd.f32 %v929_v33, %v6649_v38 }
 0x32f   : > { %v3749_v9 = vsel %vm8698_vm13, %v3748_v1, %v3744_v34  ;;  %v3828_v24 = vsub.f32 1.0, %v3827_v20  ;;  %v3835_v12 = vand.u32 2147483647, %v8687_v48  ;;  %5768 = vpow2.f32 %v5019_v14 }
 0x330   : > { %4204 = vst [vmem:[%s6188_s25 + $0x450] sm:$0xff] %v3749_v9  ;;  %v3789_v46 = vsel %vm3788_vm3, %v5759_v56, %v3785_v62  ;;  %v3837_v4 = vand.u32 2147483648, %v8687_v48  ;;  %5770 = vpow2.f32 %v5022_v18  ;;  %v5020_v53 = vmul.f32 -1.442695, %v841_v43 }
 0x331   : > { %v3794_v35 = vsel %vm3791_vm2, %v3793_v57, %v3789_v46  ;;  %v3829_v51 = vmul.f32 %v5763_v58, %v3828_v24  ;;  %vm3831_vm4 = vweird.f32 %v8687_v48  ;;  %vm3832_vm5 = vweird.f32 %v5763_v58 }
 0x332   : > { %4207 = vst [vmem:[%s6188_s25 + $0x468] sm:$0xff] %v3794_v35  ;;  %v755_v22 = vadd.f32 %v754_v0, %v6600_v47  ;;  %v5765_v50 = vpop.eup %5764  ;;  %5772 = vpow2.f32 %v5020_v53  ;;  %v5021_v31 = vmul.f32 -1.442695, %v930_v29  ;;  %v1022_v27 = vadd.f32 %v1021_v3, %v6603_v40  ;;  %vm3833_vm6 = vmor %vm3831_vm4, %vm3832_vm5 }
 0x333   : > { %v3830_v55 = vadd.f32 %v5763_v58, %v3829_v51  ;;  %v8734_v25 = vadd.f32 1.0, %v5765_v50  ;;  %vm3836_vm7 = vcmp.eq.f32.partialorder %v3835_v12, 8.507059e+37  ;;  %v3838_v5 = vor.u32 1.1754944e-38, %v3837_v4 }
 0x334   : > { %v5024_v44 = vmul.f32 -1.442695, %v755_v22  ;;  %v5767_v19 = vpop.eup %5766  ;;  %v3805_v42 = vand.u32 2147483647, %v8712_v54  ;;  %v5027_v48 = vmul.f32 -1.442695, %v1022_v27  ;;  %v844_v37 = vadd.f32 %v843_v10, %v6609_v52 }
 0x335   : > { %v5769_v13 = vpop.eup %5768  ;;  %v3834_v2 = vsel %vm3833_vm6, %v5763_v58, %v3830_v55  ;;  %v3797_v63 = vmul.f32 %v5767_v19, %v8712_v54  ;;  %v3807_v17 = vand.u32 2147483648, %v8712_v54  ;;  %5774 = vrcp.f32 %v8734_v25 }
 0x336   : > { %v5771_v56 = vpop.eup %5770  ;;  %v3839_v39 = vsel %vm3836_vm7, %v3838_v5, %v3834_v2  ;;  %5776 = vpow2.f32 %v5021_v31  ;;  %v933_v7 = vadd.f32 %v932_v21, %v6649_v38  ;;  %v8743_v60 = vadd.f32 1.0, %v5769_v13 }
 0x337   : > { %4210 = vst [vmem:[%s6188_s25 + $0x480] sm:$0xff] %v3839_v39  ;;  %v3798_v23 = vsub.f32 1.0, %v3797_v63  ;;  %v8745_v49 = vadd.f32 1.0, %v5771_v56  ;;  %5778 = vpow2.f32 %v5024_v44  ;;  %vm3801_vm8 = vweird.f32 %v8712_v54 }
 0x338   : > { %v5773_v30 = vpop.eup %5772  ;;  %vm8748_vm9 = vcmp.eq.f32.partialorder %v3805_v42, 8.507059e+37  ;;  %v3820_v41 = vand.u32 2147483647, %v8734_v25  ;;  %5780 = vpow2.f32 %v5027_v48  ;;  %vm3802_vm10 = vweird.f32 %v5767_v19 }
 0x339   : > { %v3799_v15 = vmul.f32 %v5767_v19, %v3798_v23  ;;  %v3808_v16 = vor.u32 1.1754944e-38, %v3807_v17  ;;  %5782 = vrcp.f32 %v8743_v60  ;;  %v3822_v32 = vand.u32 2147483648, %v8734_v25  ;;  %vm3803_vm12 = vmor %vm3801_vm8, %vm3802_vm10 }
 0x33a   : > { %5784 = vrcp.f32 %v8745_v49  ;;  %v5025_v45 = vmul.f32 -1.442695, %v844_v37  ;;  %v757_v33 = vadd.f32 %v756_v6, %v6600_v47  ;;  %vm3816_vm11 = vweird.f32 %v8734_v25 }
 0x33b   : > { %v5775_v61 = vpop.eup %5774  ;;  %v3800_v28 = vadd.f32 %v5767_v19, %v3799_v15  ;;  %v8758_v11 = vadd.f32 1.0, %v5773_v30  ;;  %v8760_v14 = vmul.f32 -1.442695, %v933_v7  ;;  %vm8765_vm13 = vcmp.eq.f32.partialorder %v3820_v41, 8.507059e+37 }
 0x33c   : > { %v5777_v26 = vpop.eup %5776  ;;  %v3812_v36 = vmul.f32 %v5775_v61, %v8734_v25  ;;  %v3865_v47 = vand.u32 2147483647, %v8743_v60  ;;  %v3867_v58 = vand.u32 2147483648, %v8743_v60  ;;  %v3910_v43 = vand.u32 2147483647, %v8745_v49 }
 0x33d   : > { %v5779_v1 = vpop.eup %5778  ;;  %v3804_v18 = vsel %vm3803_vm12, %v5767_v19, %v3800_v28  ;;  %v3912_v34 = vand.u32 2147483648, %v8745_v49  ;;  %5786 = vrcp.f32 %v8758_v11  ;;  %v3823_v0 = vor.u32 1.1754944e-38, %v3822_v32 }
 0x33e   : > { %v5781_v54 = vpop.eup %5780  ;;  %v3809_v62 = vsel %vm8748_vm9, %v3808_v16, %v3804_v18  ;;  %v3813_v20 = vsub.f32 1.0, %v3812_v36  ;;  %v8776_v9 = vmul.f32 -1.442695, %v757_v33  ;;  %vm3861_vm14 = vweird.f32 %v8743_v60 }
 0x33f   : > { %v5783_v57 = vpop.eup %5782  ;;  %4208 = vst [vmem:[%s6188_s25 + $0x470] sm:$0xff] %v3809_v62  ;;  %vm3906_vm15 = vweird.f32 %v8745_v49  ;;  %v8781_v29 = vadd.f32 1.0, %v5777_v26  ;;  %v8783_v46 = vadd.f32 1.0, %v5779_v1  ;;  %vm3817_vm0 = vweird.f32 %v5775_v61  ;;  %v1023_v1 = vpop.f32.mrf.mxu0 }
 0x340   : > { %v5785_v24 = vpop.eup %5784  ;;  %v3814_v12 = vmul.f32 %v5775_v61, %v3813_v20  ;;  %v3857_v3 = vmul.f32 %v5783_v57, %v8743_v60  ;;  %vm8786_vm1 = vcmp.eq.f32.partialorder %v3865_v47, 8.507059e+37  ;;  %v3868_v4 = vor.u32 1.1754944e-38, %v3867_v58  ;;  %vm3818_vm4 = vmor %vm3816_vm11, %vm3817_vm0 }
 0x341   : > { %v3902_v53 = vmul.f32 %v5785_v24, %v8745_v49  ;;  %vm8791_vm2 = vcmp.eq.f32.partialorder %v3910_v43, 8.507059e+37  ;;  %v3913_v22 = vor.u32 1.1754944e-38, %v3912_v34  ;;  %v3880_v50 = vand.u32 2147483647, %v8758_v11  ;;  %v845_v34 = vpop.f32.mrf.mxu2 }
 0x342   : > { %5788 = vrcp.f32 %v8781_v29  ;;  %v3815_v31 = vadd.f32 %v5775_v61, %v3814_v12  ;;  %v3858_v27 = vsub.f32 1.0, %v3857_v3  ;;  %vm3876_vm3 = vweird.f32 %v8758_v11 }
 0x343   : > { %v3882_v55 = vand.u32 2147483648, %v8758_v11  ;;  %5790 = vpow2.f32 %v5025_v45  ;;  %v5787_v44 = vpop.eup %5786  ;;  %vm3862_vm5 = vweird.f32 %v5783_v57  ;;  %v3903_v10 = vsub.f32 1.0, %v3902_v53 }
 0x344   : > { %5792 = vrcp.f32 %v8783_v46  ;;  %v8803_v21 = vadd.f32 1.0, %v5781_v54  ;;  %v3819_v19 = vsel %vm3818_vm4, %v5775_v61, %v3815_v31  ;;  %v3859_v5 = vmul.f32 %v5783_v57, %v3858_v27  ;;  %vm3863_vm8 = vmor %vm3861_vm14, %vm3862_vm5 }
 0x345   : > { %vm3907_vm6 = vweird.f32 %v5785_v24  ;;  %v3872_v42 = vmul.f32 %v5787_v44, %v8758_v11  ;;  %v3824_v48 = vsel %vm8765_vm13, %v3823_v0, %v3819_v19  ;;  %v3904_v13 = vmul.f32 %v5785_v24, %v3903_v10 }
 0x346   : > { %v3895_v2 = vand.u32 2147483647, %v8781_v29  ;;  %v3897_v25 = vand.u32 2147483648, %v8781_v29  ;;  %4209 = vst [vmem:[%s6188_s25 + $0x478] sm:$0xff] %v3824_v48  ;;  %v3860_v63 = vadd.f32 %v5783_v57, %v3859_v5  ;;  %vm8811_vm7 = vcmp.eq.f32.partialorder %v3880_v50, 8.507059e+37  ;;  %vm3908_vm11 = vmor %vm3906_vm15, %vm3907_vm6 }
 0x347   : > { %v3873_v17 = vsub.f32 1.0, %v3872_v42  ;;  %v3883_v39 = vor.u32 1.1754944e-38, %v3882_v55  ;;  %v3905_v7 = vadd.f32 %v5785_v24, %v3904_v13  ;;  %vm3891_vm9 = vweird.f32 %v8781_v29 }
 0x348   : > { %v5789_v37 = vpop.eup %5788  ;;  %vm3936_vm10 = vweird.f32 %v8783_v46  ;;  %5794 = vrcp.f32 %v8803_v21  ;;  %v3864_v6 = vsel %vm3863_vm8, %v5783_v57, %v3860_v63  ;;  %vm3877_vm12 = vweird.f32 %v5787_v44 }
 0x349   : > { %v5791_v23 = vpop.eup %5790  ;;  %v3874_v30 = vmul.f32 %v5787_v44, %v3873_v17  ;;  %v3887_v60 = vmul.f32 %v5789_v37, %v8781_v29  ;;  %v3869_v41 = vsel %vm8786_vm1, %v3868_v4, %v3864_v6  ;;  %v3909_v15 = vsel %vm3908_vm11, %v5785_v24, %v3905_v7  ;;  %vm3878_vm14 = vmor %vm3876_vm3, %vm3877_vm12  ;;  %v934_v24 = vpop.f32.mrf.mxu3 }
 0x34a   : > { %v5793_v8 = vpop.eup %5792  ;;  %vm8827_vm13 = vcmp.eq.f32.partialorder %v3895_v2, 8.507059e+37  ;;  %v3898_v32 = vor.u32 1.1754944e-38, %v3897_v25  ;;  %4212 = vst [vmem:[%s6188_s25 + $0x490] sm:$0xff] %v3869_v41  ;;  %v3914_v45 = vsel %vm8791_vm2, %v3913_v22, %v3909_v15  ;;  %vm3892_vm15 = vweird.f32 %v5789_v37 }
 0x34b   : > { %v3875_v49 = vadd.f32 %v5787_v44, %v3874_v30  ;;  %v3888_v33 = vsub.f32 1.0, %v3887_v60  ;;  %v3932_v61 = vmul.f32 %v5793_v8, %v8783_v46  ;;  %4215 = vst [vmem:[%s6188_s25 + $0x4a8] sm:$0xff] %v3914_v45  ;;  %v3940_v28 = vand.u32 2147483647, %v8783_v46  ;;  %vm3893_vm2 = vmor %vm3891_vm9, %vm3892_vm15 }
 0x34c   : > { %v3942_v26 = vand.u32 2147483648, %v8783_v46  ;;  %v8840_v36 = vadd.f32 1.0, %v5791_v23  ;;  %5796 = vpow2.f32 %v8760_v14  ;;  %vm3981_vm0 = vweird.f32 %v8803_v21 }
 0x34d   : > { %v3879_v59 = vsel %vm3878_vm14, %v5787_v44, %v3875_v49  ;;  %v3889_v47 = vmul.f32 %v5789_v37, %v3888_v33  ;;  %v3933_v58 = vsub.f32 1.0, %v3932_v61  ;;  %v3985_v11 = vand.u32 2147483647, %v8803_v21 }
 0x34e   : > { %v5795_v18 = vpop.eup %5794  ;;  %v3884_v43 = vsel %vm8811_vm7, %v3883_v39, %v3879_v59  ;;  %5798 = vrcp.f32 %v8840_v36  ;;  %vm3937_vm1 = vweird.f32 %v5793_v8  ;;  %vm8853_vm3 = vcmp.eq.f32.partialorder %v3940_v28, 8.507059e+37 }
 0x34f   : > { %4213 = vst [vmem:[%s6188_s25 + $0x498] sm:$0xff] %v3884_v43  ;;  %v3890_v54 = vadd.f32 %v5789_v37, %v3889_v47  ;;  %v3934_v62 = vmul.f32 %v5793_v8, %v3933_v58  ;;  %v3977_v20 = vmul.f32 %v5795_v18, %v8803_v21  ;;  %v3943_v0 = vor.u32 1.1754944e-38, %v3942_v26  ;;  %vm3938_vm4 = vmor %vm3936_vm10, %vm3937_vm1 }
 0x350   : > { %5800 = vpow2.f32 %v8776_v9  ;;  %v1024_v57 = vadd.f32 %v1023_v1, %v6603_v40  ;;  %v846_v4 = vadd.f32 %v845_v34, %v6609_v52  ;;  %vm3982_vm5 = vweird.f32 %v5795_v18 }
 0x351   : > { %v3894_v12 = vsel %vm3893_vm2, %v5789_v37, %v3890_v54  ;;  %v3935_v3 = vadd.f32 %v5793_v8, %v3934_v62  ;;  %v3978_v35 = vsub.f32 1.0, %v3977_v20  ;;  %v3987_v53 = vand.u32 2147483648, %v8803_v21  ;;  %vm3983_vm6 = vmor %vm3981_vm0, %vm3982_vm5 }
 0x352   : > { %v3899_v29 = vsel %vm8827_vm13, %v3898_v32, %v3894_v12  ;;  %v5032_v51 = vmul.f32 -1.442695, %v1024_v57  ;;  %v5797_v9 = vpop.eup %5796  ;;  %v5030_v50 = vmul.f32 -1.442695, %v846_v4  ;;  %v935_v31 = vadd.f32 %v934_v24, %v6649_v38 }
 0x353   : > { %4214 = vst [vmem:[%s6188_s25 + $0x4a0] sm:$0xff] %v3899_v29  ;;  %v3939_v40 = vsel %vm3938_vm4, %v5793_v8, %v3935_v3  ;;  %v3979_v22 = vmul.f32 %v5795_v18, %v3978_v35  ;;  %v8869_v55 = vadd.f32 1.0, %v5797_v9  ;;  %vm3986_vm7 = vcmp.eq.f32.partialorder %v3985_v11, 8.507059e+37 }
 0x354   : > { %v5799_v27 = vpop.eup %5798  ;;  %v3944_v52 = vsel %vm8853_vm3, %v3943_v0, %v3939_v40  ;;  %5802 = vpow2.f32 %v5032_v51  ;;  %v3988_v38 = vor.u32 1.1754944e-38, %v3987_v53  ;;  %v5031_v48 = vmul.f32 -1.442695, %v935_v31 }
 0x355   : > { %4217 = vst [vmem:[%s6188_s25 + $0x4b8] sm:$0xff] %v3944_v52  ;;  %v3980_v46 = vadd.f32 %v5795_v18, %v3979_v22  ;;  %v3947_v44 = vmul.f32 %v5799_v27, %v8840_v36  ;;  %5804 = vpow2.f32 %v5030_v50  ;;  %v3957_v2 = vand.u32 2147483648, %v8840_v36 }
 0x356   : > { %v5801_v10 = vpop.eup %5800  ;;  %5806 = vrcp.f32 %v8869_v55  ;;  %vm3952_vm8 = vweird.f32 %v5799_v27  ;;  %v3955_v63 = vand.u32 2147483647, %v8840_v36  ;;  %vm3951_vm9 = vweird.f32 %v8840_v36 }
 0x357   : > { %v3984_v19 = vsel %vm3983_vm6, %v5795_v18, %v3980_v46  ;;  %v3948_v5 = vsub.f32 1.0, %v3947_v44  ;;  %v1662_v42 = vadd.f32 1.0, %v5801_v10  ;;  %vm3953_vm10 = vmor %vm3951_vm9, %vm3952_vm8  ;;  %v3958_v7 = vor.u32 1.1754944e-38, %v3957_v2  ;;  %v4253_v2 = vld [vmem:[%s6188_s25 + $0x8] sm:$0xff] (%p5947_p5) }
 0x358   : > { %v3989_v13 = vsel %vm3986_vm7, %v3988_v38, %v3984_v19  ;;  %vm3956_vm11 = vcmp.eq.f32.partialorder %v3955_v63, 8.507059e+37  ;;  %v3972_v16 = vand.u32 2147483648, %v8869_v55  ;;  %v3970_v49 = vand.u32 2147483647, %v8869_v55  ;;  %v4257_v63 = vld [vmem:[%s6188_s25 + $0x18] sm:$0xff] (%p5947_p5)  ;;  %4254 = vst [vmem:[%s8921_s7 + $0x8] sm:$0xff] (%p5947_p5), %v4253_v2 }
 0x359   : > { %4220 = vst [vmem:[%s6188_s25 + $0x4d0] sm:$0xff] %v3989_v13  ;;  %v3949_v25 = vmul.f32 %v5799_v27, %v3948_v5  ;;  %5808 = vrcp.f32 %v1662_v42  ;;  %vm3966_vm13 = vweird.f32 %v8869_v55  ;;  %v4015_v36 = vand.u32 2147483647, %v1662_v42  ;;  %v4251_v13 = vld [vmem:[%s6188_s25] sm:$0xff] (%p5947_p5)  ;;  %v4381_v2 = vld [vmem:[%s6188_s25 + $0x208] sm:$0xff] (%p5947_p5) }
 0x35a   : > { %v5803_v17 = vpop.eup %5802  ;;  %5810 = vpow2.f32 %v5031_v48  ;;  %v4017_v59 = vand.u32 2147483648, %v1662_v42  ;;  %v3973_v47 = vor.u32 1.1754944e-38, %v3972_v16  ;;  %vm3971_vm0 = vcmp.eq.f32.partialorder %v3970_v49, 8.507059e+37  ;;  %4252 = vst [vmem:[%s8921_s7] sm:$0xff] (%p5947_p5), %v4251_v13  ;;  %v4285_v16 = vld [vmem:[%s6188_s25 + $0x88] sm:$0xff] (%p5947_p5)  ;;  %v4291_v49 = vld [vmem:[%s6188_s25 + $0xa0] sm:$0xff] (%p5947_p5) }
 0x35b   : > { %v5805_v21 = vpop.eup %5804  ;;  %v3950_v56 = vadd.f32 %v5799_v27, %v3949_v25  ;;  %v8881_v39 = vadd.f32 1.0, %v5803_v17  ;;  %vm4011_vm1 = vweird.f32 %v1662_v42  ;;  %vm4016_vm3 = vcmp.eq.f32.partialorder %v4015_v36, 8.507059e+37  ;;  %v4255_v25 = vld [vmem:[%s6188_s25 + $0x10] sm:$0xff] (%p5947_p5)  ;;  %v4259_v17 = vld [vmem:[%s6188_s25 + $0x20] sm:$0xff] (%p5947_p5)  ;;  %4258 = vst [vmem:[%s8921_s7 + $0x18] sm:$0xff] (%p5947_p5), %v4257_v63  ;;  %v4301_v36 = vld [vmem:[%s6188_s25 + $0xc8] sm:$0xff] (%p5947_p5) }
 0x35c   : > { %v5807_v37 = vpop.eup %5806  ;;  %v8883_v23 = vadd.f32 1.0, %v5805_v21  ;;  %v4018_v20 = vor.u32 1.1754944e-38, %v4017_v59  ;;  %4256 = vst [vmem:[%s8921_s7 + $0x10] sm:$0xff] (%p5947_p5), %v4255_v25  ;;  %v4261_v21 = vld [vmem:[%s6188_s25 + $0x28] sm:$0xff] (%p5947_p5)  ;;  %v4303_v59 = vld [vmem:[%s6188_s25 + $0xd0] sm:$0xff] (%p5947_p5)  ;;  %v4379_v13 = vld [vmem:[%s6188_s25 + $0x200] sm:$0xff] (%p5947_p5) }
 0x35d   : > { %v3954_v6 = vsel %vm3953_vm10, %v5799_v27, %v3950_v56  ;;  %v3962_v30 = vmul.f32 %v5807_v37, %v8869_v55  ;;  %5812 = vrcp.f32 %v8881_v39  ;;  %vm3967_vm12 = vweird.f32 %v5807_v37  ;;  %v4263_v56 = vld [vmem:[%s6188_s25 + $0x30] sm:$0xff] (%p5947_p5)  ;;  %4260 = vst [vmem:[%s8921_s7 + $0x20] sm:$0xff] (%p5947_p5), %v4259_v17  ;;  %v4385_v63 = vld [vmem:[%s6188_s25 + $0x218] sm:$0xff] (%p5947_p5)  ;;  %v4387_v17 = vld [vmem:[%s6188_s25 + $0x220] sm:$0xff] (%p5947_p5) }
 0x35e   : > { %v3959_v60 = vsel %vm3956_vm11, %v3958_v7, %v3954_v6  ;;  %5814 = vrcp.f32 %v8883_v23  ;;  %vm3968_vm14 = vmor %vm3966_vm13, %vm3967_vm12  ;;  %v4060_v14 = vand.u32 2147483647, %v8881_v39  ;;  %v4062_v0 = vand.u32 2147483648, %v8881_v39  ;;  %4262 = vst [vmem:[%s8921_s7 + $0x28] sm:$0xff] (%p5947_p5), %v4261_v21  ;;  %v4269_v7 = vld [vmem:[%s6188_s25 + $0x48] sm:$0xff] (%p5947_p5)  ;;  %v4273_v6 = vld [vmem:[%s6188_s25 + $0x58] sm:$0xff] (%p5947_p5) }
 0x35f   : > { %v5809_v8 = vpop.eup %5808  ;;  %4218 = vst [vmem:[%s6188_s25 + $0x4c0] sm:$0xff] %v3959_v60  ;;  %v3963_v41 = vsub.f32 1.0, %v3962_v30  ;;  %vm4056_vm5 = vweird.f32 %v8881_v39  ;;  %v4030_v4 = vand.u32 2147483647, %v8883_v23  ;;  %v4032_v29 = vand.u32 2147483648, %v8883_v23  ;;  %v4275_v30 = vld [vmem:[%s6188_s25 + $0x60] sm:$0xff] (%p5947_p5) }
 0x360   : > { %v5811_v15 = vpop.eup %5810  ;;  %v4007_v32 = vmul.f32 %v5809_v8, %v1662_v42  ;;  %vm4012_vm15 = vweird.f32 %v5809_v8  ;;  %v4063_v40 = vor.u32 1.1754944e-38, %v4062_v0  ;;  %vm4026_vm8 = vweird.f32 %v8883_v23  ;;  %4264 = vst [vmem:[%s8921_s7 + $0x30] sm:$0xff] (%p5947_p5), %v4263_v56  ;;  %v4277_v60 = vld [vmem:[%s6188_s25 + $0x68] sm:$0xff] (%p5947_p5)  ;;  %v4327_v0 = vld [vmem:[%s6188_s25 + $0x130] sm:$0xff] (%p5947_p5) }
 0x361   : > { %v3964_v45 = vmul.f32 %v5807_v37, %v3963_v41  ;;  %v8891_v33 = vadd.f32 1.0, %v5811_v15  ;;  %vm4013_vm2 = vmor %vm4011_vm1, %vm4012_vm15  ;;  %vm4061_vm9 = vcmp.eq.f32.partialorder %v4060_v14, 8.507059e+37  ;;  %vm4031_vm11 = vcmp.eq.f32.partialorder %v4030_v4, 8.507059e+37  ;;  %4270 = vst [vmem:[%s8921_s7 + $0x48] sm:$0xff] (%p5947_p5), %v4269_v7  ;;  %v4281_v41 = vld [vmem:[%s6188_s25 + $0x78] sm:$0xff] (%p5947_p5)  ;;  %v4283_v15 = vld [vmem:[%s6188_s25 + $0x80] sm:$0xff] (%p5947_p5) }
 0x362   : > { %v4008_v61 = vsub.f32 1.0, %v4007_v32  ;;  %v4033_v52 = vor.u32 1.1754944e-38, %v4032_v29  ;;  %4274 = vst [vmem:[%s8921_s7 + $0x198] sm:$0xff] (%p5947_p5), %v4273_v6  ;;  %v4287_v32 = vld [vmem:[%s6188_s25 + $0x90] sm:$0xff] (%p5947_p5)  ;;  %v4325_v14 = vld [vmem:[%s6188_s25 + $0x128] sm:$0xff] (%p5947_p5)  ;;  %v4339_v4 = vld [vmem:[%s6188_s25 + $0x160] sm:$0xff] (%p5947_p5) }
 0x363   : > { %v5813_v28 = vpop.eup %5812  ;;  %v3965_v26 = vadd.f32 %v5807_v37, %v3964_v45  ;;  %5816 = vrcp.f32 %v8891_v33  ;;  %v4047_v55 = vand.u32 2147483648, %v8891_v33  ;;  %v4045_v10 = vand.u32 2147483647, %v8891_v33  ;;  %4276 = vst [vmem:[%s8921_s7 + $0x1a0] sm:$0xff] (%p5947_p5), %v4275_v30  ;;  %v4289_v45 = vld [vmem:[%s6188_s25 + $0x98] sm:$0xff] (%p5947_p5)  ;;  %v4341_v29 = vld [vmem:[%s6188_s25 + $0x168] sm:$0xff] (%p5947_p5) }
 0x364   : > { %v4009_v58 = vmul.f32 %v5809_v8, %v4008_v61  ;;  %v4052_v1 = vmul.f32 %v5813_v28, %v8881_v39  ;;  %v5815_v18 = vpop.eup %5814  ;;  %vm4057_vm4 = vweird.f32 %v5813_v28  ;;  %vm4041_vm13 = vweird.f32 %v8891_v33  ;;  %v4265_v39 = vld [vmem:[%s6188_s25 + $0x38] sm:$0xff] (%p5947_p5)  ;;  %4278 = vst [vmem:[%s8921_s7 + $0x1a8] sm:$0xff] (%p5947_p5), %v4277_v60  ;;  %v4295_v61 = vld [vmem:[%s6188_s25 + $0xb0] sm:$0xff] (%p5947_p5)  ;;  %v4389_v21 = vld [vmem:[%s6188_s25 + $0x228] sm:$0xff] (%p5947_p5) }
 0x365   : > { %v3969_v43 = vsel %vm3968_vm14, %v5807_v37, %v3965_v26  ;;  %v4022_v62 = vmul.f32 %v5815_v18, %v8883_v23  ;;  %vm4027_vm6 = vweird.f32 %v5815_v18  ;;  %vm4058_vm7 = vmor %vm4056_vm5, %vm4057_vm4  ;;  %v4048_v5 = vor.u32 1.1754944e-38, %v4047_v55  ;;  %v4267_v37 = vld [vmem:[%s6188_s25 + $0x40] sm:$0xff] (%p5947_p5)  ;;  %4266 = vst [vmem:[%s8921_s7 + $0x38] sm:$0xff] (%p5947_p5), %v4265_v39  ;;  %v4271_v23 = vld [vmem:[%s6188_s25 + $0x50] sm:$0xff] (%p5947_p5) }
 0x366   : > { %v3974_v11 = vsel %vm3971_vm0, %v3973_v47, %v3969_v43  ;;  %v4010_v34 = vadd.f32 %v5809_v8, %v4009_v58  ;;  %v4053_v54 = vsub.f32 1.0, %v4052_v1  ;;  %vm4028_vm10 = vmor %vm4026_vm8, %vm4027_vm6  ;;  %vm4046_vm15 = vcmp.eq.f32.partialorder %v4045_v10, 8.507059e+37  ;;  %4268 = vst [vmem:[%s8921_s7 + $0x40] sm:$0xff] (%p5947_p5), %v4267_v37  ;;  %v4299_v26 = vld [vmem:[%s6188_s25 + $0xc0] sm:$0xff] (%p5947_p5)  ;;  %v4305_v47 = vld [vmem:[%s6188_s25 + $0xd8] sm:$0xff] (%p5947_p5) }
 0x367   : > { %4219 = vst [vmem:[%s6188_s25 + $0x4c8] sm:$0xff] %v3974_v11  ;;  %v4023_v12 = vsub.f32 1.0, %v4022_v62  ;;  %v4307_v58 = vld [vmem:[%s6188_s25 + $0xe0] sm:$0xff] (%p5947_p5)  ;;  %v4309_v1 = vld [vmem:[%s6188_s25 + $0xe8] sm:$0xff] (%p5947_p5)  ;;  %v4313_v43 = vld [vmem:[%s6188_s25 + $0xf8] sm:$0xff] (%p5947_p5) }
 0x368   : > { %v4014_v57 = vsel %vm4013_vm2, %v5809_v8, %v4010_v34  ;;  %v4054_v24 = vmul.f32 %v5813_v28, %v4053_v54  ;;  %4272 = vst [vmem:[%s8921_s7 + $0x190] sm:$0xff] (%p5947_p5), %v4271_v23  ;;  %v4279_v8 = vld [vmem:[%s6188_s25 + $0x70] sm:$0xff] (%p5947_p5)  ;;  %v4315_v11 = vld [vmem:[%s6188_s25 + $0x100] sm:$0xff] (%p5947_p5)  ;;  %v4317_v34 = vld [vmem:[%s6188_s25 + $0x108] sm:$0xff] (%p5947_p5) }
 0x369   : > { %v5817_v3 = vpop.eup %5816  ;;  %v4019_v35 = vsel %vm4016_vm3, %v4018_v20, %v4014_v57  ;;  %v4024_v51 = vmul.f32 %v5815_v18, %v4023_v12  ;;  %4280 = vst [vmem:[%s8921_s7 + $0x1b0] sm:$0xff] (%p5947_p5), %v4279_v8  ;;  %v4319_v54 = vld [vmem:[%s6188_s25 + $0x110] sm:$0xff] (%p5947_p5)  ;;  %v4321_v62 = vld [vmem:[%s6188_s25 + $0x118] sm:$0xff] (%p5947_p5)  ;;  %v4323_v20 = vld [vmem:[%s6188_s25 + $0x120] sm:$0xff] (%p5947_p5) }
 0x36a   : > { %4222 = vst [vmem:[%s6188_s25 + $0x4e0] sm:$0xff] %v4019_v35  ;;  %v4055_v53 = vadd.f32 %v5813_v28, %v4054_v24  ;;  %v4037_v9 = vmul.f32 %v5817_v3, %v8891_v33  ;;  %vm4042_vm12 = vweird.f32 %v5817_v3  ;;  %v4293_v33 = vld [vmem:[%s6188_s25 + $0xa8] sm:$0xff] (%p5947_p5)  ;;  %v4329_v57 = vld [vmem:[%s6188_s25 + $0x138] sm:$0xff] (%p5947_p5)  ;;  %v4331_v24 = vld [vmem:[%s6188_s25 + $0x140] sm:$0xff] (%p5947_p5) }
 0x36b   : > { %v4025_v50 = vadd.f32 %v5815_v18, %v4024_v51  ;;  %vm4043_vm14 = vmor %vm4041_vm13, %vm4042_vm12  ;;  %4282 = vst [vmem:[%s8921_s7 + $0x1b8] sm:$0xff] (%p5947_p5), %v4281_v41  ;;  %v4333_v12 = vld [vmem:[%s6188_s25 + $0x148] sm:$0xff] (%p5947_p5)  ;;  %v4337_v35 = vld [vmem:[%s6188_s25 + $0x158] sm:$0xff] (%p5947_p5) }
 0x36c   : > { %v4059_v22 = vsel %vm4058_vm7, %v5813_v28, %v4055_v53  ;;  %v4038_v31 = vsub.f32 1.0, %v4037_v9  ;;  %4284 = vst [vmem:[%s8921_s7 + $0x1c0] sm:$0xff] (%p5947_p5), %v4283_v15  ;;  %v4297_v28 = vld [vmem:[%s6188_s25 + $0xb8] sm:$0xff] (%p5947_p5)  ;;  %v4343_v53 = vld [vmem:[%s6188_s25 + $0x170] sm:$0xff] (%p5947_p5)  ;;  %v4347_v9 = vld [vmem:[%s6188_s25 + $0x180] sm:$0xff] (%p5947_p5) }
 0x36d   : > { %v4064_v27 = vsel %vm4061_vm9, %v4063_v40, %v4059_v22  ;;  %v4029_v46 = vsel %vm4028_vm10, %v5815_v18, %v4025_v50  ;;  %4286 = vst [vmem:[%s8921_s7 + $0x1c8] sm:$0xff] (%p5947_p5), %v4285_v16  ;;  %v4311_v18 = vld [vmem:[%s6188_s25 + $0xf0] sm:$0xff] (%p5947_p5)  ;;  %v4345_v51 = vld [vmem:[%s6188_s25 + $0x178] sm:$0xff] (%p5947_p5)  ;;  %v4349_v40 = vld [vmem:[%s6188_s25 + $0x188] sm:$0xff] (%p5947_p5) }
 0x36e   : > { %4225 = vst [vmem:[%s6188_s25 + $0x4f8] sm:$0xff] %v4064_v27  ;;  %v4039_v44 = vmul.f32 %v5817_v3, %v4038_v31  ;;  %v4034_v38 = vsel %vm4031_vm11, %v4033_v52, %v4029_v46  ;;  %v4351_v22 = vld [vmem:[%s6188_s25 + $0x190] sm:$0xff] (%p5947_p5)  ;;  %v4353_v50 = vld [vmem:[%s6188_s25 + $0x198] sm:$0xff] (%p5947_p5)  ;;  %v4355_v31 = vld [vmem:[%s6188_s25 + $0x1a0] sm:$0xff] (%p5947_p5) }
 0x36f   : > { %4223 = vst [vmem:[%s6188_s25 + $0x4e8] sm:$0xff] %v4034_v38  ;;  %v4357_v27 = vld [vmem:[%s6188_s25 + $0x1a8] sm:$0xff] (%p5947_p5)  ;;  %v4359_v52 = vld [vmem:[%s6188_s25 + $0x1b0] sm:$0xff] (%p5947_p5)  ;;  %v4361_v55 = vld [vmem:[%s6188_s25 + $0x1b8] sm:$0xff] (%p5947_p5) }
 0x370   : > { %v4040_v19 = vadd.f32 %v5817_v3, %v4039_v44  ;;  %4232 = sbr.rel (!%p5947_p5) target bundleno = 1023 (0x3ff), region = 36  ;;  %4288 = vst [vmem:[%s8921_s7 + $0x1d0] sm:$0xff] (%p5947_p5), %v4287_v32  ;;  %v4363_v46 = vld [vmem:[%s6188_s25 + $0x1c0] sm:$0xff] (%p5947_p5)  ;;  %v4365_v44 = vld [vmem:[%s6188_s25 + $0x1c8] sm:$0xff] (%p5947_p5)  ;;  %v4367_v10 = vld [vmem:[%s6188_s25 + $0x1d0] sm:$0xff] (%p5947_p5) }
 0x371   : > { %4290 = vst [vmem:[%s8921_s7 + $0x1d8] sm:$0xff] (%p5947_p5), %v4289_v45  ;;  %v4369_v38 = vld [vmem:[%s6188_s25 + $0x1d8] sm:$0xff] (%p5947_p5)  ;;  %v4383_v25 = vld [vmem:[%s6188_s25 + $0x210] sm:$0xff] (%p5947_p5)  ;;  %v4395_v37 = vld [vmem:[%s6188_s25 + $0x240] sm:$0xff] (%p5947_p5) }
 0x372   : > { %v4044_v42 = vsel %vm4043_vm14, %v5817_v3, %v4040_v19  ;;  %4292 = vst [vmem:[%s8921_s7 + $0x320] sm:$0xff] (%p5947_p5), %v4291_v49  ;;  %v4335_v3 = vld [vmem:[%s6188_s25 + $0x150] sm:$0xff] (%p5947_p5)  ;;  %v4371_v19 = vld [vmem:[%s6188_s25 + $0x1e0] sm:$0xff] (%p5947_p5)  ;;  %v4393_v39 = vld [vmem:[%s6188_s25 + $0x238] sm:$0xff] (%p5947_p5) }
 0x373   : > { %v4049_v48 = vsel %vm4046_vm15, %v4048_v5, %v4044_v42  ;;  %4294 = vst [vmem:[%s8921_s7 + $0x328] sm:$0xff] (%p5947_p5), %v4293_v33  ;;  %v4373_v5 = vld [vmem:[%s6188_s25 + $0x1e8] sm:$0xff] (%p5947_p5)  ;;  %v4375_v42 = vld [vmem:[%s6188_s25 + $0x1f0] sm:$0xff] (%p5947_p5)  ;;  %v4401_v6 = vld [vmem:[%s6188_s25 + $0x258] sm:$0xff] (%p5947_p5) }
 0x374   : > { %4224 = vst [vmem:[%s6188_s25 + $0x4f0] sm:$0xff] %v4049_v48  ;;  %v4377_v48 = vld [vmem:[%s6188_s25 + $0x1f8] sm:$0xff] (%p5947_p5)  ;;  %v4391_v56 = vld [vmem:[%s6188_s25 + $0x230] sm:$0xff] (%p5947_p5)  ;;  %v4397_v7 = vld [vmem:[%s6188_s25 + $0x248] sm:$0xff] (%p5947_p5) }
 0x375   : > { %4296 = vst [vmem:[%s8921_s7 + $0x330] sm:$0xff] %v4295_v61  ;;  %v4399_v23 = vld [vmem:[%s6188_s25 + $0x250] sm:$0xff]  ;;  %v4403_v30 = vld [vmem:[%s6188_s25 + $0x260] sm:$0xff]  ;;  %v4405_v60 = vld [vmem:[%s6188_s25 + $0x268] sm:$0xff] }
 0x376   : > { %4298 = vst [vmem:[%s8921_s7 + $0x338] sm:$0xff] %v4297_v28  ;;  %v4407_v8 = vld [vmem:[%s6188_s25 + $0x270] sm:$0xff]  ;;  %v4409_v41 = vld [vmem:[%s6188_s25 + $0x278] sm:$0xff]  ;;  %v4411_v15 = vld [vmem:[%s6188_s25 + $0x280] sm:$0xff] }
 0x377   : > { %4300 = vst [vmem:[%s8921_s7 + $0x340] sm:$0xff] %v4299_v26  ;;  %v4413_v16 = vld [vmem:[%s6188_s25 + $0x288] sm:$0xff]  ;;  %v4415_v32 = vld [vmem:[%s6188_s25 + $0x290] sm:$0xff]  ;;  %v4417_v45 = vld [vmem:[%s6188_s25 + $0x298] sm:$0xff] }
 0x378   : > { %4302 = vst [vmem:[%s8921_s7 + $0x348] sm:$0xff] %v4301_v36  ;;  %v4419_v49 = vld [vmem:[%s6188_s25 + $0x2a0] sm:$0xff]  ;;  %v4421_v33 = vld [vmem:[%s6188_s25 + $0x2a8] sm:$0xff]  ;;  %v4423_v61 = vld [vmem:[%s6188_s25 + $0x2b0] sm:$0xff] }
 0x379   : > { %4304 = vst [vmem:[%s8921_s7 + $0x350] sm:$0xff] %v4303_v59  ;;  %v4425_v28 = vld [vmem:[%s6188_s25 + $0x2b8] sm:$0xff]  ;;  %v4427_v26 = vld [vmem:[%s6188_s25 + $0x2c0] sm:$0xff]  ;;  %v4429_v36 = vld [vmem:[%s6188_s25 + $0x2c8] sm:$0xff] }
 0x37a   : > { %4306 = vst [vmem:[%s8921_s7 + $0x358] sm:$0xff] %v4305_v47  ;;  %v4431_v59 = vld [vmem:[%s6188_s25 + $0x2d0] sm:$0xff]  ;;  %v4433_v47 = vld [vmem:[%s6188_s25 + $0x2d8] sm:$0xff] }
 0x37b   : > { %4308 = vst [vmem:[%s8921_s7 + $0x360] sm:$0xff] %v4307_v58  ;;  %v4435_v58 = vld [vmem:[%s6188_s25 + $0x2e0] sm:$0xff] }
 0x37c   : > { %4310 = vst [vmem:[%s8921_s7 + $0x368] sm:$0xff] %v4309_v1  ;;  %v4437_v1 = vld [vmem:[%s6188_s25 + $0x2e8] sm:$0xff] }
 0x37d   : > { %4312 = vst [vmem:[%s8921_s7 + $0x4b0] sm:$0xff] %v4311_v18  ;;  %v4439_v18 = vld [vmem:[%s6188_s25 + $0x2f0] sm:$0xff] }
 0x37e   : > { %4314 = vst [vmem:[%s8921_s7 + $0x4b8] sm:$0xff] %v4313_v43  ;;  %v4441_v43 = vld [vmem:[%s6188_s25 + $0x2f8] sm:$0xff] }
 0x37f   : > { %4316 = vst [vmem:[%s8921_s7 + $0x4c0] sm:$0xff] %v4315_v11  ;;  %v4443_v11 = vld [vmem:[%s6188_s25 + $0x300] sm:$0xff] }
 0x380   : > { %4318 = vst [vmem:[%s8921_s7 + $0x4c8] sm:$0xff] %v4317_v34  ;;  %v4445_v34 = vld [vmem:[%s6188_s25 + $0x308] sm:$0xff] }
 0x381   : > { %4320 = vst [vmem:[%s8921_s7 + $0x4d0] sm:$0xff] %v4319_v54  ;;  %v4447_v54 = vld [vmem:[%s6188_s25 + $0x310] sm:$0xff] }
 0x382   : > { %4322 = vst [vmem:[%s8921_s7 + $0x4d8] sm:$0xff] %v4321_v62  ;;  %v4449_v62 = vld [vmem:[%s6188_s25 + $0x318] sm:$0xff] }
 0x383   : > { %4324 = vst [vmem:[%s8921_s7 + $0x4e0] sm:$0xff] %v4323_v20  ;;  %v4451_v20 = vld [vmem:[%s6188_s25 + $0x320] sm:$0xff] }
 0x384   : > { %4326 = vst [vmem:[%s8921_s7 + $0x4e8] sm:$0xff] %v4325_v14  ;;  %v4453_v14 = vld [vmem:[%s6188_s25 + $0x328] sm:$0xff] }
 0x385   : > { %4328 = vst [vmem:[%s8921_s7 + $0x4f0] sm:$0xff] %v4327_v0  ;;  %v4455_v0 = vld [vmem:[%s6188_s25 + $0x330] sm:$0xff] }
 0x386   : > { %4330 = vst [vmem:[%s8921_s7 + $0x4f8] sm:$0xff] %v4329_v57  ;;  %v4457_v57 = vld [vmem:[%s6188_s25 + $0x338] sm:$0xff] }
 0x387   : > { %4332 = vst [vmem:[%s8921_s7 + $0x640] sm:$0xff] %v4331_v24  ;;  %v4459_v24 = vld [vmem:[%s6188_s25 + $0x340] sm:$0xff] }
 0x388   : > { %4334 = vst [vmem:[%s8921_s7 + $0x648] sm:$0xff] %v4333_v12  ;;  %v4461_v12 = vld [vmem:[%s6188_s25 + $0x348] sm:$0xff] }
 0x389   : > { %4336 = vst [vmem:[%s8921_s7 + $0x650] sm:$0xff] %v4335_v3  ;;  %v4463_v3 = vld [vmem:[%s6188_s25 + $0x350] sm:$0xff] }
 0x38a   : > { %4338 = vst [vmem:[%s8921_s7 + $0x658] sm:$0xff] %v4337_v35  ;;  %v4465_v35 = vld [vmem:[%s6188_s25 + $0x358] sm:$0xff] }
 0x38b   : > { %4340 = vst [vmem:[%s8921_s7 + $0x660] sm:$0xff] %v4339_v4  ;;  %v4467_v4 = vld [vmem:[%s6188_s25 + $0x360] sm:$0xff] }
 0x38c   : > { %4342 = vst [vmem:[%s8921_s7 + $0x668] sm:$0xff] %v4341_v29  ;;  %v4469_v29 = vld [vmem:[%s6188_s25 + $0x368] sm:$0xff] }
 0x38d   : > { %4344 = vst [vmem:[%s8921_s7 + $0x670] sm:$0xff] %v4343_v53  ;;  %v4471_v53 = vld [vmem:[%s6188_s25 + $0x370] sm:$0xff] }
 0x38e   : > { %4346 = vst [vmem:[%s8921_s7 + $0x678] sm:$0xff] %v4345_v51  ;;  %v4473_v51 = vld [vmem:[%s6188_s25 + $0x378] sm:$0xff] }
 0x38f   : > { %4348 = vst [vmem:[%s8921_s7 + $0x680] sm:$0xff] %v4347_v9  ;;  %v4475_v9 = vld [vmem:[%s6188_s25 + $0x380] sm:$0xff] }
 0x390   : > { %4350 = vst [vmem:[%s8921_s7 + $0x688] sm:$0xff] %v4349_v40  ;;  %v4477_v40 = vld [vmem:[%s6188_s25 + $0x388] sm:$0xff] }
 0x391   : > { %4352 = vst [vmem:[%s8921_s7 + $0x7d0] sm:$0xff] %v4351_v22  ;;  %v4479_v22 = vld [vmem:[%s6188_s25 + $0x390] sm:$0xff] }
 0x392   : > { %4354 = vst [vmem:[%s8921_s7 + $0x7d8] sm:$0xff] %v4353_v50  ;;  %v4481_v50 = vld [vmem:[%s6188_s25 + $0x398] sm:$0xff] }
 0x393   : > { %4356 = vst [vmem:[%s8921_s7 + $0x7e0] sm:$0xff] %v4355_v31  ;;  %v4483_v31 = vld [vmem:[%s6188_s25 + $0x3a0] sm:$0xff] }
 0x394   : > { %4358 = vst [vmem:[%s8921_s7 + $0x7e8] sm:$0xff] %v4357_v27  ;;  %v4485_v27 = vld [vmem:[%s6188_s25 + $0x3a8] sm:$0xff] }
 0x395   : > { %4360 = vst [vmem:[%s8921_s7 + $0x7f0] sm:$0xff] %v4359_v52  ;;  %v4487_v52 = vld [vmem:[%s6188_s25 + $0x3b0] sm:$0xff] }
 0x396   : > { %4362 = vst [vmem:[%s8921_s7 + $0x7f8] sm:$0xff] %v4361_v55  ;;  %v4489_v55 = vld [vmem:[%s6188_s25 + $0x3b8] sm:$0xff] }
 0x397   : > { %4364 = vst [vmem:[%s8921_s7 + $0x800] sm:$0xff] %v4363_v46  ;;  %v4491_v46 = vld [vmem:[%s6188_s25 + $0x3c0] sm:$0xff] }
 0x398   : > { %4366 = vst [vmem:[%s8921_s7 + $0x808] sm:$0xff] %v4365_v44  ;;  %v4493_v44 = vld [vmem:[%s6188_s25 + $0x3c8] sm:$0xff] }
 0x399   : > { %4368 = vst [vmem:[%s8921_s7 + $0x810] sm:$0xff] %v4367_v10  ;;  %v4495_v10 = vld [vmem:[%s6188_s25 + $0x3d0] sm:$0xff] }
 0x39a   : > { %4370 = vst [vmem:[%s8921_s7 + $0x818] sm:$0xff] %v4369_v38  ;;  %v4497_v38 = vld [vmem:[%s6188_s25 + $0x3d8] sm:$0xff] }
 0x39b   : > { %4372 = vst [vmem:[%s8921_s7 + $0x960] sm:$0xff] %v4371_v19  ;;  %v4499_v19 = vld [vmem:[%s6188_s25 + $0x3e0] sm:$0xff] }
 0x39c   : > { %4374 = vst [vmem:[%s8921_s7 + $0x968] sm:$0xff] %v4373_v5  ;;  %v4501_v5 = vld [vmem:[%s6188_s25 + $0x3e8] sm:$0xff] }
 0x39d   : > { %4376 = vst [vmem:[%s8921_s7 + $0x970] sm:$0xff] %v4375_v42  ;;  %v4503_v42 = vld [vmem:[%s6188_s25 + $0x3f0] sm:$0xff] }
 0x39e   : > { %4378 = vst [vmem:[%s8921_s7 + $0x978] sm:$0xff] %v4377_v48  ;;  %v4505_v48 = vld [vmem:[%s6188_s25 + $0x3f8] sm:$0xff] }
 0x39f   : > { %4380 = vst [vmem:[%s8921_s7 + $0x980] sm:$0xff] %v4379_v13  ;;  %v4507_v13 = vld [vmem:[%s6188_s25 + $0x400] sm:$0xff] }
 0x3a0   : > { %4382 = vst [vmem:[%s8921_s7 + $0x988] sm:$0xff] %v4381_v2  ;;  %v4509_v2 = vld [vmem:[%s6188_s25 + $0x408] sm:$0xff] }
 0x3a1   : > { %4384 = vst [vmem:[%s8921_s7 + $0x990] sm:$0xff] %v4383_v25  ;;  %v4511_v25 = vld [vmem:[%s6188_s25 + $0x410] sm:$0xff] }
 0x3a2   : > { %4386 = vst [vmem:[%s8921_s7 + $0x998] sm:$0xff] %v4385_v63  ;;  %v4513_v63 = vld [vmem:[%s6188_s25 + $0x418] sm:$0xff] }
 0x3a3   : > { %4388 = vst [vmem:[%s8921_s7 + $0x9a0] sm:$0xff] %v4387_v17  ;;  %v4515_v17 = vld [vmem:[%s6188_s25 + $0x420] sm:$0xff] }
 0x3a4   : > { %4390 = vst [vmem:[%s8921_s7 + $0x9a8] sm:$0xff] %v4389_v21  ;;  %v4517_v21 = vld [vmem:[%s6188_s25 + $0x428] sm:$0xff] }
 0x3a5   : > { %4392 = vst [vmem:[%s8921_s7 + $0xaf0] sm:$0xff] %v4391_v56  ;;  %v4519_v56 = vld [vmem:[%s6188_s25 + $0x430] sm:$0xff] }
 0x3a6   : > { %4394 = vst [vmem:[%s8921_s7 + $0xaf8] sm:$0xff] %v4393_v39  ;;  %v4521_v39 = vld [vmem:[%s6188_s25 + $0x438] sm:$0xff] }
 0x3a7   : > { %4396 = vst [vmem:[%s8921_s7 + $0xb00] sm:$0xff] %v4395_v37  ;;  %v4523_v37 = vld [vmem:[%s6188_s25 + $0x440] sm:$0xff] }
 0x3a8   : > { %4398 = vst [vmem:[%s8921_s7 + $0xb08] sm:$0xff] %v4397_v7  ;;  %v4525_v7 = vld [vmem:[%s6188_s25 + $0x448] sm:$0xff] }
 0x3a9   : > { %4400 = vst [vmem:[%s8921_s7 + $0xb10] sm:$0xff] %v4399_v23  ;;  %v4527_v23 = vld [vmem:[%s6188_s25 + $0x450] sm:$0xff] }
 0x3aa   : > { %4402 = vst [vmem:[%s8921_s7 + $0xb18] sm:$0xff] %v4401_v6  ;;  %v4529_v6 = vld [vmem:[%s6188_s25 + $0x458] sm:$0xff] }
 0x3ab   : > { %4404 = vst [vmem:[%s8921_s7 + $0xb20] sm:$0xff] %v4403_v30  ;;  %v4531_v30 = vld [vmem:[%s6188_s25 + $0x460] sm:$0xff] }
 0x3ac   : > { %4406 = vst [vmem:[%s8921_s7 + $0xb28] sm:$0xff] %v4405_v60  ;;  %v4533_v60 = vld [vmem:[%s6188_s25 + $0x468] sm:$0xff] }
 0x3ad   : > { %4408 = vst [vmem:[%s8921_s7 + $0xb30] sm:$0xff] %v4407_v8  ;;  %v4535_v8 = vld [vmem:[%s6188_s25 + $0x470] sm:$0xff] }
 0x3ae   : > { %4410 = vst [vmem:[%s8921_s7 + $0xb38] sm:$0xff] %v4409_v41  ;;  %v4537_v41 = vld [vmem:[%s6188_s25 + $0x478] sm:$0xff] }
 0x3af   : > { %4412 = vst [vmem:[%s8921_s7 + $0xc80] sm:$0xff] %v4411_v15  ;;  %v4539_v15 = vld [vmem:[%s6188_s25 + $0x480] sm:$0xff] }
 0x3b0   : > { %4414 = vst [vmem:[%s8921_s7 + $0xc88] sm:$0xff] %v4413_v16  ;;  %v4541_v16 = vld [vmem:[%s6188_s25 + $0x488] sm:$0xff] }
 0x3b1   : > { %4416 = vst [vmem:[%s8921_s7 + $0xc90] sm:$0xff] %v4415_v32  ;;  %v4543_v32 = vld [vmem:[%s6188_s25 + $0x490] sm:$0xff] }
 0x3b2   : > { %4418 = vst [vmem:[%s8921_s7 + $0xc98] sm:$0xff] %v4417_v45  ;;  %v4545_v45 = vld [vmem:[%s6188_s25 + $0x498] sm:$0xff] }
 0x3b3   : > { %4420 = vst [vmem:[%s8921_s7 + $0xca0] sm:$0xff] %v4419_v49  ;;  %v4547_v49 = vld [vmem:[%s6188_s25 + $0x4a0] sm:$0xff] }
 0x3b4   : > { %4422 = vst [vmem:[%s8921_s7 + $0xca8] sm:$0xff] %v4421_v33  ;;  %v4549_v33 = vld [vmem:[%s6188_s25 + $0x4a8] sm:$0xff] }
 0x3b5   : > { %4424 = vst [vmem:[%s8921_s7 + $0xcb0] sm:$0xff] %v4423_v61  ;;  %v4551_v61 = vld [vmem:[%s6188_s25 + $0x4b0] sm:$0xff] }
 0x3b6   : > { %4426 = vst [vmem:[%s8921_s7 + $0xcb8] sm:$0xff] %v4425_v28  ;;  %v4553_v28 = vld [vmem:[%s6188_s25 + $0x4b8] sm:$0xff] }
 0x3b7   : > { %4428 = vst [vmem:[%s8921_s7 + $0xcc0] sm:$0xff] %v4427_v26  ;;  %v4555_v26 = vld [vmem:[%s6188_s25 + $0x4c0] sm:$0xff] }
 0x3b8   : > { %4430 = vst [vmem:[%s8921_s7 + $0xcc8] sm:$0xff] %v4429_v36  ;;  %v4557_v36 = vld [vmem:[%s6188_s25 + $0x4c8] sm:$0xff] }
 0x3b9   : > { %4432 = vst [vmem:[%s8921_s7 + $0xe10] sm:$0xff] %v4431_v59  ;;  %v4559_v59 = vld [vmem:[%s6188_s25 + $0x4d0] sm:$0xff] }
 0x3ba   : > { %4434 = vst [vmem:[%s8921_s7 + $0xe18] sm:$0xff] %v4433_v47  ;;  %v4561_v47 = vld [vmem:[%s6188_s25 + $0x4d8] sm:$0xff] }
 0x3bb   : > { %4436 = vst [vmem:[%s8921_s7 + $0xe20] sm:$0xff] %v4435_v58  ;;  %v4563_v58 = vld [vmem:[%s6188_s25 + $0x4e0] sm:$0xff] }
 0x3bc   : > { %4438 = vst [vmem:[%s8921_s7 + $0xe28] sm:$0xff] %v4437_v1  ;;  %v4565_v1 = vld [vmem:[%s6188_s25 + $0x4e8] sm:$0xff] }
 0x3bd   : > { %4440 = vst [vmem:[%s8921_s7 + $0xe30] sm:$0xff] %v4439_v18  ;;  %v4567_v18 = vld [vmem:[%s6188_s25 + $0x4f0] sm:$0xff] }
 0x3be   : > { %4442 = vst [vmem:[%s8921_s7 + $0xe38] sm:$0xff] %v4441_v43  ;;  %v4569_v43 = vld [vmem:[%s6188_s25 + $0x4f8] sm:$0xff] }
 0x3bf   : > { %4444 = vst [vmem:[%s8921_s7 + $0xe40] sm:$0xff] %v4443_v11 }
 0x3c0   : > { %4446 = vst [vmem:[%s8921_s7 + $0xe48] sm:$0xff] %v4445_v34 }
 0x3c1   : > { %4448 = vst [vmem:[%s8921_s7 + $0xe50] sm:$0xff] %v4447_v54 }
 0x3c2   : > { %4450 = vst [vmem:[%s8921_s7 + $0xe58] sm:$0xff] %v4449_v62 }
 0x3c3   : > { %4452 = vst [vmem:[%s8921_s7 + $0xfa0] sm:$0xff] %v4451_v20 }
 0x3c4   : > { %4454 = vst [vmem:[%s8921_s7 + $0xfa8] sm:$0xff] %v4453_v14 }
 0x3c5   : > { %4456 = vst [vmem:[%s8921_s7 + $0xfb0] sm:$0xff] %v4455_v0 }
 0x3c6   : > { %4458 = vst [vmem:[%s8921_s7 + $0xfb8] sm:$0xff] %v4457_v57 }
 0x3c7   : > { %4460 = vst [vmem:[%s8921_s7 + $0xfc0] sm:$0xff] %v4459_v24 }
 0x3c8   : > { %4462 = vst [vmem:[%s8921_s7 + $0xfc8] sm:$0xff] %v4461_v12 }
 0x3c9   : > { %4464 = vst [vmem:[%s8921_s7 + $0xfd0] sm:$0xff] %v4463_v3 }
 0x3ca   : > { %4466 = vst [vmem:[%s8921_s7 + $0xfd8] sm:$0xff] %v4465_v35 }
 0x3cb   : > { %4468 = vst [vmem:[%s8921_s7 + $0xfe0] sm:$0xff] %v4467_v4 }
 0x3cc   : > { %4470 = vst [vmem:[%s8921_s7 + $0xfe8] sm:$0xff] %v4469_v29 }
 0x3cd   : > { %4472 = vst [vmem:[%s8921_s7 + $0x1130] sm:$0xff] %v4471_v53 }
 0x3ce   : > { %4474 = vst [vmem:[%s8921_s7 + $0x1138] sm:$0xff] %v4473_v51 }
 0x3cf   : > { %4476 = vst [vmem:[%s8921_s7 + $0x1140] sm:$0xff] %v4475_v9 }
 0x3d0   : > { %4478 = vst [vmem:[%s8921_s7 + $0x1148] sm:$0xff] %v4477_v40 }
 0x3d1   : > { %4480 = vst [vmem:[%s8921_s7 + $0x1150] sm:$0xff] %v4479_v22 }
 0x3d2   : > { %4482 = vst [vmem:[%s8921_s7 + $0x1158] sm:$0xff] %v4481_v50 }
 0x3d3   : > { %4484 = vst [vmem:[%s8921_s7 + $0x1160] sm:$0xff] %v4483_v31 }
 0x3d4   : > { %4486 = vst [vmem:[%s8921_s7 + $0x1168] sm:$0xff] %v4485_v27 }
 0x3d5   : > { %4488 = vst [vmem:[%s8921_s7 + $0x1170] sm:$0xff] %v4487_v52 }
 0x3d6   : > { %4490 = vst [vmem:[%s8921_s7 + $0x1178] sm:$0xff] %v4489_v55 }
 0x3d7   : > { %4492 = vst [vmem:[%s8921_s7 + $0x12c0] sm:$0xff] %v4491_v46 }
 0x3d8   : > { %4494 = vst [vmem:[%s8921_s7 + $0x12c8] sm:$0xff] %v4493_v44 }
 0x3d9   : > { %4496 = vst [vmem:[%s8921_s7 + $0x12d0] sm:$0xff] %v4495_v10 }
 0x3da   : > { %4498 = vst [vmem:[%s8921_s7 + $0x12d8] sm:$0xff] %v4497_v38 }
 0x3db   : > { %4500 = vst [vmem:[%s8921_s7 + $0x12e0] sm:$0xff] %v4499_v19 }
 0x3dc   : > { %4502 = vst [vmem:[%s8921_s7 + $0x12e8] sm:$0xff] %v4501_v5 }
 0x3dd   : > { %4504 = vst [vmem:[%s8921_s7 + $0x12f0] sm:$0xff] %v4503_v42 }
 0x3de   : > { %4506 = vst [vmem:[%s8921_s7 + $0x12f8] sm:$0xff] %v4505_v48 }
 0x3df   : > { %4508 = vst [vmem:[%s8921_s7 + $0x1300] sm:$0xff] %v4507_v13 }
 0x3e0   : > { %4510 = vst [vmem:[%s8921_s7 + $0x1308] sm:$0xff] %v4509_v2 }
 0x3e1   : > { %4512 = vst [vmem:[%s8921_s7 + $0x1450] sm:$0xff] %v4511_v25 }
 0x3e2   : > { %4514 = vst [vmem:[%s8921_s7 + $0x1458] sm:$0xff] %v4513_v63 }
 0x3e3   : > { %4516 = vst [vmem:[%s8921_s7 + $0x1460] sm:$0xff] %v4515_v17 }
 0x3e4   : > { %4518 = vst [vmem:[%s8921_s7 + $0x1468] sm:$0xff] %v4517_v21 }
 0x3e5   : > { %4520 = vst [vmem:[%s8921_s7 + $0x1470] sm:$0xff] %v4519_v56 }
 0x3e6   : > { %4522 = vst [vmem:[%s8921_s7 + $0x1478] sm:$0xff] %v4521_v39 }
 0x3e7   : > { %4524 = vst [vmem:[%s8921_s7 + $0x1480] sm:$0xff] %v4523_v37 }
 0x3e8   : > { %4526 = vst [vmem:[%s8921_s7 + $0x1488] sm:$0xff] %v4525_v7 }
 0x3e9   : > { %4528 = vst [vmem:[%s8921_s7 + $0x1490] sm:$0xff] %v4527_v23 }
 0x3ea   : > { %4530 = vst [vmem:[%s8921_s7 + $0x1498] sm:$0xff] %v4529_v6 }
 0x3eb   : > { %4532 = vst [vmem:[%s8921_s7 + $0x15e0] sm:$0xff] %v4531_v30 }
 0x3ec   : > { %4534 = vst [vmem:[%s8921_s7 + $0x15e8] sm:$0xff] %v4533_v60 }
 0x3ed   : > { %4536 = vst [vmem:[%s8921_s7 + $0x15f0] sm:$0xff] %v4535_v8 }
 0x3ee   : > { %4538 = vst [vmem:[%s8921_s7 + $0x15f8] sm:$0xff] %v4537_v41 }
 0x3ef   : > { %4540 = vst [vmem:[%s8921_s7 + $0x1600] sm:$0xff] %v4539_v15 }
 0x3f0   : > { %4542 = vst [vmem:[%s8921_s7 + $0x1608] sm:$0xff] %v4541_v16 }
 0x3f1   : > { %4544 = vst [vmem:[%s8921_s7 + $0x1610] sm:$0xff] %v4543_v32 }
 0x3f2   : > { %4546 = vst [vmem:[%s8921_s7 + $0x1618] sm:$0xff] %v4545_v45 }
 0x3f3   : > { %4548 = vst [vmem:[%s8921_s7 + $0x1620] sm:$0xff] %v4547_v49 }
 0x3f4   : > { %4550 = vst [vmem:[%s8921_s7 + $0x1628] sm:$0xff] %v4549_v33 }
 0x3f5   : > { %4552 = vst [vmem:[%s8921_s7 + $0x1770] sm:$0xff] %v4551_v61 }
 0x3f6   : > { %4554 = vst [vmem:[%s8921_s7 + $0x1778] sm:$0xff] %v4553_v28 }
 0x3f7   : > { %4556 = vst [vmem:[%s8921_s7 + $0x1780] sm:$0xff] %v4555_v26 }
 0x3f8   : > { %4558 = vst [vmem:[%s8921_s7 + $0x1788] sm:$0xff] %v4557_v36 }
 0x3f9   : > { %4560 = vst [vmem:[%s8921_s7 + $0x1790] sm:$0xff] %v4559_v59 }
 0x3fa   : > { %4562 = vst [vmem:[%s8921_s7 + $0x1798] sm:$0xff] %v4561_v47 }
 0x3fb   : > { %4564 = vst [vmem:[%s8921_s7 + $0x17a0] sm:$0xff] %v4563_v58 }
 0x3fc   : > { %4566 = vst [vmem:[%s8921_s7 + $0x17a8] sm:$0xff] %v4565_v1 }
 0x3fd   : > { %4568 = vst [vmem:[%s8921_s7 + $0x17b0] sm:$0xff] %v4567_v18 }
 0x3fe   : > { %4570 = vst [vmem:[%s8921_s7 + $0x17b8] sm:$0xff] %v4569_v43 }
 0x3ff PF: > { %s13_s18 = sadd.s32 1, %s5879_s18   ;;  %s9521_s12 = smov %s5859_s13 }
 0x400   : > { %p10_p10 = scmp.ge.s32.totalorder %s13_s18, 12   ;;  %s9522_s13 = smov %s5958_s27 }
 0x401   : > { %s9523_s14 = smov %s5871_s16  ;;  %s9524_s15 = smov %s5875_s17 }
 0x402   : > { %s9525_s16 = smov %s9528_s19  ;;  %s9526_s17 = smov %s9532_s20 }
 0x403   :  { %12 = sbr.rel (!%p10_p10) target bundleno = 4 (0x4), region = 86 }

</bundles_post_ra>
